<compile_context>
chip_gen: v7x
topology: tpu7x:2x2x1
jax: 0.10.0
libtpu: 0.0.40
codegen_flags: <defaults>
</compile_context>

<pallas_src>
import functools

import jax
import jax.numpy as jnp
from jax.experimental import pallas as pl
from jax.experimental.pallas import tpu as pltpu


def _convlstm_kernel(comb_ref, w_ref, b_ref, c_ref, hc_ref, *,
                     h_dim, m_rows, tap_starts):
    """One batch element per grid step.

    comb_ref : (S_pad, c_in)        bf16  flattened, spatially padded concat([x, h])
    w_ref    : (KH*KW, c_in, 4h)    bf16  per-tap conv weights (resident)
    b_ref    : (1, 4h)              f32   conv bias
    c_ref    : (m_rows, h_dim)      f32   c_cur rows (padded-width layout)
    hc_ref   : (m_rows, 2*h_dim)    f32   [h_next | c_next] rows
    """
    # 3x3 "same" conv as 9 shifted-slice matmuls, f32 MXU accumulation.
    acc = jnp.zeros((m_rows, 4 * h_dim), jnp.float32)
    for t, start in enumerate(tap_starts):            # static Python loop (9 taps)
        slab = comb_ref[start:start + m_rows, :]      # (m_rows, c_in) bf16, static slice
        acc = acc + jnp.dot(slab, w_ref[t],
                            preferred_element_type=jnp.float32)
    acc = acc + b_ref[...]                            # bias broadcast, once

    # Gate order matches torch.split: [i | f | o | g].  One wide sigmoid over
    # the contiguous (i|f|o) slab, one tanh over g.  All elementwise math f32.
    sig = jax.nn.sigmoid(acc[:, :3 * h_dim])
    g = jnp.tanh(acc[:, 3 * h_dim:])

    i = sig[:, 0 * h_dim:1 * h_dim]
    f = sig[:, 1 * h_dim:2 * h_dim]
    o = sig[:, 2 * h_dim:3 * h_dim]

    c_cur = c_ref[...]
    c_next = f * c_cur + i * g
    h_next = o * jnp.tanh(c_next)

    # Two direct stores into the packed output (no concatenate temp).
    hc_ref[:, :h_dim] = h_next
    hc_ref[:, h_dim:] = c_next


def conv_lstm_cell(x_nchw, h_cur_nchw, c_cur_nchw, w_oihw, bias,
                   kernel_size=(3, 3)):
    """ConvLSTMCell.forward.  Inputs/outputs are NCHW (PyTorch convention).

    TODO(synk): in a multi-step rollout keep h/c in NHWC (and bf16 for h)
    across steps; the NCHW<->NHWC transposes here are model-boundary glue.
    """
    B, i_dim, H, W = x_nchw.shape
    h_dim = h_cur_nchw.shape[1]
    KH, KW = kernel_size
    ph, pw = KH // 2, KW // 2
    c_in = i_dim + h_dim
    c_out4 = 4 * h_dim

    Wp = W + 2 * pw                    # padded width (outputs computed on it too)
    m_rows = H * Wp                    # output rows per batch element
    S = (H + 2 * ph) * Wp              # flattened padded-spatial length

    # ---------------- glue (plain JAX): layout, bf16 cast, concat, pad -------
    x_nhwc = jnp.transpose(x_nchw, (0, 2, 3, 1)).astype(jnp.bfloat16)
    h_nhwc = jnp.transpose(h_cur_nchw, (0, 2, 3, 1)).astype(jnp.bfloat16)
    comb = jnp.concatenate([x_nhwc, h_nhwc], axis=-1)                 # (B,H,W,c_in)
    comb_pad = jnp.pad(comb, ((0, 0), (ph, ph), (pw, pw), (0, 0)))    # (B,H+2,W+2,c_in)
    comb_flat = comb_pad.reshape(B, S, c_in)
    # pw extra zero rows on each end so every shifted tap slice is in-bounds.
    comb_flat = jnp.pad(comb_flat, ((0, 0), (pw, pw), (0, 0)))        # (B,S+2pw,c_in)

    c_nhwc = jnp.transpose(c_cur_nchw, (0, 2, 3, 1)).astype(jnp.float32)
    c_pad = jnp.pad(c_nhwc, ((0, 0), (0, 0), (pw, pw), (0, 0)))       # (B,H,Wp,h)
    c_flat = c_pad.reshape(B, m_rows, h_dim)

    # PyTorch weight (Cout, Cin, KH, KW) -> (KH, KW, Cin, Cout) -> (KH*KW, Cin, Cout).
    w_taps = jnp.transpose(w_oihw, (2, 3, 1, 0)).reshape(KH * KW, c_in, c_out4)
    w_taps = w_taps.astype(jnp.bfloat16)
    b2d = bias.reshape(1, c_out4).astype(jnp.float32)

    # Flat-row offset of each (kh, kw) tap relative to an output row block.
    tap_starts = tuple(kh * Wp + kw for kh in range(KH) for kw in range(KW))

    kernel = functools.partial(_convlstm_kernel, h_dim=h_dim, m_rows=m_rows,
                               tap_starts=tap_starts)

    hc = pl.pallas_call(
        kernel,
        out_shape=jax.ShapeDtypeStruct((B, m_rows, 2 * h_dim), jnp.float32),
        grid_spec=pltpu.PrefetchScalarGridSpec(
            num_scalar_prefetch=0,
            grid=(B,),
            in_specs=[
                pl.BlockSpec((None, S + 2 * pw, c_in), lambda b: (b, 0, 0)),  # comb
                pl.BlockSpec((KH * KW, c_in, c_out4), lambda b: (0, 0, 0)),   # weights
                pl.BlockSpec((1, c_out4), lambda b: (0, 0)),                  # bias
                pl.BlockSpec((None, m_rows, h_dim), lambda b: (b, 0, 0)),     # c_cur
            ],
            out_specs=pl.BlockSpec((None, m_rows, 2 * h_dim), lambda b: (b, 0, 0)),
        ),
        compiler_params=pltpu.CompilerParams(
            dimension_semantics=("parallel",)),
    )(comb_flat, w_taps, b2d, c_flat)

    # Drop the two garbage edge columns, unpack h/c, back to NCHW.
    hc4 = hc.reshape(B, H, Wp, 2 * h_dim)[:, :, pw:pw + W, :]
    h_next = jnp.transpose(hc4[..., :h_dim], (0, 3, 1, 2))
    c_next = jnp.transpose(hc4[..., h_dim:], (0, 3, 1, 2))
    return h_next, c_next


def _reference(x, h_cur, c_cur, w_oihw, bias, kernel_size=(3, 3)):
    """Pure-JAX (f32) reference matching the PyTorch module."""
    KH, KW = kernel_size
    combined = jnp.concatenate([x, h_cur], axis=1)
    cc = jax.lax.conv_general_dilated(
        combined, w_oihw, window_strides=(1, 1),
        padding=((KH // 2, KH // 2), (KW // 2, KW // 2)),
        dimension_numbers=("NCHW", "OIHW", "NCHW"))
    cc = cc + bias.reshape(1, -1, 1, 1)
    cc_i, cc_f, cc_o, cc_g = jnp.split(cc, 4, axis=1)
    i = jax.nn.sigmoid(cc_i)
    f = jax.nn.sigmoid(cc_f)
    o = jax.nn.sigmoid(cc_o)
    g = jnp.tanh(cc_g)
    c_next = f * c_cur + i * g
    h_next = o * jnp.tanh(c_next)
    return h_next, c_next


if __name__ == "__main__":
    # Module config (small, consistent with the forward semantics).
    B, i_dim, h_dim = 2, 4, 32
    H, W = 16, 16
    KH, KW = 3, 3

    key = jax.random.PRNGKey(0)
    k_x, k_h, k_c, k_w, k_b = jax.random.split(key, 5)

    x = jax.random.normal(k_x, (B, i_dim, H, W), dtype=jnp.float32)
    h_cur = jax.random.normal(k_h, (B, h_dim, H, W), dtype=jnp.float32)
    c_cur = jax.random.normal(k_c, (B, h_dim, H, W), dtype=jnp.float32)

    # Deterministic "Conv2d(i_dim+h_dim, 4*h_dim, (3,3), bias=True)" params.
    fan_in = (i_dim + h_dim) * KH * KW
    bound = 1.0 / jnp.sqrt(fan_in)
    w_oihw = jax.random.uniform(k_w, (4 * h_dim, i_dim + h_dim, KH, KW),
                                minval=-bound, maxval=bound, dtype=jnp.float32)
    bias = jax.random.uniform(k_b, (4 * h_dim,),
                              minval=-bound, maxval=bound, dtype=jnp.float32)

    h_next, c_next = conv_lstm_cell(x, h_cur, c_cur, w_oihw, bias, (KH, KW))
    jax.block_until_ready((h_next, c_next))

    h_ref, c_ref = _reference(x, h_cur, c_cur, w_oihw, bias, (KH, KW))
    # bf16 MXU inputs (f32 accumulation): loosen tolerance vs the f32 reference.
    # NOTE: in long rollouts the recurrent h passes through bf16 every step;
    # error can accumulate relative to the f32 PyTorch module.
    assert jnp.allclose(h_next, h_ref, atol=2e-2, rtol=2e-2)
    assert jnp.allclose(c_next, c_ref, atol=2e-2, rtol=2e-2)

    print("KERNEL_OK")
</pallas_src>

<mosaic_0001>
module attributes {stable_mosaic.version = 11 : i64} {
  func.func @_convlstm_kernel(%arg0: i32, %arg1: memref<1x326x36xbf16, #tpu.memory_space<vmem>>, %arg2: memref<9x36x128xbf16, #tpu.memory_space<vmem>>, %arg3: memref<1x128xf32, #tpu.memory_space<vmem>>, %arg4: memref<1x288x32xf32, #tpu.memory_space<vmem>>, %arg5: memref<1x288x64xf32, #tpu.memory_space<vmem>>) attributes {dimension_semantics = [#tpu.dimension_semantics<parallel>], iteration_bounds = array<i64: 2>, scalar_prefetch = 0 : i64, scratch_operands = 0 : i64, tpu.core_type = #tpu.core_type<tc>, window_params = [{transform_indices = @transform_0, window_bounds = array<i64: 1, 326, 36>}, {pipeline_mode = #tpu.pipeline_mode<synchronous>, transform_indices = @transform_1, window_bounds = array<i64: 9, 36, 128>}, {pipeline_mode = #tpu.pipeline_mode<synchronous>, transform_indices = @transform_2, window_bounds = array<i64: 1, 128>}, {transform_indices = @transform_3, window_bounds = array<i64: 1, 288, 32>}, {transform_indices = @transform_4, window_bounds = array<i64: 1, 288, 64>}]} {
    %cst = arith.constant 0.000000e+00 : f32
    %0 = vector.broadcast %cst : f32 to vector<288x128xf32>
    %c0 = arith.constant 0 : index
    %c0_0 = arith.constant 0 : index
    %c0_1 = arith.constant 0 : index
    %1 = vector.load %arg1[%c0, %c0_0, %c0_1] : memref<1x326x36xbf16, #tpu.memory_space<vmem>>, vector<1x288x36xbf16>
    %2 = vector.shape_cast %1 : vector<1x288x36xbf16> to vector<288x36xbf16>
    %c0_2 = arith.constant 0 : index
    %c0_3 = arith.constant 0 : index
    %c0_4 = arith.constant 0 : index
    %3 = vector.load %arg2[%c0_2, %c0_3, %c0_4] : memref<9x36x128xbf16, #tpu.memory_space<vmem>>, vector<1x36x128xbf16>
    %4 = vector.shape_cast %3 : vector<1x36x128xbf16> to vector<36x128xbf16>
    %cst_5 = arith.constant dense<0.000000e+00> : vector<288x128xf32>
    %5 = tpu.matmul %2, %4, %cst_5 {dimension_numbers = #tpu.dot_dimension_numbers<[1], [0], [0], [1], [0, 0, 1, 1], [], []>} : vector<288x36xbf16>, vector<36x128xbf16>, vector<288x128xf32> -> vector<288x128xf32>
    %6 = arith.addf %0, %5 : vector<288x128xf32>
    %c0_6 = arith.constant 0 : index
    %c1 = arith.constant 1 : index
    %c0_7 = arith.constant 0 : index
    %7 = vector.load %arg1[%c0_6, %c1, %c0_7] : memref<1x326x36xbf16, #tpu.memory_space<vmem>>, vector<1x288x36xbf16>
    %8 = vector.shape_cast %7 : vector<1x288x36xbf16> to vector<288x36xbf16>
    %c1_8 = arith.constant 1 : index
    %c0_9 = arith.constant 0 : index
    %c0_10 = arith.constant 0 : index
    %9 = vector.load %arg2[%c1_8, %c0_9, %c0_10] : memref<9x36x128xbf16, #tpu.memory_space<vmem>>, vector<1x36x128xbf16>
    %10 = vector.shape_cast %9 : vector<1x36x128xbf16> to vector<36x128xbf16>
    %cst_11 = arith.constant dense<0.000000e+00> : vector<288x128xf32>
    %11 = tpu.matmul %8, %10, %cst_11 {dimension_numbers = #tpu.dot_dimension_numbers<[1], [0], [0], [1], [0, 0, 1, 1], [], []>} : vector<288x36xbf16>, vector<36x128xbf16>, vector<288x128xf32> -> vector<288x128xf32>
    %12 = arith.addf %6, %11 : vector<288x128xf32>
    %c0_12 = arith.constant 0 : index
    %c2 = arith.constant 2 : index
    %c0_13 = arith.constant 0 : index
    %13 = vector.load %arg1[%c0_12, %c2, %c0_13] : memref<1x326x36xbf16, #tpu.memory_space<vmem>>, vector<1x288x36xbf16>
    %14 = vector.shape_cast %13 : vector<1x288x36xbf16> to vector<288x36xbf16>
    %c2_14 = arith.constant 2 : index
    %c0_15 = arith.constant 0 : index
    %c0_16 = arith.constant 0 : index
    %15 = vector.load %arg2[%c2_14, %c0_15, %c0_16] : memref<9x36x128xbf16, #tpu.memory_space<vmem>>, vector<1x36x128xbf16>
    %16 = vector.shape_cast %15 : vector<1x36x128xbf16> to vector<36x128xbf16>
    %cst_17 = arith.constant dense<0.000000e+00> : vector<288x128xf32>
    %17 = tpu.matmul %14, %16, %cst_17 {dimension_numbers = #tpu.dot_dimension_numbers<[1], [0], [0], [1], [0, 0, 1, 1], [], []>} : vector<288x36xbf16>, vector<36x128xbf16>, vector<288x128xf32> -> vector<288x128xf32>
    %18 = arith.addf %12, %17 : vector<288x128xf32>
    %c0_18 = arith.constant 0 : index
    %c18 = arith.constant 18 : index
    %c0_19 = arith.constant 0 : index
    %19 = vector.load %arg1[%c0_18, %c18, %c0_19] : memref<1x326x36xbf16, #tpu.memory_space<vmem>>, vector<1x288x36xbf16>
    %20 = vector.shape_cast %19 : vector<1x288x36xbf16> to vector<288x36xbf16>
    %c3 = arith.constant 3 : index
    %c0_20 = arith.constant 0 : index
    %c0_21 = arith.constant 0 : index
    %21 = vector.load %arg2[%c3, %c0_20, %c0_21] : memref<9x36x128xbf16, #tpu.memory_space<vmem>>, vector<1x36x128xbf16>
    %22 = vector.shape_cast %21 : vector<1x36x128xbf16> to vector<36x128xbf16>
    %cst_22 = arith.constant dense<0.000000e+00> : vector<288x128xf32>
    %23 = tpu.matmul %20, %22, %cst_22 {dimension_numbers = #tpu.dot_dimension_numbers<[1], [0], [0], [1], [0, 0, 1, 1], [], []>} : vector<288x36xbf16>, vector<36x128xbf16>, vector<288x128xf32> -> vector<288x128xf32>
    %24 = arith.addf %18, %23 : vector<288x128xf32>
    %c0_23 = arith.constant 0 : index
    %c19 = arith.constant 19 : index
    %c0_24 = arith.constant 0 : index
    %25 = vector.load %arg1[%c0_23, %c19, %c0_24] : memref<1x326x36xbf16, #tpu.memory_space<vmem>>, vector<1x288x36xbf16>
    %26 = vector.shape_cast %25 : vector<1x288x36xbf16> to vector<288x36xbf16>
    %c4 = arith.constant 4 : index
    %c0_25 = arith.constant 0 : index
    %c0_26 = arith.constant 0 : index
    %27 = vector.load %arg2[%c4, %c0_25, %c0_26] : memref<9x36x128xbf16, #tpu.memory_space<vmem>>, vector<1x36x128xbf16>
    %28 = vector.shape_cast %27 : vector<1x36x128xbf16> to vector<36x128xbf16>
    %cst_27 = arith.constant dense<0.000000e+00> : vector<288x128xf32>
    %29 = tpu.matmul %26, %28, %cst_27 {dimension_numbers = #tpu.dot_dimension_numbers<[1], [0], [0], [1], [0, 0, 1, 1], [], []>} : vector<288x36xbf16>, vector<36x128xbf16>, vector<288x128xf32> -> vector<288x128xf32>
    %30 = arith.addf %24, %29 : vector<288x128xf32>
    %c0_28 = arith.constant 0 : index
    %c20 = arith.constant 20 : index
    %c0_29 = arith.constant 0 : index
    %31 = vector.load %arg1[%c0_28, %c20, %c0_29] : memref<1x326x36xbf16, #tpu.memory_space<vmem>>, vector<1x288x36xbf16>
    %32 = vector.shape_cast %31 : vector<1x288x36xbf16> to vector<288x36xbf16>
    %c5 = arith.constant 5 : index
    %c0_30 = arith.constant 0 : index
    %c0_31 = arith.constant 0 : index
    %33 = vector.load %arg2[%c5, %c0_30, %c0_31] : memref<9x36x128xbf16, #tpu.memory_space<vmem>>, vector<1x36x128xbf16>
    %34 = vector.shape_cast %33 : vector<1x36x128xbf16> to vector<36x128xbf16>
    %cst_32 = arith.constant dense<0.000000e+00> : vector<288x128xf32>
    %35 = tpu.matmul %32, %34, %cst_32 {dimension_numbers = #tpu.dot_dimension_numbers<[1], [0], [0], [1], [0, 0, 1, 1], [], []>} : vector<288x36xbf16>, vector<36x128xbf16>, vector<288x128xf32> -> vector<288x128xf32>
    %36 = arith.addf %30, %35 : vector<288x128xf32>
    %c0_33 = arith.constant 0 : index
    %c36 = arith.constant 36 : index
    %c0_34 = arith.constant 0 : index
    %37 = vector.load %arg1[%c0_33, %c36, %c0_34] : memref<1x326x36xbf16, #tpu.memory_space<vmem>>, vector<1x288x36xbf16>
    %38 = vector.shape_cast %37 : vector<1x288x36xbf16> to vector<288x36xbf16>
    %c6 = arith.constant 6 : index
    %c0_35 = arith.constant 0 : index
    %c0_36 = arith.constant 0 : index
    %39 = vector.load %arg2[%c6, %c0_35, %c0_36] : memref<9x36x128xbf16, #tpu.memory_space<vmem>>, vector<1x36x128xbf16>
    %40 = vector.shape_cast %39 : vector<1x36x128xbf16> to vector<36x128xbf16>
    %cst_37 = arith.constant dense<0.000000e+00> : vector<288x128xf32>
    %41 = tpu.matmul %38, %40, %cst_37 {dimension_numbers = #tpu.dot_dimension_numbers<[1], [0], [0], [1], [0, 0, 1, 1], [], []>} : vector<288x36xbf16>, vector<36x128xbf16>, vector<288x128xf32> -> vector<288x128xf32>
    %42 = arith.addf %36, %41 : vector<288x128xf32>
    %c0_38 = arith.constant 0 : index
    %c37 = arith.constant 37 : index
    %c0_39 = arith.constant 0 : index
    %43 = vector.load %arg1[%c0_38, %c37, %c0_39] : memref<1x326x36xbf16, #tpu.memory_space<vmem>>, vector<1x288x36xbf16>
    %44 = vector.shape_cast %43 : vector<1x288x36xbf16> to vector<288x36xbf16>
    %c7 = arith.constant 7 : index
    %c0_40 = arith.constant 0 : index
    %c0_41 = arith.constant 0 : index
    %45 = vector.load %arg2[%c7, %c0_40, %c0_41] : memref<9x36x128xbf16, #tpu.memory_space<vmem>>, vector<1x36x128xbf16>
    %46 = vector.shape_cast %45 : vector<1x36x128xbf16> to vector<36x128xbf16>
    %cst_42 = arith.constant dense<0.000000e+00> : vector<288x128xf32>
    %47 = tpu.matmul %44, %46, %cst_42 {dimension_numbers = #tpu.dot_dimension_numbers<[1], [0], [0], [1], [0, 0, 1, 1], [], []>} : vector<288x36xbf16>, vector<36x128xbf16>, vector<288x128xf32> -> vector<288x128xf32>
    %48 = arith.addf %42, %47 : vector<288x128xf32>
    %c0_43 = arith.constant 0 : index
    %c38 = arith.constant 38 : index
    %c0_44 = arith.constant 0 : index
    %49 = vector.load %arg1[%c0_43, %c38, %c0_44] : memref<1x326x36xbf16, #tpu.memory_space<vmem>>, vector<1x288x36xbf16>
    %50 = vector.shape_cast %49 : vector<1x288x36xbf16> to vector<288x36xbf16>
    %c8 = arith.constant 8 : index
    %c0_45 = arith.constant 0 : index
    %c0_46 = arith.constant 0 : index
    %51 = vector.load %arg2[%c8, %c0_45, %c0_46] : memref<9x36x128xbf16, #tpu.memory_space<vmem>>, vector<1x36x128xbf16>
    %52 = vector.shape_cast %51 : vector<1x36x128xbf16> to vector<36x128xbf16>
    %cst_47 = arith.constant dense<0.000000e+00> : vector<288x128xf32>
    %53 = tpu.matmul %50, %52, %cst_47 {dimension_numbers = #tpu.dot_dimension_numbers<[1], [0], [0], [1], [0, 0, 1, 1], [], []>} : vector<288x36xbf16>, vector<36x128xbf16>, vector<288x128xf32> -> vector<288x128xf32>
    %54 = arith.addf %48, %53 : vector<288x128xf32>
    %c0_48 = arith.constant 0 : index
    %c0_49 = arith.constant 0 : index
    %55 = vector.load %arg3[%c0_48, %c0_49] : memref<1x128xf32, #tpu.memory_space<vmem>>, vector<1x128xf32>
    %56 = vector.broadcast %55 : vector<1x128xf32> to vector<288x128xf32>
    %57 = arith.addf %54, %56 : vector<288x128xf32>
    %58 = vector.extract_strided_slice %57 {offsets = [0, 0], sizes = [288, 96], strides = [1, 1]} : vector<288x128xf32> to vector<288x96xf32>
    %59 = arith.negf %58 : vector<288x96xf32>
    %60 = math.exp %59 : vector<288x96xf32>
    %cst_50 = arith.constant 1.000000e+00 : f32
    %61 = vector.broadcast %cst_50 : f32 to vector<288x96xf32>
    %62 = arith.addf %61, %60 : vector<288x96xf32>
    %63 = arith.divf %61, %62 : vector<288x96xf32>
    %64 = vector.extract_strided_slice %57 {offsets = [0, 96], sizes = [288, 32], strides = [1, 1]} : vector<288x128xf32> to vector<288x32xf32>
    %65 = math.tanh %64 : vector<288x32xf32>
    %66 = vector.extract_strided_slice %63 {offsets = [0, 0], sizes = [288, 32], strides = [1, 1]} : vector<288x96xf32> to vector<288x32xf32>
    %67 = vector.extract_strided_slice %63 {offsets = [0, 32], sizes = [288, 32], strides = [1, 1]} : vector<288x96xf32> to vector<288x32xf32>
    %68 = vector.extract_strided_slice %63 {offsets = [0, 64], sizes = [288, 32], strides = [1, 1]} : vector<288x96xf32> to vector<288x32xf32>
    %c0_51 = arith.constant 0 : index
    %c0_52 = arith.constant 0 : index
    %c0_53 = arith.constant 0 : index
    %69 = vector.load %arg4[%c0_51, %c0_52, %c0_53] : memref<1x288x32xf32, #tpu.memory_space<vmem>>, vector<1x288x32xf32>
    %70 = vector.shape_cast %69 : vector<1x288x32xf32> to vector<288x32xf32>
    %71 = arith.mulf %67, %70 : vector<288x32xf32>
    %72 = arith.mulf %66, %65 : vector<288x32xf32>
    %73 = arith.addf %71, %72 : vector<288x32xf32>
    %74 = math.tanh %73 : vector<288x32xf32>
    %75 = arith.mulf %68, %74 : vector<288x32xf32>
    %c0_54 = arith.constant 0 : index
    %c0_55 = arith.constant 0 : index
    %c0_56 = arith.constant 0 : index
    %76 = vector.load %arg5[%c0_54, %c0_55, %c0_56] : memref<1x288x64xf32, #tpu.memory_space<vmem>>, vector<1x288x32xf32>
    %77 = vector.shape_cast %76 : vector<1x288x32xf32> to vector<288x32xf32>
    %78 = vector.shape_cast %75 : vector<288x32xf32> to vector<1x288x32xf32>
    tpu.vector_store %arg5[%c0_54, %c0_55, %c0_56], %78 {strides = array<i32>} : memref<1x288x64xf32, #tpu.memory_space<vmem>>, vector<1x288x32xf32>,
    %c0_57 = arith.constant 0 : index
    %c0_58 = arith.constant 0 : index
    %c32 = arith.constant 32 : index
    %79 = vector.load %arg5[%c0_57, %c0_58, %c32] : memref<1x288x64xf32, #tpu.memory_space<vmem>>, vector<1x288x32xf32>
    %80 = vector.shape_cast %79 : vector<1x288x32xf32> to vector<288x32xf32>
    %81 = vector.shape_cast %73 : vector<288x32xf32> to vector<1x288x32xf32>
    tpu.vector_store %arg5[%c0_57, %c0_58, %c32], %81 {strides = array<i32>} : memref<1x288x64xf32, #tpu.memory_space<vmem>>, vector<1x288x32xf32>,
    return
  }
  func.func @transform_0(%arg0: i32) -> (i32, i32, i32) {
    %c0_i32 = arith.constant 0 : i32
    %c0_i32_0 = arith.constant 0 : i32
    %c0_i32_1 = arith.constant 0 : i32
    return %arg0, %c0_i32, %c0_i32_0 : i32, i32, i32
  }
  func.func @transform_1(%arg0: i32) -> (i32, i32, i32) {
    %c0_i32 = arith.constant 0 : i32
    %c0_i32_0 = arith.constant 0 : i32
    %c0_i32_1 = arith.constant 0 : i32
    %c0_i32_2 = arith.constant 0 : i32
    return %c0_i32, %c0_i32_0, %c0_i32_1 : i32, i32, i32
  }
  func.func @transform_2(%arg0: i32) -> (i32, i32) {
    %c0_i32 = arith.constant 0 : i32
    %c0_i32_0 = arith.constant 0 : i32
    %c0_i32_1 = arith.constant 0 : i32
    return %c0_i32, %c0_i32_0 : i32, i32
  }
  func.func @transform_3(%arg0: i32) -> (i32, i32, i32) {
    %c0_i32 = arith.constant 0 : i32
    %c0_i32_0 = arith.constant 0 : i32
    %c0_i32_1 = arith.constant 0 : i32
    return %arg0, %c0_i32, %c0_i32_0 : i32, i32, i32
  }
  func.func @transform_4(%arg0: i32) -> (i32, i32, i32) {
    %c0_i32 = arith.constant 0 : i32
    %c0_i32_0 = arith.constant 0 : i32
    %c0_i32_1 = arith.constant 0 : i32
    return %arg0, %c0_i32, %c0_i32_0 : i32, i32, i32
  }
}

</mosaic_0001>

<bundles_post_ra>
// kernel: tpu_custom_call.1
= control target key start
LH: loop header
LB: loop body
LE: loop exit
PB: predicated region body
PF: predicated region fallthrough
CT: control target
= control target key end

     0   :  { %s6859_s15 = smov 0   ;;  %s8775_s0 = inlined_call_operand.vmem [shape: bf16[2,326,36], index: 0, kind: input, shape index: {}]   ;;  %s8776_s1 = inlined_call_operand.vmem [shape: bf16[9,36,128], index: 1, kind: input, shape index: {}]   ;;  %s8777_s2 = inlined_call_operand.vmem [shape: f32[1,128], index: 2, kind: input, shape index: {}]   ;;  %s8778_s3 = inlined_call_operand.vmem [shape: f32[2,288,32], index: 3, kind: input, shape index: {}]   ;;  %s8779_s4 = inlined_call_operand.vmem [shape: f32[2,288,64], index: 4, kind: output, shape index: {}]  }
   0x1 LB: > { %s5210_s16 = sadd.s32 4294967295, %s6830_s15   ;;  %p5214_p0 = scmp.ge.s32.totalorder %s6830_s15, 1  ;;  %s6830_s15 = sphi %s6859_s15, %s14_s15  }
   0x2   : > { %p172_p1 = scmp.lt.s32.totalorder %s6830_s15, 3 }
   0x4   : > { %p173_p2 = pnand %p5214_p0, %p172_p1 }
   0x6   : > { %176 = sbr.rel (%p173_p2) target bundleno = 1087 (0x43f), region = 36 }
   0xd   : > { %v6431_v0 = vld [vmem:[%s8776_s1 + $0x50] sm:$0xff]   ;;  %p203_p3 = scmp.lt.s32.totalorder %s5210_s16, 1  ;;  %v6433_v2 = vld [vmem:[%s8776_s1 + $0x58] sm:$0xff]   ;;  %vm579_vm0 = vcmask 1041408   ;;  %vm360_vm1 = vsmask.f32 7424 }
   0xe   : > { %v6432_v1 = vld [vmem:[%s8776_s1 + $0x14] sm:$0xff]   ;;  %5905 = vmatprep.subr.bf16.mxu0 %v6431_v0  ;;  %v6434_v3 = vld [vmem:[%s8776_s1 + $0x1c] sm:$0xff]   ;;  %v6436_v5 = vld [vmem:[%s8776_s1 + $0x24] ss:$0 sps:$4 sm:$0x33]   ;;  %vm524_vm2 = vcmask 293888  }
   0xf   : > { %5737 = vmatprep.subr.bf16.mxu1 %v6432_v1  ;;  %5906 = vmatpush3.bf16.msra.mxu0 %v6431_v0  ;;  %s8875_s16 = smov (!%p203_p3, %s5210_s16), 1  ;;  %v6435_v4 = vld [vmem:[%s8776_s1 + $0x60] ss:$0 sps:$4 sm:$0x33]   ;;  %v6891_v6 = vld [vmem:[%s8776_s1 + $0x64] sm:$0xff]   ;;  %v581_v11 = vsel %vm579_vm0, %v6436_v5, 0 }
  0x10   : > { %5738 = vmatpush3.bf16.msra.mxu1 %v6432_v1  ;;  %5907 = vmatprep.subr.bf16.mxu0 %v6433_v2  ;;  %s6419_s29 = smul.u32 164, %s8875_s16  ;;  %v6894_v7 = vsel %vm579_vm0, %v6435_v4, 0  ;;  %v6445_v8 = vld [vmem:[%s8776_s1] sm:$0xff]   ;;  %vm1792_vm3 = vsmask.f32 6400  ;;  %v6449_v57 = vld [vmem:[%s8776_s1 + $0x6c] sm:$0xff]  }
  0x11   : > { %5739 = vmatprep.subr.bf16.mxu1 %v6434_v3  ;;  %vm2258_vm4 = vcmask 1045504   ;;  %vm1001_vm5 = vcmask 1046528   ;;  %vm3049_vm6 = vsmask.f32 5376  ;;  %s6420_s30 = smul.u32 288, %s8875_s16  ;;  %s6832_s9 = smov 32  }
  0x12   : > { %s6899_s8 = scalar_lea.vmem %s8775_s0, %s6419_s29  ;;  %vm3515_vm7 = vcmask 1044480   ;;  %s6833_s17 = smov 64   ;;  %vm5069_vm8 = vcmask 261120   ;;  %vm5106_vm9 = vcmask 523520  }
  0x13   : > { %5908 = vmatpush3.bf16.msra.mxu0 %v6433_v2  ;;  %v219_v9 = vld [vmem:[%s6899_s8] sm:$0xf]  ;;  %v220_v10 = vld [vmem:[%s6899_s8 + $0x4] sm:$0xf]  ;;  %v6912_v13 = vld [vmem:[%s6899_s8 + $0x8] sm:$0xff]   ;;  %s7536_s7 = scalar_lea.vmem %s8778_s3, %s6420_s30  ;;  %s8590_s20 = scalar_lea.vmem %s8779_s4, %s6420_s30 }
  0x14   : > { %5740 = vmatpush3.bf16.msra.mxu1 %v6434_v3  ;;  %6413 = vmatprep.subr.msk.bf16.mxu0 %vm579_vm0, %v6435_v4  ;;  %v6909_v12 = vcombine.low %v219_v9, %v220_v10  ;;  %v1324_v14 = vld [vmem:[%s6899_s8 + $0x8] sm:$0xe]  ;;  %v6916_v15 = vld [vmem:[%s6899_s8 + $0xc] sm:$0xf]  ;;  %v369_v18 = vshll.u32 %v6912_v13, 16  ;;  %v373_v19 = vshrl.u32 %v6912_v13, 16 }
  0x15   : > { %6409 = vmatprep.subr.msk.bf16.mxu1 %vm579_vm0, %v6436_v5  ;;  %v6924_v20 = vld [vmem:[%s6899_s8 + $0x10] sm:$0xff]   ;;  %v6930_v22 = vcombine.low %v1324_v14, %v6916_v15  ;;  %v6939_v30 = vld [vmem:[%s6899_s8 + $0x18] sm:$0xff]   ;;  %v6945_v36 = vld [vmem:[%s6899_s8 + $0x20] sm:$0xff]  }
  0x16   : > { %v362_v16 = vshrl.u32 %v6909_v12, 16  ;;  %v364_v17 = vshll.u32 %v6909_v12, 16  ;;  %v6927_v21 = vld [vmem:[%s6899_s8 + $0x10] sm:$0xff]   ;;  %v371_v24 = vrot.slane %v369_v18, 1  ;;  %v1802_v25 = vshrl.u32 %v6924_v20, 16  ;;  %v6942_v35 = vld [vmem:[%s6899_s8 + $0x18] sm:$0xff]  }
  0x17   : > { %5910 = vmatpush3.bf16.msra.mxu0 %v6894_v7  ;;  %v1805_v26 = vshll.u32 %v6924_v20, 16  ;;  %v1794_v27 = vshrl.u32 %v6930_v22, 16  ;;  %v1797_v28 = vshll.u32 %v6930_v22, 16  ;;  %v377_v29 = vshll.u32 %v6927_v21, 16  ;;  %v6958_v53 = vld [vmem:[%s6899_s8 + $0x20] sm:$0xff]   ;;  %v6968_v62 = vld [vmem:[%s6899_s8 + $0x28] sm:$0xff]  }
  0x18   : > { %5742 = vmatpush3.bf16.msra.mxu1 %v581_v11  ;;  %5947 = vmatprep.subr.bf16.mxu0 %v6891_v6  ;;  %v366_v23 = vrot.slane %v364_v17, 1  ;;  %v375_v32 = vor.u32 %v373_v19, %v371_v24  ;;  %v1804_v33 = vrot.slane %v1802_v25, 1  ;;  %v1811_v40 = vshrl.u32 %v6939_v30, 16  ;;  %v6975_v5 = vld [vmem:[%s6899_s8 + $0x28] sm:$0xff]   ;;  %v6988_v18 = vld [vmem:[%s6899_s8 + $0x30] sm:$0xff]   ;;  %v6991_v19 = vld [vmem:[%s6899_s8 + $0x38] sm:$0xff]  }
  0x19   : > { %5779 = vmatprep.subr.bf16.mxu1 %v6445_v8  ;;  %v1807_v34 = vrot.slane %v1805_v26, 2  ;;  %v1796_v37 = vrot.slane %v1794_v27, 1  ;;  %v1799_v38 = vrot.slane %v1797_v28, 2  ;;  %v379_v39 = vrot.slane %v377_v29, 1  ;;  %v6997_v26 = vld [vmem:[%s6899_s8 + $0x38] sm:$0xff]  }
  0x1a   : > { %v367_v31 = vor.u32 %v366_v23, %v362_v16  ;;  %v1814_v43 = vshll.u32 %v6939_v30, 16  ;;  %v381_v44 = vshrl.u32 %v6927_v21, 16  ;;  %v1813_v47 = vrot.slane %v1811_v40, 1 }
  0x1b   : > { %v1808_v42 = vor.u32 %v1807_v34, %v1804_v33  ;;  %v1800_v45 = vor.u32 %v1799_v38, %v1796_v37  ;;  %v380_v46 = vsel %vm360_vm1, %v375_v32, %v379_v39  ;;  %v385_v48 = vshll.u32 %v6942_v35, 16  ;;  %v7005_v38 = vld [vmem:[%s6899_s8 + $0x40] sm:$0xff]  }
  0x1c   : > { %v372_v41 = vsel %vm360_vm1, %v367_v31, %v371_v24  ;;  %v1816_v49 = vrot.slane %v1814_v43, 2  ;;  %v383_v50 = vor.u32 %v381_v44, %v379_v39  ;;  %v1820_v51 = vshrl.u32 %v6945_v36, 16 }
  0x1d   : > { %5743 = vmatprep.mubr.msk.bf16.mxu1 %vm524_vm2, %v372_v41  ;;  %v1823_v52 = vshll.u32 %v6945_v36, 16  ;;  %v1809_v54 = vsel %vm1792_vm3, %v1800_v45, %v1808_v42  ;;  %v387_v55 = vrot.slane %v385_v48, 1  ;;  %v389_v56 = vshrl.u32 %v6942_v35, 16 }
  0x1e   : > { %5744 = vmatmul.mubr.msk.bf16.vlgmr.msra.gmra.mrb[0].mxu1 %vm524_vm2, %v380_v46  ;;  %5911 = vmatprep.mubr.msk.bf16.mxu0 %vm524_vm2, %v1809_v54  ;;  %v1817_v58 = vor.u32 %v1816_v49, %v1813_v47  ;;  %v1822_v59 = vrot.slane %v1820_v51, 1  ;;  %v393_v61 = vshll.u32 %v6958_v53, 16  ;;  %v1829_v4 = vshrl.u32 %v6968_v62, 16  ;;  %v7016_v51 = vld [vmem:[%s6899_s8 + $0x40] sm:$0xff]  }
  0x1f   : > { %5780 = vmatpush3.bf16.msra.mxu1 %v6445_v8  ;;  %v1825_v60 = vrot.slane %v1823_v52, 2  ;;  %v388_v63 = vsel %vm360_vm1, %v383_v50, %v387_v55  ;;  %v391_v0 = vor.u32 %v389_v56, %v387_v55  ;;  %v6978_v8 = vld [vmem:[%s6899_s8 + $0x30] sm:$0xff]   ;;  %v1832_v9 = vshll.u32 %v6968_v62, 16 }
  0x20   : > { %v1818_v1 = vsel %vm1792_vm3, %v1808_v42, %v1817_v58  ;;  %5747 = vmatprep.mubr.msk.bf16.mxu1 %vm524_vm2, %v388_v63  ;;  %v395_v3 = vrot.slane %v393_v61, 1  ;;  %v397_v10 = vshrl.u32 %v6958_v53, 16  ;;  %v1831_v16 = vrot.slane %v1829_v4, 1 }
  0x21   : > { %v1826_v2 = vor.u32 %v1825_v60, %v1822_v59  ;;  %5912 = vmatmul.mubr.msk.bf16.vlgmr.msra.gmra.mrb[0].mxu0 %vm524_vm2, %v1818_v1  ;;  %v401_v17 = vshll.u32 %v6975_v5, 16  ;;  %v1834_v23 = vrot.slane %v1832_v9, 2  ;;  %v1838_v25 = vshrl.u32 %v6978_v8, 16  ;;  %v6458_v1 = vld [vmem:[%s8776_s1 + $0x74] ss:$0 sps:$4 sm:$0x33]  }
  0x22   : > { %5948 = vmatpush3.bf16.msra.mxu0 %v6891_v6  ;;  %v396_v14 = vsel %vm360_vm1, %v391_v0, %v395_v3  ;;  %v399_v24 = vor.u32 %v397_v10, %v395_v3  ;;  %v1841_v6 = vshll.u32 %v6978_v8, 16  ;;  %v405_v28 = vshrl.u32 %v6975_v5, 16 }
  0x23   : > { %v1827_v11 = vsel %vm1792_vm3, %v1817_v58, %v1826_v2  ;;  %5949 = vmatprep.subr.bf16.mxu0 %v6449_v57  ;;  %v403_v27 = vrot.slane %v401_v17, 1  ;;  %v409_v29 = vshll.u32 %v6988_v18, 16  ;;  %v1847_v31 = vshrl.u32 %v6991_v19, 16 }
  0x24   : > { %5915 = vmatprep.mubr.msk.bf16.mxu0 %vm524_vm2, %v1827_v11  ;;  %v1835_v32 = vor.u32 %v1834_v23, %v1831_v16  ;;  %v1840_v33 = vrot.slane %v1838_v25, 1  ;;  %v1843_v34 = vrot.slane %v1841_v6, 2  ;;  %v1850_v37 = vshll.u32 %v6991_v19, 16  ;;  %v6460_v11 = vld [vmem:[%s8776_s1 + $0x8] sm:$0xff]   ;;  %v7046_v6 = vld [vmem:[%s6899_s8 + $0x50] sm:$0xff]  }
  0x25   : > { %v404_v39 = vsel %vm360_vm1, %v399_v24, %v403_v27  ;;  %v407_v40 = vor.u32 %v405_v28, %v403_v27  ;;  %v411_v41 = vrot.slane %v409_v29, 1  ;;  %v1849_v42 = vrot.slane %v1847_v31, 1  ;;  %5781 = vmatprep.subr.bf16.mxu1 %v6460_v11 }
  0x26   : > { %5748 = vmatmul.mubr.msk.bf16.gmra.mrb[4].mxu1 %vm524_vm2, %v396_v14  ;;  %5950 = vmatpush3.bf16.msra.mxu0 %v6449_v57  ;;  %v1836_v43 = vsel %vm1792_vm3, %v1826_v2, %v1835_v32  ;;  %v1844_v44 = vor.u32 %v1843_v34, %v1840_v33  ;;  %v1852_v45 = vrot.slane %v1850_v37, 2  ;;  %v413_v46 = vshrl.u32 %v6988_v18, 16  ;;  %v7022_v57 = vld [vmem:[%s6899_s8 + $0x48] sm:$0xff]   ;;  %v7052_v33 = vld [vmem:[%s6899_s8 + $0x50] sm:$0xff]   ;;  %v7056_v37 = vld [vmem:[%s6899_s8 + $0x58] sm:$0xff]  }
  0x27   : > { %5751 = vmatprep.mubr.msk.bf16.mxu1 %vm524_vm2, %v404_v39  ;;  %v412_v47 = vsel %vm360_vm1, %v407_v40, %v411_v41  ;;  %v417_v48 = vshll.u32 %v6997_v26, 16  ;;  %v1856_v49 = vshrl.u32 %v7005_v38, 16  ;;  %v1859_v50 = vshll.u32 %v7005_v38, 16  ;;  %v7032_v2 = vld [vmem:[%s6899_s8 + $0x48] sm:$0xff]   ;;  %6415 = vmatprep.subr.msk.bf16.mxu0 %vm579_vm0, %v6458_v1 }
  0x28   : > { %v1845_v52 = vsel %vm1792_vm3, %v1835_v32, %v1844_v44  ;;  %v1853_v54 = vor.u32 %v1852_v45, %v1849_v42  ;;  %v415_v55 = vor.u32 %v413_v46, %v411_v41  ;;  %v421_v56 = vshrl.u32 %v6997_v26, 16  ;;  %5782 = vmatpush3.bf16.msra.mxu1 %v6460_v11  ;;  %v7068_v45 = vld [vmem:[%s8776_s1 + $0x78] sm:$0xff]  }
  0x29   : > { %5916 = vmatmul.mubr.msk.bf16.gmra.mrb[4].mxu0 %vm524_vm2, %v1836_v43  ;;  %v419_v58 = vrot.slane %v417_v48, 1  ;;  %v1858_v59 = vrot.slane %v1856_v49, 1  ;;  %v1861_v60 = vrot.slane %v1859_v50, 2  ;;  %v425_v61 = vshll.u32 %v7016_v51, 16  ;;  %v2248_v50 = vld [vmem:[%s6899_s8 + $0x8] sm:$0xc] }
  0x2a   : > { %5919 = vmatprep.mubr.msk.bf16.mxu0 %vm524_vm2, %v1845_v52  ;;  %v1865_v63 = vshrl.u32 %v7022_v57, 16  ;;  %v1868_v0 = vshll.u32 %v7022_v57, 16  ;;  %v2366_v17 = vsel %vm579_vm0, %v6458_v1, 0  ;;  %v429_v23 = vshrl.u32 %v7016_v51, 16 }
  0x2b   : > { %v420_v3 = vsel %vm360_vm1, %v415_v55, %v419_v58  ;;  %v1862_v4 = vor.u32 %v1861_v60, %v1858_v59  ;;  %v423_v9 = vor.u32 %v421_v56, %v419_v58  ;;  %v427_v10 = vrot.slane %v425_v61, 1  ;;  %5952 = vmatpush3.bf16.msra.mxu0 %v2366_v17  ;;  %v7080_v58 = vld [vmem:[%s6899_s8 + $0x60] sm:$0xff]  }
  0x2c   : > { %v1867_v14 = vrot.slane %v1865_v63, 1  ;;  %v1870_v16 = vrot.slane %v1868_v0, 2  ;;  %v1854_v24 = vsel %vm1792_vm3, %v1844_v44, %v1853_v54  ;;  %v433_v25 = vshll.u32 %v7032_v2, 16  ;;  %v7063_v44 = vld [vmem:[%s6899_s8 + $0x58] sm:$0xff]   ;;  %5989 = vmatprep.subr.bf16.mxu0 %v7068_v45  ;;  %v7084_v0 = vld [vmem:[%s6899_s8 + $0x68] sm:$0xff]  }
  0x2d   : > { %v1863_v27 = vsel %vm1792_vm3, %v1853_v54, %v1862_v4  ;;  %v431_v28 = vor.u32 %v429_v23, %v427_v10  ;;  %v1874_v31 = vshrl.u32 %v7046_v6, 16  ;;  %v1877_v32 = vshll.u32 %v7046_v6, 16 }
  0x2e   : > { %5752 = vmatmul.mubr.msk.bf16.gmra.mrb[8].mxu1 %vm524_vm2, %v412_v47  ;;  %v435_v29 = vrot.slane %v433_v25, 1  ;;  %v437_v34 = vshrl.u32 %v7032_v2, 16  ;;  %v428_v39 = vsel %vm360_vm1, %v423_v9, %v427_v10  ;;  %v1871_v40 = vor.u32 %v1870_v16, %v1867_v14  ;;  %v6471_v25 = vld [vmem:[%s8776_s1 + $0x10] ss:$0 sps:$4 sm:$0x33]  }
  0x2f   : > { %5755 = vmatprep.mubr.msk.bf16.mxu1 %vm524_vm2, %v420_v3  ;;  %v1876_v42 = vrot.slane %v1874_v31, 1  ;;  %v1879_v43 = vrot.slane %v1877_v32, 2  ;;  %v441_v46 = vshll.u32 %v7052_v33, 16  ;;  %v1883_v47 = vshrl.u32 %v7056_v37, 16  ;;  %6410 = vmatprep.subr.msk.bf16.mxu1 %vm579_vm0, %v6471_v25 }
  0x30   : > { %v436_v41 = vsel %vm360_vm1, %v431_v28, %v435_v29  ;;  %v1886_v48 = vshll.u32 %v7056_v37, 16  ;;  %v445_v49 = vshrl.u32 %v7052_v33, 16  ;;  %v449_v54 = vshll.u32 %v7063_v44, 16  ;;  %v7104_v28 = vld [vmem:[%s6899_s8 + $0x70] sm:$0xff]  }
  0x31   : > { %5920 = vmatmul.mubr.msk.bf16.gmra.mrb[8].mxu0 %vm524_vm2, %v1854_v24  ;;  %v1880_v52 = vor.u32 %v1879_v43, %v1876_v42  ;;  %v439_v55 = vor.u32 %v437_v34, %v435_v29  ;;  %v443_v56 = vrot.slane %v441_v46, 1  ;;  %v1872_v59 = vsel %vm1792_vm3, %v1862_v4, %v1871_v40  ;;  %v7111_v34 = vld [vmem:[%s6899_s8 + $0x78] sm:$0xff]  }
  0x32   : > { %5923 = vmatprep.mubr.msk.bf16.mxu0 %vm524_vm2, %v1863_v27  ;;  %v1885_v60 = vrot.slane %v1883_v47, 1  ;;  %v1888_v61 = vrot.slane %v1886_v48, 2  ;;  %v451_v63 = vrot.slane %v449_v54, 1  ;;  %v5388_v9 = vcombine.low %v2248_v50, %v6916_v15 }
  0x33   : > { %v1881_v1 = vsel %vm1792_vm3, %v1871_v40, %v1880_v52  ;;  %v447_v3 = vor.u32 %v445_v49, %v443_v56  ;;  %v457_v10 = vshll.u32 %v7080_v58, 16  ;;  %v444_v11 = vsel %vm360_vm1, %v439_v55, %v443_v56  ;;  %v7133_v55 = vld [vmem:[%s6899_s8 + $0x80] sm:$0xff]  }
  0x34   : > { %v453_v14 = vshrl.u32 %v7063_v44, 16  ;;  %v7093_v4 = vor.u32 %v1888_v61, %v1885_v60  ;;  %v461_v17 = vshrl.u32 %v7080_v58, 16  ;;  %v465_v15 = vshll.u32 %v7084_v0, 16  ;;  %v7138_v61 = vld [vmem:[%s6899_s8 + $0x88] sm:$0xff]  }
  0x35   : > { %v452_v16 = vsel %vm360_vm1, %v447_v3, %v451_v63  ;;  %v2259_v23 = vrot.slane %v5388_v9, 2  ;;  %v2260_v24 = vrot.slane %v6924_v20, 2  ;;  %v459_v27 = vrot.slane %v457_v10, 1 }
  0x36   : > { %5756 = vmatmul.mubr.msk.bf16.gmra.mrb[12].mxu1 %vm524_vm2, %v428_v39  ;;  %v455_v29 = vor.u32 %v453_v14, %v451_v63  ;;  %v1890_v31 = vsel %vm1792_vm3, %v1880_v52, %v7093_v4  ;;  %v467_v20 = vrot.slane %v465_v15, 1  ;;  %v7116_v39 = vld [vmem:[%s8776_s1 + $0x28] sm:$0xff]   ;;  %v473_v42 = vshll.u32 %v7104_v28, 16 }
  0x37   : > { %5759 = vmatprep.mubr.msk.bf16.mxu1 %vm524_vm2, %v436_v41  ;;  %v463_v32 = vor.u32 %v461_v17, %v459_v27  ;;  %v2261_v40 = vsel %vm2258_vm4, %v2259_v23, %v2260_v24  ;;  %v812_v41 = vsel %vm579_vm0, %v6471_v25, 0  ;;  %v2262_v46 = vrot.slane %v6939_v30, 2 }
  0x38   : > { %5784 = vmatpush3.bf16.msra.mxu1 %v812_v41  ;;  %v460_v43 = vsel %vm360_vm1, %v455_v29, %v459_v27  ;;  %v469_v47 = vshrl.u32 %v7084_v0, 16  ;;  %v477_v49 = vshrl.u32 %v7104_v28, 16  ;;  %v481_v50 = vshll.u32 %v7111_v34, 16 }
  0x39   : > { %5924 = vmatmul.mubr.msk.bf16.gmra.mrb[12].mxu0 %vm524_vm2, %v1872_v59  ;;  %5821 = vmatprep.subr.bf16.mxu1 %v7116_v39  ;;  %v468_v48 = vsel %vm360_vm1, %v463_v32, %v467_v20  ;;  %v2264_v52 = vrot.slane %v6945_v36, 2  ;;  %v475_v54 = vrot.slane %v473_v42, 1  ;;  %v2263_v56 = vsel %vm2258_vm4, %v2260_v24, %v2262_v46  ;;  %v6474_v36 = vld [vmem:[%s8776_s1 + $0x80] sm:$0xff]   ;;  %v7161_v24 = vld [vmem:[%s6899_s8 + $0x90] ss:$0 sps:$4 sm:$0x11]  }
  0x3a   : > { %5927 = vmatprep.mubr.msk.bf16.mxu0 %vm524_vm2, %v1881_v1  ;;  %v471_v30 = vor.u32 %v469_v47, %v467_v20  ;;  %v483_v60 = vrot.slane %v481_v50, 1  ;;  %v489_v1 = vshll.u32 %v7133_v55, 16  ;;  %v2266_v9 = vrot.slane %v6968_v62, 2 }
  0x3b   : > { %v479_v59 = vor.u32 %v477_v49, %v475_v54  ;;  %v2265_v63 = vsel %vm2258_vm4, %v2262_v46, %v2264_v52  ;;  %v485_v10 = vshrl.u32 %v7111_v34, 16  ;;  %v497_v17 = vshll.u32 %v7138_v61, 16 }
  0x3c   : > { %v476_v3 = vsel %vm360_vm1, %v471_v30, %v475_v54  ;;  %v2268_v15 = vrot.slane %v6978_v8, 2  ;;  %v491_v62 = vrot.slane %v489_v1, 1  ;;  %v501_v20 = vshrl.u32 %v7138_v61, 16  ;;  %v7195_v54 = vld [vmem:[%s6899_s8 + $0x60] sm:$0xff]  }
  0x3d   : > { %v484_v14 = vsel %vm360_vm1, %v479_v59, %v483_v60  ;;  %v487_v23 = vor.u32 %v485_v10, %v483_v60  ;;  %v499_v27 = vrot.slane %v497_v17, 1  ;;  %v2270_v41 = vrot.slane %v6991_v19, 2  ;;  %v7212_v59 = vld [vmem:[%s6899_s8 + $0x68] sm:$0xff]   ;;  %v7243_v10 = vld [vmem:[%s6899_s8 + $0x80] sm:$0xff]  }
  0x3e   : > { %5760 = vmatmul.mubr.msk.bf16.gmra.mrb[16].mxu1 %vm524_vm2, %v444_v11  ;;  %v6480_v11 = vld [vmem:[%s8776_s1 + $0x88] ss:$0 sps:$4 sm:$0x33]   ;;  %v2269_v29 = vsel %vm2258_vm4, %v2266_v9, %v2268_v15  ;;  %v2276_v50 = vrot.slane %v7046_v6, 2  ;;  %v6484_v6 = vld [vmem:[%s8776_s1 + $0x30] sm:$0xff]  }
  0x3f   : > { %5763 = vmatprep.mubr.msk.bf16.mxu1 %vm524_vm2, %v452_v16  ;;  %v493_v16 = vshrl.u32 %v7133_v55, 16  ;;  %v2824_v8 = vsel %vm579_vm0, %v6480_v11, 0  ;;  %v492_v32 = vsel %vm360_vm1, %v487_v23, %v491_v62  ;;  %v503_v46 = vor.u32 %v501_v20, %v499_v27  ;;  %v7255_v17 = vld [vmem:[%s6899_s8 + $0x88] sm:$0xff]  }
  0x40   : > { %v2290_v23 = vrot.slane %v7255_v17, 2 }
  0x41   : > { %5928 = vmatmul.mubr.msk.bf16.gmra.mrb[16].mxu0 %vm524_vm2, %v1890_v31  ;;  %v495_v25 = vor.u32 %v493_v16, %v491_v62  ;;  %v7170_v31 = vld [vmem:[%s8776_s1 + $0x8c] sm:$0xff]  }
  0x42   : > { %5953 = vmatprep.mubr.msk.bf16.mxu0 %vm524_vm2, %v2261_v40  ;;  %v505_v40 = vshll.u32 %v7161_v24, 16  ;;  %v7259_v62 = vld [vmem:[%s6899_s8 + $0x90] sm:$0xff]  }
  0x43   : > { %v500_v42 = vsel %vm360_vm1, %v495_v25, %v499_v27  ;;  %v2581_v25 = vld [vmem:[%s6899_s8 + $0x10] sm:$0xc]  ;;  %v7269_v27 = vld [vmem:[%s6899_s8 + $0x14] sm:$0xf] }
  0x44   : > { %v507_v47 = vrot.slane %v505_v40, 1  ;;  %v7279_v20 = vcombine.low %v2581_v25, %v7269_v27  ;;  %v7282_v40 = vld [vmem:[%s6899_s8 + $0x18] sm:$0xff]  }
  0x46   : > { %5764 = vmatmul.mubr.msk.bf16.gmra.mrb[20].mxu1 %vm524_vm2, %v460_v43  ;;  %v2272_v43 = vrot.slane %v7005_v38, 2  ;;  %v508_v19 = vsel %vm360_vm1, %v503_v46, %v507_v47  ;;  %v2274_v38 = vrot.slane %v7022_v57, 2  ;;  %v2278_v57 = vrot.slane %v7056_v37, 2  ;;  %v6493_v37 = vld [vmem:[%s8776_s1 + $0x38] ss:$0 sps:$4 sm:$0x33]  }
  0x47   : > { %5767 = vmatprep.mubr.msk.bf16.mxu1 %vm524_vm2, %v468_v48  ;;  %v2271_v48 = vsel %vm2258_vm4, %v2268_v15, %v2270_v41  ;;  %v7295_v47 = vld [vmem:[%s6899_s8 + $0x20] sm:$0xff]  }
  0x48   : > { %v2273_v49 = vsel %vm2258_vm4, %v2270_v41, %v2272_v43  ;;  %v2277_v30 = vsel %vm2258_vm4, %v2274_v38, %v2276_v50 }
  0x49   : > { %5954 = vmatmul.mubr.msk.bf16.vlgmr.msra.gmra.mrb[0].mxu0 %vm524_vm2, %v2263_v56  ;;  %v2280_v56 = vrot.slane %v7195_v54, 2 }
  0x4a   : > { %5990 = vmatpush3.bf16.msra.mxu0 %v7068_v45  ;;  %5957 = vmatprep.mubr.msk.bf16.mxu0 %vm524_vm2, %v2265_v63  ;;  %v2267_v45 = vsel %vm2258_vm4, %v2264_v52, %v2266_v9  ;;  %v2275_v52 = vsel %vm2258_vm4, %v2272_v43, %v2274_v38  ;;  %v7219_v63 = vld [vmem:[%s6899_s8 + $0x70] sm:$0xff]   ;;  %v2718_v43 = vrot.slane %v7282_v40, 2 }
  0x4b   : > { %5991 = vmatprep.subr.bf16.mxu0 %v6474_v36  ;;  %v2281_v60 = vsel %vm2258_vm4, %v2278_v57, %v2280_v56 }
  0x4e   : > { %5768 = vmatmul.mubr.msk.bf16.gmra.mrb[24].mxu1 %vm524_vm2, %v476_v3  ;;  %5992 = vmatpush3.bf16.msra.mxu0 %v6474_v36  ;;  %v2284_v36 = vrot.slane %v7219_v63, 2  ;;  %v7238_v3 = vld [vmem:[%s6899_s8 + $0x78] sm:$0xff]  }
  0x4f   : > { %5771 = vmatprep.mubr.msk.bf16.mxu1 %vm524_vm2, %v484_v14  ;;  %6416 = vmatprep.subr.msk.bf16.mxu0 %vm579_vm0, %v6480_v11  ;;  %v2286_v11 = vrot.slane %v7238_v3, 2  ;;  %v2288_v14 = vrot.slane %v7243_v10, 2 }
  0x51   : > { %5958 = vmatmul.mubr.msk.bf16.gmra.mrb[4].mxu0 %vm524_vm2, %v2267_v45  ;;  %v2287_v16 = vsel %vm2258_vm4, %v2284_v36, %v2286_v11  ;;  %v2289_v15 = vsel %vm2258_vm4, %v2286_v11, %v2288_v14  ;;  %v2292_v45 = vrot.slane %v7259_v62, 2 }
  0x52   : > { %5961 = vmatprep.mubr.msk.bf16.mxu0 %vm524_vm2, %v2269_v29  ;;  %5994 = vmatpush3.bf16.msra.mxu0 %v2824_v8  ;;  %v2291_v29 = vsel %vm2258_vm4, %v2288_v14, %v2290_v23  ;;  %v7275_v8 = vld [vmem:[%s6899_s8 + $0x98] ss:$0 sps:$4 sm:$0x33]   ;;  %v6808_v14 = vld [vmem:[%s6899_s8 + $0x4] sm:$0xf] }
  0x53   : > { %6031 = vmatprep.subr.bf16.mxu0 %v7170_v31  ;;  %v2294_v41 = vrot.slane %v7275_v8, 2 }
  0x55   : > { %v2295_v46 = vsel %vm2258_vm4, %v2292_v45, %v2294_v41 }
  0x56   : > { %5772 = vmatmul.mubr.msk.bf16.gmra.mrb[28].mxu1 %vm524_vm2, %v492_v32  ;;  %v2293_v32 = vsel %vm2258_vm4, %v2290_v23, %v2292_v45  ;;  %v7360_v45 = vld [vmem:[%s6899_s8 + $0x50] sm:$0xff]  }
  0x57   : > { %5775 = vmatprep.mubr.msk.bf16.mxu1 %vm524_vm2, %v500_v42  ;;  %v2717_v42 = vrot.slane %v7279_v20, 2 }
  0x59   : > { %5962 = vmatmul.mubr.msk.bf16.gmra.mrb[8].mxu0 %vm524_vm2, %v2271_v48  ;;  %v2719_v48 = vsel %vm2258_vm4, %v2717_v42, %v2718_v43  ;;  %v7365_v42 = vld [vmem:[%s6899_s8 + $0x58] sm:$0xff]  }
  0x5a   : > { %5965 = vmatprep.mubr.msk.bf16.mxu0 %vm524_vm2, %v2273_v49  ;;  %v7299_v49 = vld [vmem:[%s6899_s8 + $0x28] sm:$0xff]  }
  0x5b   : > { %v2722_v38 = vrot.slane %v7299_v49, 2 }
  0x5e   : > { %5776 = vmatmul.mubr.msk.bf16.gmra.mrb[32].mxu1 %vm524_vm2, %v508_v19  ;;  %v2720_v19 = vrot.slane %v7295_v47, 2 }
  0x5f   : > { %5785 = vmatprep.mubr.msk.bf16.mxu1 %vm524_vm2, %v6909_v12  ;;  %v2279_v12 = vsel %vm2258_vm4, %v2276_v50, %v2278_v57  ;;  %v7315_v57 = vld [vmem:[%s6899_s8 + $0x38] sm:$0xff]  }
  0x60   : > { %v2721_v50 = vsel %vm2258_vm4, %v2718_v43, %v2720_v19  ;;  %v2732_v43 = vrot.slane %v7360_v45, 2 }
  0x61   : > { %5966 = vmatmul.mubr.msk.bf16.gmra.mrb[12].mxu0 %vm524_vm2, %v2275_v52  ;;  %v7311_v52 = vld [vmem:[%s6899_s8 + $0x30] sm:$0xff]  }
  0x62   : > { %5969 = vmatprep.mubr.msk.bf16.mxu0 %vm524_vm2, %v2277_v30  ;;  %v2723_v30 = vsel %vm2258_vm4, %v2720_v19, %v2722_v38  ;;  %v6810_v19 = vld [vmem:[%s6899_s8 + $0x10] sm:$0xff]  }
  0x66   : > { %5786 = vmatmul.mubr.msk.bf16.vlgmr.msra.gmra.mrb[0].mxu1 %vm524_vm2, %v6912_v13  ;;  %v2282_v13 = vrot.slane %v7212_v59, 2 }
  0x67   : > { %5789 = vmatprep.mubr.msk.bf16.mxu1 %vm524_vm2, %v6927_v21  ;;  %5822 = vmatpush3.bf16.msra.mxu1 %v7116_v39  ;;  %v1109_v21 = vsel %vm579_vm0, %v6493_v37, 0  ;;  %v7229_v39 = vld [vmem:[%s8776_s1 + $0x3c] sm:$0xff]  }
  0x68   : > { %5823 = vmatprep.subr.bf16.mxu1 %v6484_v6  ;;  %v2283_v1 = vsel %vm2258_vm4, %v2280_v56, %v2282_v13  ;;  %v2285_v9 = vsel %vm2258_vm4, %v2282_v13, %v2284_v36  ;;  %v2724_v56 = vrot.slane %v7311_v52, 2  ;;  %v991_v36 = vld [vmem:[%s6899_s8] sm:$0xe] }
  0x69   : > { %5970 = vmatmul.mubr.msk.bf16.gmra.mrb[16].mxu0 %vm524_vm2, %v2279_v12  ;;  %v2726_v12 = vrot.slane %v7315_v57, 2 }
  0x6a   : > { %5973 = vmatprep.mubr.msk.bf16.mxu0 %vm524_vm2, %v2281_v60  ;;  %v7334_v60 = vld [vmem:[%s6899_s8 + $0x40] sm:$0xff]  }
  0x6b   : > { %5824 = vmatpush3.bf16.msra.mxu1 %v6484_v6  ;;  %v6497_v6 = vld [vmem:[%s8776_s1 + $0x94] sm:$0xff]   ;;  %v2727_v13 = vsel %vm2258_vm4, %v2724_v56, %v2726_v12  ;;  %v2728_v11 = vrot.slane %v7334_v60, 2 }
  0x6c   : > { %6411 = vmatprep.subr.msk.bf16.mxu1 %vm579_vm0, %v6493_v37  ;;  %v6506_v37 = vld [vmem:[%s8776_s1 + $0x9c] ss:$0 sps:$4 sm:$0x33]  }
  0x6d   : > { %v2729_v23 = vsel %vm2258_vm4, %v2726_v12, %v2728_v11  ;;  %v7383_v12 = vld [vmem:[%s6899_s8 + $0x68] sm:$0xff]  }
  0x6e   : > { %5790 = vmatmul.mubr.msk.bf16.gmra.mrb[4].mxu1 %vm524_vm2, %v6942_v35 }
  0x6f   : > { %5793 = vmatprep.mubr.msk.bf16.mxu1 %vm524_vm2, %v6958_v53  ;;  %5826 = vmatpush3.bf16.msra.mxu1 %v1109_v21  ;;  %v7338_v21 = vld [vmem:[%s6899_s8 + $0x48] sm:$0xff]  }
  0x70   : > { %5863 = vmatprep.subr.bf16.mxu1 %v7229_v39 }
  0x71   : > { %5974 = vmatmul.mubr.msk.bf16.gmra.mrb[20].mxu0 %vm524_vm2, %v2283_v1  ;;  %v3290_v1 = vsel %vm579_vm0, %v6506_v37, 0 }
  0x72   : > { %5977 = vmatprep.mubr.msk.bf16.mxu0 %vm524_vm2, %v2285_v9  ;;  %v7346_v9 = vld [vmem:[%s8776_s1 + $0xa0] sm:$0xff]  }
  0x76   : > { %5794 = vmatmul.mubr.msk.bf16.gmra.mrb[8].mxu1 %vm524_vm2, %v6975_v5 }
  0x77   : > { %5797 = vmatprep.mubr.msk.bf16.mxu1 %vm524_vm2, %v6988_v18 }
  0x79   : > { %5978 = vmatmul.mubr.msk.bf16.gmra.mrb[24].mxu0 %vm524_vm2, %v2287_v16  ;;  %v5289_v16 = vcombine.low %v991_v36, %v6808_v14  ;;  %v6510_v36 = vld [vmem:[%s8776_s1 + $0x44] sm:$0xff]   ;;  %v7400_v14 = vld [vmem:[%s6899_s8 + $0x70] sm:$0xff]  }
  0x7a   : > { %5981 = vmatprep.mubr.msk.bf16.mxu0 %vm524_vm2, %v2289_v15  ;;  %v2730_v15 = vrot.slane %v7338_v21, 2 }
  0x7b   : > { %v1002_v25 = vrot.slane %v5289_v16, 1  ;;  %v1011_v16 = vrot.slane %v6975_v5, 1  ;;  %v2740_v5 = vrot.slane %v7400_v14, 2 }
  0x7c   : > { %v2731_v41 = vsel %vm2258_vm4, %v2728_v11, %v2730_v15 }
  0x7e   : > { %5798 = vmatmul.mubr.msk.bf16.gmra.mrb[12].mxu1 %vm524_vm2, %v6997_v26 }
  0x7f   : > { %5801 = vmatprep.mubr.msk.bf16.mxu1 %vm524_vm2, %v7016_v51 }
  0x81   : > { %5982 = vmatmul.mubr.msk.bf16.gmra.mrb[28].mxu0 %vm524_vm2, %v2291_v29  ;;  %v6809_v29 = vld [vmem:[%s6899_s8 + $0x8] sm:$0xff]  }
  0x82   : > { %5985 = vmatprep.mubr.msk.bf16.mxu0 %vm524_vm2, %v2293_v32  ;;  %v1003_v32 = vrot.slane %v6809_v29, 1 }
  0x86   : > { %5802 = vmatmul.mubr.msk.bf16.gmra.mrb[16].mxu1 %vm524_vm2, %v7032_v2 }
  0x87   : > { %5805 = vmatprep.mubr.msk.bf16.mxu1 %vm524_vm2, %v7052_v33 }
  0x89   : > { %5986 = vmatmul.mubr.msk.bf16.gmra.mrb[32].mxu0 %vm524_vm2, %v2295_v46  ;;  %v1004_v46 = vsel %vm1001_vm5, %v1002_v25, %v1003_v32  ;;  %v7408_v25 = vld [vmem:[%s6899_s8 + $0x78] sm:$0xff]  }
  0x8a   : > { %5995 = vmatprep.mubr.msk.bf16.mxu0 %vm524_vm2, %v2719_v48  ;;  %v2734_v48 = vrot.slane %v7365_v42, 2 }
  0x8e   : > { %5806 = vmatmul.mubr.msk.bf16.gmra.mrb[20].mxu1 %vm524_vm2, %v7063_v44 }
  0x8f   : > { %5809 = vmatprep.mubr.msk.bf16.mxu1 %vm524_vm2, %v7080_v58 }
  0x91   : > { %5996 = vmatmul.mubr.msk.bf16.vlgmr.msra.gmra.mrb[0].mxu0 %vm524_vm2, %v2721_v50  ;;  %v2733_v50 = vsel %vm2258_vm4, %v2730_v15, %v2732_v43  ;;  %v6514_v15 = vld [vmem:[%s8776_s1 + $0x4c] ss:$0 sps:$4 sm:$0x33]  }
  0x92   : > { %6032 = vmatpush3.bf16.msra.mxu0 %v7170_v31  ;;  %5999 = vmatprep.mubr.msk.bf16.mxu0 %vm524_vm2, %v2723_v30  ;;  %v2725_v31 = vsel %vm2258_vm4, %v2722_v38, %v2724_v56  ;;  %v1005_v38 = vrot.slane %v6810_v19, 1  ;;  %v7378_v30 = vld [vmem:[%s6899_s8 + $0x60] sm:$0xff]   ;;  %v2735_v56 = vsel %vm2258_vm4, %v2732_v43, %v2734_v48  ;;  %v1567_v29 = vsel %vm579_vm0, %v6514_v15, 0  ;;  %v7429_v19 = vld [vmem:[%s8776_s1 + $0x50] sm:$0xff]  }
  0x93   : > { %6033 = vmatprep.subr.bf16.mxu0 %v6497_v6 }
  0x96   : > { %5810 = vmatmul.mubr.msk.bf16.gmra.mrb[24].mxu1 %vm524_vm2, %v7084_v0  ;;  %6034 = vmatpush3.bf16.msra.mxu0 %v6497_v6  ;;  %v1007_v6 = vrot.slane %v6942_v35, 1  ;;  %v2738_v35 = vrot.slane %v7383_v12, 2 }
  0x97   : > { %5813 = vmatprep.mubr.msk.bf16.mxu1 %vm524_vm2, %v7104_v28  ;;  %6417 = vmatprep.subr.msk.bf16.mxu0 %vm579_vm0, %v6506_v37  ;;  %v1006_v37 = vsel %vm1001_vm5, %v1003_v32, %v1005_v38  ;;  %v2742_v32 = vrot.slane %v7408_v25, 2 }
  0x98   : > { %v2741_v43 = vsel %vm2258_vm4, %v2738_v35, %v2740_v5 }
  0x99   : > { %6000 = vmatmul.mubr.msk.bf16.gmra.mrb[4].mxu0 %vm524_vm2, %v2725_v31  ;;  %v2736_v31 = vrot.slane %v7378_v30, 2 }
  0x9a   : > { %6003 = vmatprep.mubr.msk.bf16.mxu0 %vm524_vm2, %v2727_v13  ;;  %6036 = vmatpush3.bf16.msra.mxu0 %v3290_v1  ;;  %v1008_v13 = vsel %vm1001_vm5, %v1005_v38, %v1007_v6  ;;  %v1009_v1 = vrot.slane %v6958_v53, 1  ;;  %v2743_v38 = vsel %vm2258_vm4, %v2740_v5, %v2742_v32  ;;  %v3062_v5 = vshll.u32 %v7282_v40, 16 }
  0x9b   : > { %6073 = vmatprep.subr.bf16.mxu0 %v7346_v9  ;;  %v2737_v11 = vsel %vm2258_vm4, %v2734_v48, %v2736_v31  ;;  %v1015_v48 = vrot.slane %v6997_v26, 1 }
  0x9c   : > { %v1010_v53 = vsel %vm1001_vm5, %v1007_v6, %v1009_v1 }
  0x9e   : > { %5814 = vmatmul.mubr.msk.bf16.gmra.mrb[28].mxu1 %vm524_vm2, %v7111_v34 }
  0x9f   : > { %5817 = vmatprep.mubr.msk.bf16.mxu1 %vm524_vm2, %v7133_v55 }
  0xa1   : > { %6004 = vmatmul.mubr.msk.bf16.gmra.mrb[8].mxu0 %vm524_vm2, %v2729_v23  ;;  %v2739_v23 = vsel %vm2258_vm4, %v2736_v31, %v2738_v35 }
  0xa2   : > { %6007 = vmatprep.mubr.msk.bf16.mxu0 %vm524_vm2, %v2731_v41  ;;  %v1013_v41 = vrot.slane %v6988_v18, 1 }
  0xa4   : > { %v1014_v18 = vsel %vm1001_vm5, %v1011_v16, %v1013_v41  ;;  %v1016_v6 = vsel %vm1001_vm5, %v1013_v41, %v1015_v48  ;;  %v1023_v41 = vrot.slane %v7063_v44, 1 }
  0xa6   : > { %5818 = vmatmul.mubr.msk.bf16.gmra.mrb[32].mxu1 %vm524_vm2, %v7138_v61 }
  0xa7   : > { %5827 = vmatprep.mubr.msk.bf16.mxu1 %vm524_vm2, %v1004_v46  ;;  %v7423_v46 = vld [vmem:[%s6899_s8 + $0x80] sm:$0xff]  }
  0xa8   : > { %v2744_v26 = vrot.slane %v7423_v46, 2 }
  0xa9   : > { %6008 = vmatmul.mubr.msk.bf16.gmra.mrb[12].mxu0 %vm524_vm2, %v2733_v50  ;;  %v7434_v50 = vld [vmem:[%s6899_s8 + $0x88] sm:$0xff]  }
  0xaa   : > { %6011 = vmatprep.mubr.msk.bf16.mxu0 %vm524_vm2, %v2735_v56  ;;  %v2746_v56 = vrot.slane %v7434_v50, 2  ;;  %v2745_v31 = vsel %vm2258_vm4, %v2742_v32, %v2744_v26  ;;  %v6512_v32 = vld [vmem:[%s6899_s8 + $0xa0] ss:$0 sps:$4 sm:$0x33]  }
  0xac   : > { %v2747_v35 = vsel %vm2258_vm4, %v2744_v26, %v2746_v56 }
  0xae   : > { %5828 = vmatmul.mubr.msk.bf16.vlgmr.msra.gmra.mrb[0].mxu1 %vm524_vm2, %v1006_v37  ;;  %v1017_v37 = vrot.slane %v7016_v51, 1 }
  0xaf   : > { %5831 = vmatprep.mubr.msk.bf16.mxu1 %vm524_vm2, %v1008_v13  ;;  %5864 = vmatpush3.bf16.msra.mxu1 %v7229_v39  ;;  %v1012_v39 = vsel %vm1001_vm5, %v1009_v1, %v1011_v16  ;;  %v7447_v13 = vld [vmem:[%s6899_s8 + $0x90] sm:$0xff]   ;;  %v7452_v1 = vld [vmem:[%s6899_s8 + $0x98] sm:$0xff]  }
  0xb0   : > { %5865 = vmatprep.subr.bf16.mxu1 %v6510_v36  ;;  %v2748_v16 = vrot.slane %v7447_v13, 2 }
  0xb1   : > { %6012 = vmatmul.mubr.msk.bf16.gmra.mrb[16].mxu0 %vm524_vm2, %v2737_v11  ;;  %v1018_v11 = vsel %vm1001_vm5, %v1015_v48, %v1017_v37 }
  0xb2   : > { %6015 = vmatprep.mubr.msk.bf16.mxu0 %vm524_vm2, %v2739_v23  ;;  %v2750_v23 = vrot.slane %v7452_v1, 2 }
  0xb3   : > { %5866 = vmatpush3.bf16.msra.mxu1 %v6510_v36  ;;  %v1019_v36 = vrot.slane %v7032_v2, 1  ;;  %v3054_v2 = vshll.u32 %v7279_v20, 16 }
  0xb4   : > { %6412 = vmatprep.subr.msk.bf16.mxu1 %vm579_vm0, %v6514_v15  ;;  %v3051_v15 = vshrl.u32 %v7279_v20, 16  ;;  %v2751_v48 = vsel %vm2258_vm4, %v2748_v16, %v2750_v23 }
  0xb5   : > { %v1020_v51 = vsel %vm1001_vm5, %v1017_v37, %v1019_v36  ;;  %v3071_v37 = vshll.u32 %v7295_v47, 16 }
  0xb6   : > { %5832 = vmatmul.mubr.msk.bf16.gmra.mrb[4].mxu1 %vm524_vm2, %v1010_v53  ;;  %v3059_v53 = vshrl.u32 %v7282_v40, 16 }
  0xb7   : > { %5835 = vmatprep.mubr.msk.bf16.mxu1 %vm524_vm2, %v1012_v39  ;;  %5868 = vmatpush3.bf16.msra.mxu1 %v1567_v29  ;;  %v1021_v39 = vrot.slane %v7052_v33, 1  ;;  %v2749_v29 = vsel %vm2258_vm4, %v2746_v56, %v2748_v16  ;;  %v3068_v56 = vshrl.u32 %v7295_v47, 16 }
  0xb8   : > { %6115 = vmatprep.subr.bf16.mxu1 %v7429_v19  ;;  %v3061_v20 = vrot.slane %v3059_v53, 2 }
  0xb9   : > { %6016 = vmatmul.mubr.msk.bf16.gmra.mrb[20].mxu0 %vm524_vm2, %v2741_v43  ;;  %v3053_v43 = vrot.slane %v3051_v15, 2  ;;  %v1022_v26 = vsel %vm1001_vm5, %v1019_v36, %v1021_v39  ;;  %v1024_v33 = vsel %vm1001_vm5, %v1021_v39, %v1023_v41  ;;  %v1025_v36 = vrot.slane %v7080_v58, 1 }
  0xba   : > { %6019 = vmatprep.mubr.msk.bf16.mxu0 %vm524_vm2, %v2743_v38  ;;  %v3056_v38 = vrot.slane %v3054_v2, 3  ;;  %v3073_v15 = vrot.slane %v3071_v37, 3  ;;  %v1027_v2 = vrot.slane %v7084_v0, 1  ;;  %v3086_v58 = vshrl.u32 %v7311_v52, 16 }
  0xbb   : > { %v3095_v0 = vshrl.u32 %v7315_v57, 16 }
  0xbc   : > { %v3057_v44 = vor.u32 %v3056_v38, %v3053_v43  ;;  %v1028_v43 = vsel %vm1001_vm5, %v1025_v36, %v1027_v2  ;;  %v3098_v38 = vshll.u32 %v7315_v57, 16 }
  0xbe   : > { %5836 = vmatmul.mubr.msk.bf16.gmra.mrb[8].mxu1 %vm524_vm2, %v1014_v18  ;;  %v3064_v18 = vrot.slane %v3062_v5, 3  ;;  %v3100_v37 = vrot.slane %v3098_v38, 3 }
  0xbf   : > { %5839 = vmatprep.mubr.msk.bf16.mxu1 %vm524_vm2, %v1016_v6  ;;  %v2752_v6 = vrot.slane %v6512_v32, 2 }
  0xc1   : > { %6020 = vmatmul.mubr.msk.bf16.gmra.mrb[24].mxu0 %vm524_vm2, %v2745_v31  ;;  %v3065_v31 = vor.u32 %v3064_v18, %v3061_v20  ;;  %v2753_v16 = vsel %vm2258_vm4, %v2750_v23, %v2752_v6  ;;  %v3089_v23 = vshll.u32 %v7311_v52, 16  ;;  %v3088_v18 = vrot.slane %v3086_v58, 2 }
  0xc2   : > { %6023 = vmatprep.mubr.msk.bf16.mxu0 %vm524_vm2, %v2747_v35  ;;  %v3077_v35 = vshrl.u32 %v7299_v49, 16  ;;  %v1031_v6 = vrot.slane %v7111_v34, 1  ;;  %v3104_v34 = vshrl.u32 %v7334_v60, 16 }
  0xc3   : > { %v3066_v53 = vsel %vm3049_vm6, %v3057_v44, %v3065_v31  ;;  %v6515_v44 = vld [vmem:[%s8776_s1 + $0xa8] sm:$0xff]  }
  0xc4   : > { %v3079_v5 = vrot.slane %v3077_v35, 2 }
  0xc6   : > { %5840 = vmatmul.mubr.msk.bf16.gmra.mrb[12].mxu1 %vm524_vm2, %v1018_v11  ;;  %v3080_v11 = vshll.u32 %v7299_v49, 16 }
  0xc7   : > { %5843 = vmatprep.mubr.msk.bf16.mxu1 %vm524_vm2, %v1020_v51  ;;  %v3070_v51 = vrot.slane %v3068_v56, 2  ;;  %v3097_v56 = vrot.slane %v3095_v0, 2  ;;  %v3125_v0 = vshll.u32 %v7360_v45, 16 }
  0xc8   : > { %v3082_v39 = vrot.slane %v3080_v11, 3  ;;  %v3107_v11 = vshll.u32 %v7334_v60, 16 }
  0xc9   : > { %6024 = vmatmul.mubr.msk.bf16.gmra.mrb[28].mxu0 %vm524_vm2, %v2749_v29  ;;  %v1026_v29 = vsel %vm1001_vm5, %v1023_v41, %v1025_v36  ;;  %v3074_v32 = vor.u32 %v3073_v15, %v3070_v51  ;;  %v1029_v41 = vrot.slane %v7104_v28, 1  ;;  %v3101_v36 = vor.u32 %v3100_v37, %v3097_v56  ;;  %v6516_v15 = vld [vmem:[%s8776_s1 + $0xb0] ss:$0 sps:$4 sm:$0x33]  }
  0xca   : > { %6027 = vmatprep.mubr.msk.bf16.mxu0 %vm524_vm2, %v2751_v48  ;;  %v3083_v48 = vor.u32 %v3082_v39, %v3079_v5  ;;  %v3116_v51 = vshll.u32 %v7338_v21, 16  ;;  %v3109_v5 = vrot.slane %v3107_v11, 3  ;;  %v1035_v39 = vrot.slane %v7138_v61, 1 }
  0xcb   : > { %v3075_v20 = vsel %vm3049_vm6, %v3065_v31, %v3074_v32  ;;  %v1030_v35 = vsel %vm1001_vm5, %v1027_v2, %v1029_v41  ;;  %v1032_v31 = vsel %vm1001_vm5, %v1029_v41, %v1031_v6  ;;  %v3623_v58 = vsel %vm579_vm0, %v6516_v15, 0 }
  0xcc   : > { %v3131_v41 = vshrl.u32 %v7365_v42, 16 }
  0xce   : > { %5844 = vmatmul.mubr.msk.bf16.gmra.mrb[16].mxu1 %vm524_vm2, %v1022_v26  ;;  %v3091_v26 = vrot.slane %v3089_v23, 3  ;;  %v3133_v11 = vrot.slane %v3131_v41, 2 }
  0xcf   : > { %5847 = vmatprep.mubr.msk.bf16.mxu1 %vm524_vm2, %v1024_v33  ;;  %v3084_v33 = vsel %vm3049_vm6, %v3074_v32, %v3083_v48 }
  0xd0   : > { %v3092_v28 = vor.u32 %v3091_v26, %v3088_v18  ;;  %v4133_v18 = vld [vmem:[%s7536_s7] sm:$0xff]  ;;  %v4135_v26 = vld [vmem:[%s7536_s7 + $0x10] sm:$0xff] }
  0xd1   : > { %6028 = vmatmul.mubr.msk.bf16.gmra.mrb[32].mxu0 %vm524_vm2, %v2753_v16  ;;  %v3113_v16 = vshrl.u32 %v7338_v21, 16  ;;  %4205 = vrot.lane.b32.xlu0 %v4133_v18, %s6832_s9 }
  0xd2   : > { %6037 = vmatprep.mubr.msk.bf16.mxu0 %vm524_vm2, %v3066_v53  ;;  %v3093_v2 = vsel %vm3049_vm6, %v3083_v48, %v3092_v28  ;;  %v3106_v53 = vrot.slane %v3104_v34, 2  ;;  %v3122_v48 = vshrl.u32 %v7360_v45, 16  ;;  %4209 = vrot.lane.b32.xlu1 %v4135_v26, %s6832_s9  ;;  %v4140_v26 = vld [vmem:[%s7536_s7 + $0x38] sm:$0xff] }
  0xd3   : > { %v3115_v32 = vrot.slane %v3113_v16, 2  ;;  %v4136_v16 = vld [vmem:[%s7536_s7 + $0x18] sm:$0xff] }
  0xd4   : > { %v3110_v23 = vor.u32 %v3109_v5, %v3106_v53  ;;  %v3124_v37 = vrot.slane %v3122_v48, 2  ;;  %v3149_v5 = vshrl.u32 %v7383_v12, 16 }
  0xd6   : > { %5848 = vmatmul.mubr.msk.bf16.gmra.mrb[20].mxu1 %vm524_vm2, %v1026_v29  ;;  %v3102_v29 = vsel %vm3049_vm6, %v3092_v28, %v3101_v36  ;;  %v3111_v56 = vsel %vm3049_vm6, %v3101_v36, %v3110_v23  ;;  %4211 = vrot.lane.b32.xlu1 %v4136_v16, %s6832_s9 }
  0xd7   : > { %5851 = vmatprep.mubr.msk.bf16.mxu1 %vm524_vm2, %v1028_v43  ;;  %v3118_v43 = vrot.slane %v3116_v51, 3 }
  0xd9   : > { %6038 = vmatmul.mubr.msk.bf16.vlgmr.msra.gmra.mrb[0].mxu0 %vm524_vm2, %v3075_v20  ;;  %v3119_v38 = vor.u32 %v3118_v43, %v3115_v32  ;;  %v3134_v20 = vshll.u32 %v7365_v42, 16  ;;  %v6813_v32 = vld [vmem:[%s6899_s8 + $0x18] sm:$0xff]  }
  0xda   : > { %6074 = vmatpush3.bf16.msra.mxu0 %v7346_v9  ;;  %6041 = vmatprep.mubr.msk.bf16.mxu0 %vm524_vm2, %v3084_v33  ;;  %v1033_v9 = vrot.slane %v7133_v55, 1  ;;  %v1460_v33 = vrot.slane %v6930_v22, 1  ;;  %v1463_v43 = vrot.slane %v6813_v32, 1 }
  0xdb   : > { %6075 = vmatprep.subr.bf16.mxu0 %v6515_v44  ;;  %v3120_v34 = vsel %vm3049_vm6, %v3110_v23, %v3119_v38 }
  0xdc   : > { %v1034_v55 = vsel %vm1001_vm5, %v1031_v6, %v1033_v9  ;;  %v1036_v61 = vsel %vm1001_vm5, %v1033_v9, %v1035_v39  ;;  %v1037_v6 = vrot.slane %v7161_v24, 1  ;;  %v3136_v24 = vrot.slane %v3134_v20, 3 }
  0xdd   : > { %v3143_v9 = vshll.u32 %v7378_v30, 16  ;;  %v3151_v20 = vrot.slane %v3149_v5, 2 }
  0xde   : > { %5852 = vmatmul.mubr.msk.bf16.gmra.mrb[24].mxu1 %vm524_vm2, %v1030_v35  ;;  %6076 = vmatpush3.bf16.msra.mxu0 %v6515_v44  ;;  %v3127_v44 = vrot.slane %v3125_v0, 3  ;;  %v6812_v35 = vld [vmem:[%s6899_s8 + $0x10] sm:$0xff]   ;;  %v1038_v22 = vsel %vm1001_vm5, %v1035_v39, %v1037_v6  ;;  %v3137_v53 = vor.u32 %v3136_v24, %v3133_v11  ;;  %v3152_v39 = vshll.u32 %v7383_v12, 16  ;;  %v6815_v11 = vld [vmem:[%s6899_s8 + $0x28] sm:$0xff]  }
  0xdf   : > { %5855 = vmatprep.mubr.msk.bf16.mxu1 %vm524_vm2, %v1032_v31  ;;  %6418 = vmatprep.subr.msk.bf16.mxu0 %vm579_vm0, %v6516_v15  ;;  %v1461_v28 = vrot.slane %v6812_v35, 1  ;;  %v4134_v31 = vld [vmem:[%s7536_s7 + $0x8] sm:$0xff]  ;;  %v3140_v15 = vshrl.u32 %v7378_v30, 16  ;;  %v3145_v23 = vrot.slane %v3143_v9, 3  ;;  %v4139_v0 = vld [vmem:[%s7536_s7 + $0x30] sm:$0xff]  ;;  %v3167_v35 = vshrl.u32 %v7408_v25, 16 }
  0xe0   : > { %4207 = vrot.lane.b32.xlu0 %v4134_v31, %s6832_s9  ;;  %v3128_v36 = vor.u32 %v3127_v44, %v3124_v37  ;;  %v3154_v18 = vrot.slane %v3152_v39, 3  ;;  %v3161_v37 = vshll.u32 %v7400_v14, 16  ;;  %v3170_v31 = vshll.u32 %v7408_v25, 16  ;;  %v6817_v9 = vld [vmem:[%s8776_s1 + $0x58] sm:$0xff]  }
  0xe1   : > { %6042 = vmatmul.mubr.msk.bf16.gmra.mrb[4].mxu0 %vm524_vm2, %v3093_v2  ;;  %v1462_v51 = vsel %vm1001_vm5, %v1460_v33, %v1461_v28  ;;  %v4137_v2 = vld [vmem:[%s7536_s7 + $0x20] sm:$0xff]  ;;  %v1464_v6 = vsel %vm1001_vm5, %v1461_v28, %v1463_v43  ;;  %v1467_v24 = vrot.slane %v6815_v11, 1  ;;  %v3169_v5 = vrot.slane %v3167_v35, 2  ;;  %v4148_v11 = vld [vmem:[%s7536_s7 + $0x78] sm:$0xff] }
  0xe2   : > { %6045 = vmatprep.mubr.msk.bf16.mxu0 %vm524_vm2, %v3102_v29  ;;  %6078 = vmatpush3.bf16.msra.mxu0 %v3623_v58  ;;  %v4138_v29 = vld [vmem:[%s7536_s7 + $0x28] sm:$0xff]  ;;  %v3129_v58 = vsel %vm3049_vm6, %v3119_v38, %v3128_v36  ;;  %v3138_v41 = vsel %vm3049_vm6, %v3128_v36, %v3137_v53  ;;  %v3155_v44 = vor.u32 %v3154_v18, %v3151_v20  ;;  %v4141_v28 = vld [vmem:[%s7536_s7 + $0x40] sm:$0xff]  ;;  %v3163_v36 = vrot.slane %v3161_v37, 3  ;;  %v6819_v18 = vld [vmem:[%s6899_s8 + $0x38] sm:$0xff]  }
  0xe3   : > { %4215 = vrot.lane.b32.xlu1 %v4138_v29, %s6832_s9  ;;  %v3172_v39 = vrot.slane %v3170_v31, 3  ;;  %v4144_v29 = vld [vmem:[%s7536_s7 + $0x58] sm:$0xff]  ;;  %v4146_v20 = vld [vmem:[%s7536_s7 + $0x68] sm:$0xff] }
  0xe4   : > { %4213 = vrot.lane.b32.xlu0 %v4137_v2, %s6832_s9 }
  0xe6   : > { %5856 = vmatmul.mubr.msk.bf16.gmra.mrb[28].mxu1 %vm524_vm2, %v1034_v55  ;;  %v3142_v55 = vrot.slane %v3140_v15, 2 }
  0xe7   : > { %5859 = vmatprep.mubr.msk.bf16.mxu1 %vm524_vm2, %v1036_v61  ;;  %v6814_v61 = vld [vmem:[%s6899_s8 + $0x20] sm:$0xff]   ;;  %4219 = vrot.lane.b32.xlu1 %v4140_v26, %s6832_s9  ;;  %v1471_v26 = vrot.slane %v6819_v18, 1 }
  0xe8   : > { %v1465_v48 = vrot.slane %v6814_v61, 1  ;;  %4217 = vrot.lane.b32.xlu0 %v4139_v0, %s6832_s9  ;;  %v3146_v38 = vor.u32 %v3145_v23, %v3142_v55  ;;  %v3179_v55 = vshll.u32 %v7423_v46, 16  ;;  %v6818_v23 = vld [vmem:[%s8776_s1 + $0x60] ss:$0 sps:$4 sm:$0x33]   ;;  %v3173_v61 = vor.u32 %v3172_v39, %v3169_v5  ;;  %v6821_v5 = vld [vmem:[%s6899_s8 + $0x48] sm:$0xff]  }
  0xe9   : > { %6046 = vmatmul.mubr.msk.bf16.gmra.mrb[8].mxu0 %vm524_vm2, %v3111_v56  ;;  %v3158_v56 = vshrl.u32 %v7400_v14, 16  ;;  %v3188_v0 = vshll.u32 %v7434_v50, 16  ;;  %v1475_v39 = vrot.slane %v6821_v5, 1  ;;  %v1483_v5 = vrot.slane %v7212_v59, 1 }
  0xea   : > { %6049 = vmatprep.mubr.msk.bf16.mxu0 %vm524_vm2, %v3120_v34  ;;  %v1466_v33 = vsel %vm1001_vm5, %v1463_v43, %v1465_v48  ;;  %v4142_v34 = vld [vmem:[%s7536_s7 + $0x48] sm:$0xff]  ;;  %v3147_v16 = vsel %vm3049_vm6, %v3137_v53, %v3146_v38  ;;  %v3156_v2 = vsel %vm3049_vm6, %v3146_v38, %v3155_v44  ;;  %v1468_v53 = vsel %vm1001_vm5, %v1465_v48, %v1467_v24 }
  0xeb   : > { %4223 = vrot.lane.b32.xlu1 %v4142_v34, %s6832_s9  ;;  %v3185_v48 = vshrl.u32 %v7434_v50, 16  ;;  %v4147_v34 = vld [vmem:[%s7536_s7 + $0x70] sm:$0xff] }
  0xec   : > { %4221 = vrot.lane.b32.xlu0 %v4141_v28, %s6832_s9  ;;  %v3190_v28 = vrot.slane %v3188_v0, 3  ;;  %v4151_v0 = vld [vmem:[%s7536_s7 + $0x90] sm:$0xff] }
  0xed   : > { %v3187_v31 = vrot.slane %v3185_v48, 2 }
  0xee   : > { %5860 = vmatmul.mubr.msk.bf16.gmra.mrb[32].mxu1 %vm524_vm2, %v1038_v22  ;;  %v3160_v22 = vrot.slane %v3158_v56, 2  ;;  %v6820_v56 = vld [vmem:[%s6899_s8 + $0x40] sm:$0xff]  }
  0xef   : > { %5869 = vmatprep.mubr.msk.bf16.mxu1 %vm524_vm2, %v1462_v51  ;;  %v6816_v51 = vld [vmem:[%s6899_s8 + $0x30] sm:$0xff]   ;;  %4227 = vrot.lane.b32.xlu1 %v4144_v29, %s6832_s9  ;;  %v1473_v37 = vrot.slane %v6820_v56, 1  ;;  %v4153_v56 = vld [vmem:[%s7536_s7 + $0xa0] sm:$0xff] }
  0xf0   : > { %v1469_v15 = vrot.slane %v6816_v51, 1  ;;  %v3164_v32 = vor.u32 %v3163_v36, %v3160_v22  ;;  %v3197_v22 = vshll.u32 %v7447_v13, 16  ;;  %v3191_v36 = vor.u32 %v3190_v28, %v3187_v31 }
  0xf1   : > { %6050 = vmatmul.mubr.msk.bf16.gmra.mrb[12].mxu0 %vm524_vm2, %v3129_v58  ;;  %v3176_v58 = vshrl.u32 %v7423_v46, 16  ;;  %v3203_v51 = vshrl.u32 %v7452_v1, 16 }
  0xf2   : > { %6053 = vmatprep.mubr.msk.bf16.mxu0 %vm524_vm2, %v3138_v41  ;;  %v1470_v43 = vsel %vm1001_vm5, %v1467_v24, %v1469_v15  ;;  %v4145_v41 = vld [vmem:[%s7536_s7 + $0x60] sm:$0xff]  ;;  %v3174_v35 = vsel %vm3049_vm6, %v3164_v32, %v3173_v61  ;;  %v1474_v24 = vsel %vm1001_vm5, %v1471_v26, %v1473_v37 }
  0xf3   : > { %v3178_v38 = vrot.slane %v3176_v58, 2  ;;  %4231 = vrot.lane.b32.xlu1 %v4146_v20, %s6832_s9  ;;  %v7644_v58 = vld [vmem:[%s6899_s8 + $0xa0] ss:$0 sps:$4 sm:$0x77]  }
  0xf6   : > { %5870 = vmatmul.mubr.msk.bf16.vlgmr.msra.gmra.mrb[0].mxu1 %vm524_vm2, %v1464_v6  ;;  %v3165_v6 = vsel %vm3049_vm6, %v3155_v44, %v3164_v32  ;;  %v6822_v32 = vld [vmem:[%s6899_s8 + $0x50] sm:$0xff]  }
  0xf7   : > { %5873 = vmatprep.mubr.msk.bf16.mxu1 %vm524_vm2, %v1466_v33  ;;  %6118 = vmatpush3.bf16.msra.mxu1 %v7429_v19  ;;  %v4143_v19 = vld [vmem:[%s7536_s7 + $0x50] sm:$0xff]  ;;  %v3181_v33 = vrot.slane %v3179_v55, 3 }
  0xf8   : > { %6116 = vmatprep.subr.bf16.mxu1 %v6817_v9  ;;  %4225 = vrot.lane.b32.xlu0 %v4143_v19, %s6832_s9 }
  0xf9   : > { %6054 = vmatmul.mubr.msk.bf16.gmra.mrb[16].mxu0 %vm524_vm2, %v3147_v16  ;;  %v3182_v44 = vor.u32 %v3181_v33, %v3178_v38  ;;  %v3194_v16 = vshrl.u32 %v7447_v13, 16  ;;  %4235 = vrot.lane.b32.xlu1 %v4148_v11, %s6832_s9  ;;  %v3505_v33 = vld [vmem:[%s6899_s8 + $0x10] sm:$0x8] }
  0xfa   : > { %6057 = vmatprep.mubr.msk.bf16.mxu0 %vm524_vm2, %v3156_v2  ;;  %v4150_v2 = vld [vmem:[%s7536_s7 + $0x88] sm:$0xff] }
  0xfb   : > { %6119 = vmatpush3.bf16.msra.mxu1 %v6817_v9  ;;  %v3206_v9 = vshll.u32 %v7452_v1, 16  ;;  %v3183_v19 = vsel %vm3049_vm6, %v3173_v61, %v3182_v44  ;;  %v3196_v29 = vrot.slane %v3194_v16, 2  ;;  %v3192_v55 = vsel %vm3049_vm6, %v3182_v44, %v3191_v36  ;;  %v4155_v16 = vld [vmem:[%s7536_s7 + $0xb0] sm:$0xff] }
  0xfc   : > { %6414 = vmatprep.subr.msk.bf16.mxu1 %vm579_vm0, %v6818_v23  ;;  %4229 = vrot.lane.b32.xlu0 %v4145_v41, %s6832_s9  ;;  %v3205_v23 = vrot.slane %v3203_v51, 2  ;;  %v4152_v41 = vld [vmem:[%s7536_s7 + $0x98] sm:$0xff]  ;;  %v1476_v61 = vsel %vm1001_vm5, %v1473_v37, %v1475_v39  ;;  %v4154_v37 = vld [vmem:[%s7536_s7 + $0xa8] sm:$0xff] }
  0xfd   : > { %v3208_v48 = vrot.slane %v3206_v9, 3  ;;  %4239 = vrot.lane.b32.xlu1 %v4150_v2, %s6832_s9  ;;  %v3517_v2 = vrot.slane %v7282_v40, 3 }
  0xfe   : > { %5874 = vmatmul.mubr.msk.bf16.gmra.mrb[4].mxu1 %vm524_vm2, %v1468_v53  ;;  %v3199_v53 = vrot.slane %v3197_v22, 3  ;;  %v4156_v22 = vld [vmem:[%s7536_s7 + $0xb8] sm:$0xff] }
  0xff   : > { %5877 = vmatprep.mubr.msk.bf16.mxu1 %vm524_vm2, %v1470_v43  ;;  %6120 = vmatpush3.bf16.msra.mxu1 %v6894_v7  ;;  %v1472_v7 = vsel %vm1001_vm5, %v1469_v15, %v1471_v26  ;;  %v4149_v15 = vld [vmem:[%s7536_s7 + $0x80] sm:$0xff]  ;;  %v1477_v43 = vrot.slane %v6822_v32, 1  ;;  %v3212_v26 = vshrl.u32 %v7644_v58, 16  ;;  %v3209_v38 = vor.u32 %v3208_v48, %v3205_v23 }
 0x100   : > { %4233 = vrot.lane.b32.xlu0 %v4147_v34, %s6832_s9  ;;  %v3200_v20 = vor.u32 %v3199_v53, %v3196_v29  ;;  %v3519_v53 = vrot.slane %v7295_v47, 3  ;;  %v1489_v48 = vrot.slane %v7243_v10, 1 }
 0x101   : > { %6058 = vmatmul.mubr.msk.bf16.gmra.mrb[20].mxu0 %vm524_vm2, %v3165_v6  ;;  %v1478_v18 = vsel %vm1001_vm5, %v1475_v39, %v1477_v43  ;;  %v3215_v6 = vshll.u32 %v7644_v58, 16  ;;  %4243 = vrot.lane.b32.xlu1 %v4152_v41, %s6832_s9  ;;  %v3214_v34 = vrot.slane %v3212_v26, 2  ;;  %v1493_v26 = vrot.slane %v7259_v62, 1 }
 0x102   : > { %6061 = vmatprep.mubr.msk.bf16.mxu0 %vm524_vm2, %v3174_v35  ;;  %v6823_v35 = vld [vmem:[%s6899_s8 + $0x58] sm:$0xff]   ;;  %v3201_v28 = vsel %vm3049_vm6, %v3191_v36, %v3200_v20  ;;  %v3210_v44 = vsel %vm3049_vm6, %v3200_v20, %v3209_v38  ;;  %v3520_v23 = vsel %vm3515_vm7, %v3517_v2, %v3519_v53  ;;  %v1491_v20 = vrot.slane %v7255_v17, 1 }
 0x103   : > { %v1479_v31 = vrot.slane %v6823_v35, 1  ;;  %v3217_v11 = vrot.slane %v3215_v6, 3  ;;  %v1892_v6 = vshrl.u32 %v7195_v54, 16 }
 0x104   : > { %4237 = vrot.lane.b32.xlu0 %v4149_v15, %s6832_s9 }
 0x105   : > { %4247 = vrot.lane.b32.xlu1 %v4154_v37, %s6832_s9  ;;  %v1480_v51 = vsel %vm1001_vm5, %v1477_v43, %v1479_v31  ;;  %v3218_v36 = vor.u32 %v3217_v11, %v3214_v34  ;;  %v3521_v43 = vrot.slane %v7299_v49, 3  ;;  %v3523_v49 = vrot.slane %v7311_v52, 3 }
 0x106   : > { %5878 = vmatmul.mubr.msk.bf16.gmra.mrb[8].mxu1 %vm524_vm2, %v1472_v7  ;;  %v1481_v7 = vrot.slane %v7195_v54, 1  ;;  %v1494_v37 = vsel %vm1001_vm5, %v1491_v20, %v1493_v26  ;;  %v1894_v35 = vrot.slane %v1892_v6, 1  ;;  %v1901_v34 = vshrl.u32 %v7212_v59, 16 }
 0x107   : > { %5881 = vmatprep.mubr.msk.bf16.mxu1 %vm524_vm2, %v1474_v24  ;;  %v5487_v24 = vcombine.low %v3505_v33, %v7269_v27  ;;  %v4157_v27 = vld [vmem:[%s7536_s7 + $0xc0] sm:$0xff]  ;;  %v3219_v39 = vsel %vm3049_vm6, %v3209_v38, %v3218_v36  ;;  %v1895_v38 = vshll.u32 %v7195_v54, 16  ;;  %v6519_v33 = vld [vmem:[%s6899_s8 + $0x98] ss:$0 sps:$4 sm:$0x11]   ;;  %v1904_v11 = vshll.u32 %v7212_v59, 16 }
 0x108   : > { %4241 = vrot.lane.b32.xlu0 %v4151_v0, %s6832_s9  ;;  %v1482_v9 = vsel %vm1001_vm5, %v1479_v31, %v1481_v7  ;;  %v1484_v40 = vsel %vm1001_vm5, %v1481_v7, %v1483_v5  ;;  %v3522_v0 = vsel %vm3515_vm7, %v3519_v53, %v3521_v43  ;;  %v1495_v54 = vrot.slane %v6519_v33, 1 }
 0x109   : > { %6062 = vmatmul.mubr.msk.bf16.gmra.mrb[24].mxu0 %vm524_vm2, %v3183_v19  ;;  %v3516_v15 = vrot.slane %v5487_v24, 3  ;;  %4251 = vrot.lane.b32.xlu1 %v4156_v22, %s6832_s9  ;;  %v1485_v19 = vrot.slane %v7219_v63, 1  ;;  %v1897_v31 = vrot.slane %v1895_v38, 2  ;;  %v1913_v24 = vshll.u32 %v7219_v63, 16 }
 0x10a   : > { %6065 = vmatprep.mubr.msk.bf16.mxu0 %vm524_vm2, %v3192_v55  ;;  %v1487_v55 = vrot.slane %v7238_v3, 1  ;;  %v1903_v22 = vrot.slane %v1901_v34, 1  ;;  %v3531_v36 = vrot.slane %v7360_v45, 3  ;;  %v1928_v45 = vshrl.u32 %v7243_v10, 16  ;;  %v4159_v34 = vld [vmem:[%s7536_s7 + $0xd0] sm:$0xff] }
 0x10b   : > { %v3518_v29 = vsel %vm3515_vm7, %v3516_v15, %v3517_v2  ;;  %v1486_v32 = vsel %vm1001_vm5, %v1483_v5, %v1485_v19  ;;  %v1915_v15 = vrot.slane %v1913_v24, 2  ;;  %v3533_v2 = vrot.slane %v7365_v42, 3 }
 0x10c   : > { %4245 = vrot.lane.b32.xlu0 %v4153_v56, %s6832_s9  ;;  %v1488_v47 = vsel %vm1001_vm5, %v1485_v19, %v1487_v55  ;;  %v1490_v41 = vsel %vm1001_vm5, %v1487_v55, %v1489_v48  ;;  %v3527_v56 = vrot.slane %v7334_v60, 3  ;;  %v1910_v60 = vshrl.u32 %v7219_v63, 16 }
 0x10d   : > { %v1922_v5 = vshll.u32 %v7238_v3, 16  ;;  %v1958_v33 = vshll.u32 %v7275_v8, 16 }
 0x10e   : > { %5882 = vmatmul.mubr.msk.bf16.gmra.mrb[12].mxu1 %vm524_vm2, %v1476_v61  ;;  %v3525_v61 = vrot.slane %v7315_v57, 3  ;;  %v1492_v57 = vsel %vm1001_vm5, %v1489_v48, %v1491_v20  ;;  %v1937_v48 = vshrl.u32 %v7255_v17, 16 }
 0x10f   : > { %5885 = vmatprep.mubr.msk.bf16.mxu1 %vm524_vm2, %v1478_v18  ;;  %v3524_v18 = vsel %vm3515_vm7, %v3521_v43, %v3523_v49  ;;  %v1924_v53 = vrot.slane %v1922_v5, 2  ;;  %v1930_v43 = vrot.slane %v1928_v45, 1 }
 0x110   : > { %4249 = vrot.lane.b32.xlu0 %v4155_v16, %s6832_s9  ;;  %v3526_v52 = vsel %vm3515_vm7, %v3523_v49, %v3525_v61  ;;  %v3528_v7 = vsel %vm3515_vm7, %v3525_v61, %v3527_v56  ;;  %v1939_v20 = vrot.slane %v1937_v48, 1 }
 0x111   : > { %6066 = vmatmul.mubr.msk.bf16.gmra.mrb[28].mxu0 %vm524_vm2, %v3201_v28  ;;  %v3529_v28 = vrot.slane %v7338_v21, 3  ;;  %v1496_v21 = vsel %vm1001_vm5, %v1493_v26, %v1495_v54 }
 0x112   : > { %6069 = vmatprep.mubr.msk.bf16.mxu0 %vm524_vm2, %v3210_v44  ;;  %v1898_v44 = vor.u32 %v1897_v31, %v1894_v35  ;;  %v4158_v35 = vld [vmem:[%s7536_s7 + $0xc8] sm:$0xff] }
 0x113   : > { %v3530_v16 = vsel %vm3515_vm7, %v3527_v56, %v3529_v28  ;;  %4255 = vrot.lane.b32.xlu1 %v4158_v35, %s6832_s9 }
 0x114   : > { %4253 = vrot.lane.b32.xlu0 %v4157_v27, %s6832_s9  ;;  %v1899_v59 = vsel %vm1792_vm3, %v7093_v4, %v1898_v44  ;;  %v1919_v27 = vshrl.u32 %v7238_v3, 16  ;;  %v1931_v4 = vshll.u32 %v7243_v10, 16 }
 0x116   : > { %5886 = vmatmul.mubr.msk.bf16.gmra.mrb[16].mxu1 %vm524_vm2, %v1480_v51  ;;  %v1906_v51 = vrot.slane %v1904_v11, 2  ;;  %v1933_v55 = vrot.slane %v1931_v4, 2  ;;  %v4160_v11 = vld [vmem:[%s7536_s7 + $0xd8] sm:$0xff] }
 0x117   : > { %5889 = vmatprep.mubr.msk.bf16.mxu1 %vm524_vm2, %v1482_v9  ;;  %v1912_v9 = vrot.slane %v1910_v60, 1  ;;  %4259 = vrot.lane.b32.xlu1 %v4160_v11, %s6832_s9 }
 0x118   : > { %v1907_v63 = vor.u32 %v1906_v51, %v1903_v22  ;;  %v1934_v49 = vor.u32 %v1933_v55, %v1930_v43  ;;  %4257 = vrot.lane.b32.xlu0 %v4159_v34, %s6832_s9  ;;  %v4163_v22 = vld [vmem:[%s7536_s7 + $0xf0] sm:$0xff]  ;;  %v4164_v51 = vld [vmem:[%s7536_s7 + $0xf8] sm:$0xff] }
 0x119   : > { %6070 = vmatmul.mubr.msk.bf16.gmra.mrb[32].mxu0 %vm524_vm2, %v3219_v39  ;;  %v3532_v39 = vsel %vm3515_vm7, %v3529_v28, %v3531_v36  ;;  %v1916_v19 = vor.u32 %v1915_v15, %v1912_v9  ;;  %v1960_v28 = vrot.slane %v1958_v33, 2 }
 0x11a   : > { %6079 = vmatprep.mubr.msk.bf16.mxu0 %vm524_vm2, %v3518_v29  ;;  %v3534_v29 = vsel %vm3515_vm7, %v3531_v36, %v3533_v2  ;;  %v1908_v42 = vsel %vm1792_vm3, %v1898_v44, %v1907_v63  ;;  %v4161_v44 = vld [vmem:[%s7536_s7 + $0xe0] sm:$0xff]  ;;  %v3549_v36 = vrot.slane %v7452_v1, 3  ;;  %v3551_v1 = vrot.slane %v7644_v58, 3 }
 0x11b   : > { %v1917_v3 = vsel %vm1792_vm3, %v1907_v63, %v1916_v19  ;;  %v4168_v63 = vld [vmem:[%s7536_s7 + $0x118] sm:$0xff] }
 0x11c   : > { %4261 = vrot.lane.b32.xlu0 %v4161_v44, %s6832_s9 }
 0x11e   : > { %5890 = vmatmul.mubr.msk.bf16.gmra.mrb[20].mxu1 %vm524_vm2, %v1484_v40  ;;  %v1921_v40 = vrot.slane %v1919_v27, 1  ;;  %v3552_v27 = vsel %vm3515_vm7, %v3549_v36, %v3551_v1 }
 0x11f   : > { %5893 = vmatprep.mubr.msk.bf16.mxu1 %vm524_vm2, %v1486_v32  ;;  %v3535_v32 = vrot.slane %v7378_v30, 3  ;;  %v1946_v30 = vshrl.u32 %v7259_v62, 16 }
 0x120   : > { %v1925_v10 = vor.u32 %v1924_v53, %v1921_v40  ;;  %4265 = vrot.lane.b32.xlu0 %v4163_v22, %s6832_s9 }
 0x121   : > { %6080 = vmatmul.mubr.msk.bf16.vlgmr.msra.gmra.mrb[0].mxu0 %vm524_vm2, %v3520_v23  ;;  %v3537_v23 = vrot.slane %v7383_v12, 3  ;;  %v1948_v6 = vrot.slane %v1946_v30, 1 }
 0x122   : > { %6083 = vmatprep.mubr.msk.bf16.mxu0 %vm524_vm2, %v3522_v0  ;;  %v1940_v0 = vshll.u32 %v7255_v17, 16  ;;  %v1926_v12 = vsel %vm1792_vm3, %v1916_v19, %v1925_v10  ;;  %v3539_v17 = vrot.slane %v7400_v14, 3  ;;  %v1935_v26 = vsel %vm1792_vm3, %v1925_v10, %v1934_v49 }
 0x123   : > { %v3538_v61 = vsel %vm3515_vm7, %v3535_v32, %v3537_v23 }
 0x124   : > { %v3540_v56 = vsel %vm3515_vm7, %v3537_v23, %v3539_v17 }
 0x126   : > { %5894 = vmatmul.mubr.msk.bf16.gmra.mrb[24].mxu1 %vm524_vm2, %v1488_v47  ;;  %v3536_v47 = vsel %vm3515_vm7, %v3533_v2, %v3535_v32  ;;  %v4167_v2 = vld [vmem:[%s7536_s7 + $0x110] sm:$0xff] }
 0x127   : > { %5897 = vmatprep.mubr.msk.bf16.mxu1 %vm524_vm2, %v1490_v41  ;;  %v1949_v41 = vshll.u32 %v7259_v62, 16 }
 0x129   : > { %6084 = vmatmul.mubr.msk.bf16.gmra.mrb[4].mxu0 %vm524_vm2, %v3524_v18  ;;  %v1942_v18 = vrot.slane %v1940_v0, 2  ;;  %v1951_v38 = vrot.slane %v1949_v41, 2  ;;  %v7832_v41 = vld [vmem:[%s8777_s2] ss:$0 sm:$0xff] }
 0x12a   : > { %6087 = vmatprep.mubr.msk.bf16.mxu0 %vm524_vm2, %v3526_v52  ;;  %v3541_v52 = vrot.slane %v7408_v25, 3 }
 0x12b   : > { %v1943_v62 = vor.u32 %v1942_v18, %v1939_v20  ;;  %v1952_v14 = vor.u32 %v1951_v38, %v1948_v6 }
 0x12d   : > { %v1944_v25 = vsel %vm1792_vm3, %v1934_v49, %v1943_v62  ;;  %v1953_v54 = vsel %vm1792_vm3, %v1943_v62, %v1952_v14 }
 0x12e   : > { %5898 = vmatmul.mubr.msk.bf16.gmra.mrb[28].mxu1 %vm524_vm2, %v1492_v57  ;;  %v1955_v57 = vshrl.u32 %v7275_v8, 16  ;;  %v3543_v8 = vrot.slane %v7423_v46, 3 }
 0x12f   : > { %5901 = vmatprep.mubr.msk.bf16.mxu1 %vm524_vm2, %v1494_v37  ;;  %v3542_v37 = vsel %vm3515_vm7, %v3539_v17, %v3541_v52 }
 0x130   : > { %v1957_v31 = vrot.slane %v1955_v57, 1  ;;  %v3544_v46 = vsel %vm3515_vm7, %v3541_v52, %v3543_v8 }
 0x131   : > { %6088 = vmatmul.mubr.msk.bf16.gmra.mrb[8].mxu0 %vm524_vm2, %v3528_v7  ;;  %v3545_v7 = vrot.slane %v7434_v50, 3  ;;  %v4162_v50 = vld [vmem:[%s7536_s7 + $0xe8] sm:$0xff] }
 0x132   : > { %6091 = vmatprep.mubr.msk.bf16.mxu0 %vm524_vm2, %v3530_v16  ;;  %v1961_v60 = vor.u32 %v1960_v28, %v1957_v31  ;;  %4263 = vrot.lane.b32.xlu1 %v4162_v50, %s6832_s9 }
 0x133   : > { %v3546_v24 = vsel %vm3515_vm7, %v3543_v8, %v3545_v7 }
 0x134   : > { %v1962_v16 = vsel %vm1792_vm3, %v1952_v14, %v1961_v60 }
 0x136   : > { %5902 = vmatmul.mubr.msk.bf16.gmra.mrb[32].mxu1 %vm524_vm2, %v1496_v21  ;;  %v3547_v21 = vrot.slane %v7447_v13, 3  ;;  %4267 = vrot.lane.b32.xlu1 %v4164_v51, %s6832_s9  ;;  %v4166_v13 = vld [vmem:[%s7536_s7 + $0x108] sm:$0xff] }
 0x137   : > { %5931 = vmatprep.mubr.msk.bf16.mxu1 %vm524_vm2, %v1899_v59  ;;  %v4165_v59 = vld [vmem:[%s7536_s7 + $0x100] sm:$0xff] }
 0x138   : > { %v3548_v9 = vsel %vm3515_vm7, %v3545_v7, %v3547_v21  ;;  %v3550_v15 = vsel %vm3515_vm7, %v3547_v21, %v3549_v36  ;;  %4269 = vrot.lane.b32.xlu0 %v4165_v59, %s6832_s9 }
 0x139   : > { %6092 = vmatmul.mubr.msk.bf16.gmra.mrb[12].mxu0 %vm524_vm2, %v3532_v39 }
 0x13a   : > { %6095 = vmatprep.mubr.msk.bf16.mxu0 %vm524_vm2, %v3534_v29  ;;  %4271 = vrot.lane.b32.xlu1 %v4166_v13, %s6832_s9 }
 0x13c   : > { %4273 = vrot.lane.b32.xlu0 %v4167_v2, %s6832_s9 }
 0x13e   : > { %5932 = vmatmul.mubr.msk.bf16.vlgmr.msra.gmra.mrb[20].mxu1 %vm524_vm2, %v1908_v42  ;;  %4275 = vrot.lane.b32.xlu1 %v4168_v63, %s6832_s9 }
 0x13f   : > { %5935 = vmatprep.mubr.msk.bf16.mxu1 %vm524_vm2, %v1917_v3 }
 0x141   : > { %6096 = vmatmul.mubr.msk.bf16.gmra.mrb[16].mxu0 %vm524_vm2, %v3536_v47 }
 0x142   : > { %6099 = vmatprep.mubr.msk.bf16.mxu0 %vm524_vm2, %v3538_v61 }
 0x143   : > { %v7873_v1 = vpop.permute.xlu0 %4205 }
 0x146   : > { %5936 = vmatmul.mubr.msk.bf16.gmra.mrb[24].mxu1 %vm524_vm2, %v1926_v12 }
 0x147   : > { %5939 = vmatprep.mubr.msk.bf16.mxu1 %vm524_vm2, %v1935_v26 }
 0x149   : > { %6100 = vmatmul.mubr.msk.bf16.gmra.mrb[20].mxu0 %vm524_vm2, %v3540_v56 }
 0x14a   : > { %6103 = vmatprep.mubr.msk.bf16.mxu0 %vm524_vm2, %v3542_v37 }
 0x14e   : > { %5940 = vmatmul.mubr.msk.bf16.gmra.mrb[28].mxu1 %vm524_vm2, %v1944_v25 }
 0x14f   : > { %5943 = vmatprep.mubr.msk.bf16.mxu1 %vm524_vm2, %v1953_v54 }
 0x151   : > { %6104 = vmatmul.mubr.msk.bf16.gmra.mrb[24].mxu0 %vm524_vm2, %v3544_v46 }
 0x152   : > { %6107 = vmatprep.mubr.msk.bf16.mxu0 %vm524_vm2, %v3546_v24 }
 0x156   : > { %5944 = vmatmul.mubr.msk.bf16.gmra.mrb[32].mxu1 %vm524_vm2, %v1962_v16 }
 0x159   : > { %6108 = vmatmul.mubr.msk.bf16.gmra.mrb[28].mxu0 %vm524_vm2, %v3548_v9 }
 0x15a   : > { %6111 = vmatprep.mubr.msk.bf16.mxu0 %vm524_vm2, %v3550_v15 }
 0x161   : > { %6112 = vmatmul.mubr.msk.bf16.gmra.mrb[32].mxu0 %vm524_vm2, %v3552_v27 }
 0x1c9   : > { %v5871_v5 = vpop.f32.mrb[0].mxu1 }
 0x1ca   : > { %v1603_v39 = vpop.f32.mrb[1].mxu1 }
 0x1cb   : > { %v5872_v19 = vpop.f32.mrb[2].mxu1 }
 0x1cc   : > { %v1606_v45 = vpop.f32.mrb[3].mxu1 }
 0x1d1   : > { %v5875_v4 = vpop.f32.mrb[4].mxu1 }
 0x1d2   : > { %v1619_v29 = vpop.f32.mrb[5].mxu1 }
 0x1d3   : > { %v5876_v42 = vpop.f32.mrb[6].mxu1 }
 0x1d4   : > { %v1622_v40 = vpop.f32.mrb[7].mxu1 }
 0x1d9   : > { %v5879_v53 = vpop.f32.mrb[8].mxu1 }
 0x1da   : > { %v1635_v58 = vpop.f32.mrb[9].mxu1 }
 0x1db   : > { %v5880_v32 = vpop.f32.mrb[10].mxu1 }
 0x1dc   : > { %v1638_v3 = vpop.f32.mrb[11].mxu1 }
 0x1e1   : > { %v5883_v43 = vpop.f32.mrb[12].mxu1 }
 0x1e2   : > { %v7815_v55 = vpop.f32.mrb[13].mxu1 }
 0x1e3   : > { %v7817_v23 = vpop.f32.mrb[14].mxu1 }
 0x1e4   : > { %v7819_v10 = vpop.f32.mrb[15].mxu1 }
 0x1e9   : > { %v7821_v48 = vpop.f32.mrb[16].mxu1 }
 0x1ea   : > { %v7823_v0 = vpop.f32.mrb[17].mxu1 }
 0x1eb   : > { %v7825_v47 = vpop.f32.mrb[18].mxu1 }
 0x1ec   : > { %v7827_v49 = vpop.f32.mrb[19].mxu1 }
 0x1f4   : > { %v6081_v30 = vpop.f32.mrb[0].mxu0 }
 0x1f5   : > { %v6121_v61 = vadd.f32 %v6081_v30, %v5871_v5  ;;  %v3659_v12 = vpop.f32.mrb[1].mxu0 }
 0x1f6   : > { %v6122_v20 = vadd.f32 %v3659_v12, %v1603_v39  ;;  %v6082_v18 = vpop.f32.mrb[2].mxu0 }
 0x1f7   : > { %v7835_v17 = vadd.f32 %v6121_v61, %v7832_v41  ;;  %v6123_v26 = vadd.f32 %v6082_v18, %v5872_v19  ;;  %v3662_v6 = vpop.f32.mrb[3].mxu0 }
 0x1f8   : > { %v6124_v38 = vadd.f32 %v3662_v6, %v1606_v45  ;;  %v7839_v52 = vadd.f32 %v6122_v20, %v7832_v41 }
 0x1f9   : > { %6520 = vtanh.f32 %v7835_v17  ;;  %v7842_v62 = vadd.f32 %v6123_v26, %v7832_v41 }
 0x1fa   : > { %6522 = vtanh.f32 %v7839_v52  ;;  %v7847_v14 = vadd.f32 %v6124_v38, %v7832_v41 }
 0x1fb   : > { %6524 = vtanh.f32 %v7842_v62 }
 0x1fc   : > { %v6085_v57 = vpop.f32.mrb[4].mxu0 }
 0x1fd   : > { %v6125_v33 = vadd.f32 %v6085_v57, %v5875_v4  ;;  %v3675_v56 = vpop.f32.mrb[5].mxu0 }
 0x1fe   : > { %v6126_v37 = vadd.f32 %v3675_v56, %v1619_v29  ;;  %v6086_v35 = vpop.f32.mrb[6].mxu0 }
 0x1ff   : > { %v7850_v25 = vadd.f32 %v6125_v33, %v7832_v41  ;;  %v6127_v31 = vadd.f32 %v6086_v35, %v5876_v42  ;;  %v3678_v28 = vpop.f32.mrb[7].mxu0 }
 0x200   : > { %v6128_v8 = vadd.f32 %v3678_v28, %v1622_v40  ;;  %v7854_v54 = vadd.f32 %v6126_v37, %v7832_v41 }
 0x201   : > { %6526 = vtanh.f32 %v7850_v25  ;;  %v7858_v34 = vadd.f32 %v6127_v31, %v7832_v41 }
 0x202   : > { %6528 = vtanh.f32 %v7847_v14  ;;  %v7864_v16 = vadd.f32 %v6128_v8, %v7832_v41 }
 0x203   : > { %v6521_v11 = vpop.eup %6520  ;;  %6530 = vtanh.f32 %v7854_v54 }
 0x204   : > { %v6089_v7 = vpop.f32.mrb[8].mxu0  ;;  %4389 = vrot.lane.b32.xlu0 %v6521_v11, %s6832_s9  ;;  %6532 = vtanh.f32 %v7858_v34  ;;  %v6523_v50 = vpop.eup %6522 }
 0x205   : > { %v6129_v44 = vadd.f32 %v6089_v7, %v5879_v53  ;;  %v3691_v60 = vpop.f32.mrb[9].mxu0  ;;  %v6525_v51 = vpop.eup %6524  ;;  %6534 = vtanh.f32 %v7864_v16 }
 0x206   : > { %v6130_v46 = vadd.f32 %v3691_v60, %v1635_v58  ;;  %v6090_v24 = vpop.f32.mrb[10].mxu0  ;;  %4391 = vrot.lane.b32.xlu1 %v6525_v51, %s6832_s9  ;;  %v7883_v53 = vpop.permute.xlu1 %4209 }
 0x207   : > { %v6131_v21 = vadd.f32 %v6090_v24, %v5880_v32  ;;  %v3694_v22 = vpop.f32.mrb[11].mxu0  ;;  %v7869_v59 = vadd.f32 %v6129_v44, %v7832_v41 }
 0x208   : > { %v6132_v36 = vadd.f32 %v3694_v22, %v1638_v3  ;;  %4385 = vrot.lane.b32.xlu0 %v6523_v50, %s6832_s9  ;;  %v7879_v19 = vadd.f32 %v6130_v46, %v7832_v41 }
 0x209   : > { %6536 = vtanh.f32 %v7869_v59  ;;  %v7888_v3 = vadd.f32 %v6131_v21, %v7832_v41 }
 0x20a   : > { %6538 = vtanh.f32 %v7879_v19  ;;  %v7896_v12 = vadd.f32 %v6132_v36, %v7832_v41  ;;  %v7899_v20 = vpop.permute.xlu1 %4211 }
 0x20b   : > { %v6527_v9 = vpop.eup %6526  ;;  %6540 = vtanh.f32 %v7888_v3 }
 0x20c   : > { %v6529_v15 = vpop.eup %6528  ;;  %v6093_v13 = vpop.f32.mrb[12].mxu0  ;;  %4397 = vrot.lane.b32.xlu0 %v6527_v9, %s6832_s9  ;;  %6542 = vtanh.f32 %v7896_v12 }
 0x20d   : > { %4387 = vrot.lane.b32.xlu1 %v6529_v15, %s6832_s9  ;;  %v6133_v2 = vadd.f32 %v6093_v13, %v5883_v43  ;;  %v3707_v63 = vpop.f32.mrb[13].mxu0  ;;  %v6531_v39 = vpop.eup %6530 }
 0x20e   : > { %v6134_v27 = vadd.f32 %v3707_v63, %v7815_v55  ;;  %v6094_v5 = vpop.f32.mrb[14].mxu0  ;;  %v6533_v42 = vpop.eup %6532 }
 0x20f   : > { %v6135_v45 = vadd.f32 %v6094_v5, %v7817_v23  ;;  %v3710_v4 = vpop.f32.mrb[15].mxu0  ;;  %v7890_v43 = vpop.permute.xlu0 %4207  ;;  %v7903_v6 = vadd.f32 %v6133_v2, %v7832_v41 }
 0x210   : > { %v6136_v40 = vadd.f32 %v3710_v4, %v7819_v10  ;;  %4393 = vrot.lane.b32.xlu0 %v6531_v39, %s6832_s9  ;;  %v6535_v30 = vpop.eup %6534  ;;  %v7913_v28 = vadd.f32 %v6134_v27, %v7832_v41  ;;  %v7918_v7 = vpop.permute.xlu1 %4215 }
 0x211   : > { %v5933_v29 = vpop.f32.mrb[20].mxu1  ;;  %4399 = vrot.lane.b32.xlu1 %v6533_v42, %s6832_s9  ;;  %6544 = vtanh.f32 %v7903_v6 }
 0x212   : > { %v2149_v58 = vpop.f32.mrb[21].mxu1  ;;  %6546 = vtanh.f32 %v7913_v28  ;;  %v7930_v36 = vadd.f32 %v6136_v40, %v7832_v41 }
 0x213   : > { %v5934_v32 = vpop.f32.mrb[22].mxu1  ;;  %v6537_v33 = vpop.eup %6536 }
 0x214   : > { %v2152_v55 = vpop.f32.mrb[23].mxu1  ;;  %v6097_v23 = vpop.f32.mrb[16].mxu0  ;;  %4405 = vrot.lane.b32.xlu0 %v6537_v33, %s6832_s9 }
 0x215   : > { %v6137_v10 = vadd.f32 %v6097_v23, %v7821_v48  ;;  %v3723_v61 = vpop.f32.mrb[17].mxu0  ;;  %4395 = vrot.lane.b32.xlu1 %v6535_v30, %s6832_s9  ;;  %v7906_v56 = vpop.permute.xlu0 %4213 }
 0x216   : > { %v6138_v18 = vadd.f32 %v3723_v61, %v7823_v0  ;;  %v6098_v26 = vpop.f32.mrb[18].mxu0  ;;  %v6539_v11 = vpop.eup %6538 }
 0x217   : > { %v6139_v38 = vadd.f32 %v6098_v26, %v7825_v47  ;;  %v3726_v57 = vpop.f32.mrb[19].mxu0  ;;  %v7916_v47 = vadd.f32 %v6135_v45, %v7832_v41  ;;  %v6541_v51 = vpop.eup %6540  ;;  %v7936_v63 = vadd.f32 %v6137_v10, %v7832_v41 }
 0x218   : > { %v6140_v37 = vadd.f32 %v3726_v57, %v7827_v49  ;;  %4401 = vrot.lane.b32.xlu0 %v6539_v11, %s6832_s9  ;;  %v7938_v27 = vpop.permute.xlu1 %4219  ;;  %v6543_v5 = vpop.eup %6542 }
 0x219   : > { %v5937_v48 = vpop.f32.mrb[24].mxu1  ;;  %v7921_v60 = vpop.permute.xlu0 %4217  ;;  %6548 = vtanh.f32 %v7916_v47  ;;  %4407 = vrot.lane.b32.xlu1 %v6541_v51, %s6832_s9  ;;  %v7956_v57 = vadd.f32 %v6139_v38, %v7832_v41 }
 0x21a   : > { %v2165_v35 = vpop.f32.mrb[25].mxu1  ;;  %6550 = vtanh.f32 %v7930_v36 }
 0x21b   : > { %v5938_v31 = vpop.f32.mrb[26].mxu1  ;;  %v6545_v4 = vpop.eup %6544  ;;  %6552 = vtanh.f32 %v7936_v63 }
 0x21c   : > { %v2168_v0 = vpop.f32.mrb[27].mxu1  ;;  %v6101_v8 = vpop.f32.mrb[20].mxu0  ;;  %4413 = vrot.lane.b32.xlu0 %v6545_v4, %s6832_s9 }
 0x21d   : > { %v6141_v49 = vadd.f32 %v6101_v8, %v5933_v29  ;;  %v3739_v44 = vpop.f32.mrb[21].mxu0  ;;  %v7941_v39 = vpop.permute.xlu0 %4221  ;;  %4403 = vrot.lane.b32.xlu1 %v6543_v5, %s6832_s9 }
 0x21e   : > { %v7923_v46 = vadd.f32 %v3739_v44, %v2149_v58  ;;  %v6102_v24 = vpop.f32.mrb[22].mxu0  ;;  %v6547_v26 = vpop.eup %6546 }
 0x21f   : > { %v7926_v50 = vadd.f32 %v6102_v24, %v5934_v32  ;;  %v3742_v21 = vpop.f32.mrb[23].mxu0  ;;  %v7949_v32 = vadd.f32 %v6138_v18, %v7832_v41  ;;  %v7970_v51 = vadd.f32 %v6141_v49, %v7832_v41 }
 0x220   : > { %v7932_v9 = vadd.f32 %v3742_v21, %v2152_v55  ;;  %4409 = vrot.lane.b32.xlu0 %v6547_v26, %s6832_s9  ;;  %v7984_v49 = vadd.f32 %v7923_v46, %v7832_v41 }
 0x221   : > { %v5941_v22 = vpop.f32.mrb[28].mxu1  ;;  %v7961_v8 = vpop.permute.xlu0 %4225  ;;  %6554 = vtanh.f32 %v7949_v32 }
 0x222   : > { %v2181_v15 = vpop.f32.mrb[29].mxu1  ;;  %6556 = vtanh.f32 %v7956_v57 }
 0x223   : > { %v5942_v13 = vpop.f32.mrb[30].mxu1 }
 0x224   : > { %v2184_v2 = vpop.f32.mrb[31].mxu1  ;;  %v6105_v45 = vpop.f32.mrb[24].mxu0 }
 0x225   : > { %v6145_v29 = vadd.f32 %v6105_v45, %v5937_v48  ;;  %v3755_v42 = vpop.f32.mrb[25].mxu0  ;;  %v7958_v48 = vpop.permute.xlu1 %4223 }
 0x226   : > { %v7945_v40 = vadd.f32 %v3755_v42, %v2165_v35  ;;  %v6106_v58 = vpop.f32.mrb[26].mxu0  ;;  %v6549_v35 = vpop.eup %6548 }
 0x227   : > { %v7951_v55 = vadd.f32 %v6106_v58, %v5938_v31  ;;  %v3758_v23 = vpop.f32.mrb[27].mxu0  ;;  %4415 = vrot.lane.b32.xlu1 %v6549_v35, %s6832_s9  ;;  %v6551_v44 = vpop.eup %6550 }
 0x228   : > { %v7953_v10 = vadd.f32 %v3758_v23, %v2168_v0  ;;  %v7967_v0 = vadd.f32 %v6140_v37, %v7832_v41  ;;  %v7975_v42 = vpop.permute.xlu0 %4229  ;;  %v6553_v37 = vpop.eup %6552 }
 0x229   : > { %v5945_v30 = vpop.f32.mrb[32].mxu1  ;;  %v7973_v5 = vpop.permute.xlu1 %4227  ;;  %4421 = vrot.lane.b32.xlu0 %v6553_v37, %s6832_s9  ;;  %v8005_v37 = vadd.f32 %v6145_v29, %v7832_v41  ;;  %v8021_v29 = vadd.f32 %v7951_v55, %v7832_v41 }
 0x22a   : > { %v2197_v61 = vpop.f32.mrb[33].mxu1  ;;  %6558 = vtanh.f32 %v7967_v0 }
 0x22b   : > { %v5946_v33 = vpop.f32.mrb[34].mxu1  ;;  %4411 = vrot.lane.b32.xlu1 %v6551_v44, %s6832_s9  ;;  %6560 = vtanh.f32 %v7970_v51 }
 0x22c   : > { %v2200_v18 = vpop.f32.mrb[35].mxu1  ;;  %v6109_v31 = vpop.f32.mrb[28].mxu0  ;;  %6562 = vtanh.f32 %v7984_v49 }
 0x22d   : > { %v6149_v38 = vadd.f32 %v6109_v31, %v5941_v22  ;;  %v3771_v11 = vpop.f32.mrb[29].mxu0  ;;  %v7990_v23 = vpop.permute.xlu1 %4231 }
 0x22e   : > { %v6150_v24 = vadd.f32 %v3771_v11, %v2181_v15  ;;  %v6110_v21 = vpop.f32.mrb[30].mxu0  ;;  %v6555_v15 = vpop.eup %6554 }
 0x22f   : > { %v6151_v45 = vadd.f32 %v6110_v21, %v5942_v13  ;;  %v3774_v4 = vpop.f32.mrb[31].mxu0  ;;  %v7988_v13 = vadd.f32 %v7926_v50, %v7832_v41  ;;  %4417 = vrot.lane.b32.xlu0 %v6555_v15, %s6832_s9  ;;  %v7993_v35 = vpop.permute.xlu0 %4233  ;;  %v8002_v50 = vadd.f32 %v7932_v9, %v7832_v41  ;;  %v8017_v9 = vadd.f32 %v7945_v40, %v7832_v41 }
 0x230   : > { %v7977_v58 = vadd.f32 %v3774_v4, %v2184_v2  ;;  %v6557_v44 = vpop.eup %6556  ;;  %v8033_v40 = vadd.f32 %v7953_v10, %v7832_v41  ;;  %v8036_v55 = vadd.f32 %v6149_v38, %v7832_v41  ;;  %v8047_v10 = vadd.f32 %v6150_v24, %v7832_v41 }
 0x231   : > { %4423 = vrot.lane.b32.xlu1 %v6557_v44, %s6832_s9  ;;  %6564 = vtanh.f32 %v7988_v13  ;;  %v8050_v38 = vadd.f32 %v6151_v45, %v7832_v41 }
 0x232   : > { %6566 = vtanh.f32 %v8002_v50  ;;  %v8062_v24 = vadd.f32 %v7977_v58, %v7832_v41 }
 0x233   : > { %6568 = vtanh.f32 %v8005_v37 }
 0x234   : > { %v6113_v22 = vpop.f32.mrb[32].mxu0  ;;  %6570 = vtanh.f32 %v8017_v9 }
 0x235   : > { %v6153_v2 = vadd.f32 %v6113_v22, %v5945_v30  ;;  %v3787_v26 = vpop.f32.mrb[33].mxu0  ;;  %v6559_v30 = vpop.eup %6558  ;;  %6572 = vtanh.f32 %v8021_v29 }
 0x236   : > { %v6154_v31 = vadd.f32 %v3787_v26, %v2197_v61  ;;  %v6114_v11 = vpop.f32.mrb[34].mxu0  ;;  %v8007_v61 = vpop.permute.xlu1 %4235  ;;  %4419 = vrot.lane.b32.xlu1 %v6559_v30, %s6832_s9  ;;  %6574 = vtanh.f32 %v8033_v40 }
 0x237   : > { %v6155_v46 = vadd.f32 %v6114_v11, %v5946_v33  ;;  %v3790_v21 = vpop.f32.mrb[35].mxu0  ;;  %v8010_v33 = vpop.permute.xlu0 %4237  ;;  %6576 = vtanh.f32 %v8036_v55  ;;  %v8065_v45 = vadd.f32 %v6153_v2, %v7832_v41 }
 0x238   : > { %v7997_v4 = vadd.f32 %v3790_v21, %v2200_v18  ;;  %v6561_v22 = vpop.eup %6560  ;;  %6578 = vtanh.f32 %v8047_v10  ;;  %v8077_v58 = vadd.f32 %v6154_v31, %v7832_v41 }
 0x239   : > { %4429 = vrot.lane.b32.xlu0 %v6561_v22, %s6832_s9  ;;  %v6563_v18 = vpop.eup %6562  ;;  %6580 = vtanh.f32 %v8050_v38 }
 0x23a   : > { %v8023_v15 = vpop.permute.xlu1 %4239  ;;  %6582 = vtanh.f32 %v8062_v24  ;;  %v8094_v31 = vadd.f32 %v7997_v4, %v7832_v41 }
 0x23b   : > { %8802 = vst [vmem:[#allocation2_spill] sm:$0xff] %v8023_v15  ;;  %v8026_v26 = vpop.permute.xlu0 %4241  ;;  %v6565_v11 = vpop.eup %6564  ;;  %6584 = vtanh.f32 %v8065_v45  ;;  %v8080_v15 = vadd.f32 %v6155_v46, %v7832_v41  ;;  %v5514_v41 = vmul.f32 -1.442695, %v7854_v54  ;;  %v5515_v54 = vmul.f32 -1.442695, %v7864_v16 }
 0x23c   : > { %4431 = vrot.lane.b32.xlu1 %v6565_v11, %s6832_s9  ;;  %v6567_v44 = vpop.eup %6566 }
 0x23d   : > { %4425 = vrot.lane.b32.xlu0 %v6563_v18, %s6832_s9  ;;  %v6569_v22 = vpop.eup %6568 }
 0x23e   : > { %v8038_v21 = vpop.permute.xlu1 %4243  ;;  %v6571_v18 = vpop.eup %6570 }
 0x23f   : > { %v8041_v30 = vpop.permute.xlu0 %4245 }
 0x240   : > { %4427 = vrot.lane.b32.xlu1 %v6567_v44, %s6832_s9  ;;  %8803 = vst [vmem:[#allocation3_spill] sm:$0xff] %v8041_v30  ;;  %v6573_v30 = vpop.eup %6572 }
 0x241   : > { %4437 = vrot.lane.b32.xlu0 %v6569_v22, %s6832_s9  ;;  %v6575_v22 = vpop.eup %6574 }
 0x242   : > { %v8052_v11 = vpop.permute.xlu1 %4247 }
 0x243   : > { %8804 = vst [vmem:[#allocation4_spill] sm:$0xff] %v8052_v11  ;;  %v8055_v44 = vpop.permute.xlu0 %4249 }
 0x244   : > { %8805 = vst [vmem:[#allocation5_spill] sm:$0xff] %v8055_v44  ;;  %4439 = vrot.lane.b32.xlu1 %v6573_v30, %s6832_s9  ;;  %v6577_v44 = vpop.eup %6576  ;;  %v5512_v30 = vmul.f32 -1.442695, %v7835_v17  ;;  %v5510_v17 = vmul.f32 -1.442695, %v7839_v52 }
 0x245   : > { %4433 = vrot.lane.b32.xlu0 %v6571_v18, %s6832_s9  ;;  %v6579_v2 = vpop.eup %6578  ;;  %v5511_v52 = vmul.f32 -1.442695, %v7847_v14 }
 0x246   : > { %v8067_v11 = vpop.permute.xlu1 %4251  ;;  %6586 = vpow2.f32 %v5512_v30  ;;  %v5516_v30 = vmul.f32 -1.442695, %v7850_v25  ;;  %v5517_v25 = vmul.f32 -1.442695, %v7858_v34 }
 0x247   : > { %8806 = vst [vmem:[#allocation6_spill] sm:$0xff] %v8067_v11  ;;  %v8070_v18 = vpop.permute.xlu0 %4253  ;;  %6588 = vtanh.f32 %v8077_v58 }
 0x248   : > { %4435 = vrot.lane.b32.xlu1 %v6575_v22, %s6832_s9  ;;  %8807 = vst [vmem:[#allocation7_spill] sm:$0xff] %v8070_v18  ;;  %v6581_v18 = vpop.eup %6580  ;;  %6590 = vtanh.f32 %v8080_v15 }
 0x249   : > { %4445 = vrot.lane.b32.xlu0 %v6577_v44, %s6832_s9  ;;  %v5513_v44 = vmul.f32 -1.442695, %v7842_v62  ;;  %v6583_v46 = vpop.eup %6582  ;;  %6592 = vpow2.f32 %v5510_v17 }
 0x24a   : > { %v8082_v11 = vpop.permute.xlu1 %4255 }
 0x24b   : > { %8808 = vst [vmem:[#allocation8_spill] sm:$0xff] %v8082_v11  ;;  %v8085_v22 = vpop.permute.xlu0 %4257  ;;  %6594 = vpow2.f32 %v5513_v44 }
 0x24c   : > { %4447 = vrot.lane.b32.xlu1 %v6581_v18, %s6832_s9  ;;  %v6585_v18 = vpop.eup %6584  ;;  %6596 = vtanh.f32 %v8094_v31 }
 0x24d   : > { %4441 = vrot.lane.b32.xlu0 %v6579_v2, %s6832_s9  ;;  %6598 = vpow2.f32 %v5516_v30 }
 0x24e   : > { %v8097_v2 = vpop.permute.xlu1 %4259  ;;  %6600 = vpow2.f32 %v5511_v52  ;;  %v5520_v52 = vmul.f32 -1.442695, %v7869_v59 }
 0x24f   : > { %8809 = vst [vmem:[#allocation9_spill] sm:$0xff] %v8097_v2  ;;  %v8101_v62 = vpop.permute.xlu0 %4261  ;;  %6602 = vpow2.f32 %v5514_v41 }
 0x250   : > { %4443 = vrot.lane.b32.xlu1 %v6583_v46, %s6832_s9  ;;  %8810 = vst [vmem:[#allocation10_spill] sm:$0xff] %v8101_v62  ;;  %v6587_v4 = vpop.eup %6586  ;;  %6604 = vpow2.f32 %v5517_v25 }
 0x251   : > { %4453 = vrot.lane.b32.xlu0 %v6585_v18, %s6832_s9  ;;  %v6589_v17 = vpop.eup %6588  ;;  %v3991_v62 = vadd.f32 1.0, %v6587_v4 }
 0x252   : > { %v8107_v44 = vpop.permute.xlu1 %4263  ;;  %v6591_v46 = vpop.eup %6590 }
 0x253   : > { %8811 = vst [vmem:[#allocation11_spill] sm:$0xff] %v8107_v44  ;;  %v8110_v14 = vpop.permute.xlu0 %4265  ;;  %v6593_v30 = vpop.eup %6592  ;;  %6606 = vrcp.f32 %v3991_v62 }
 0x254   : > { %8812 = vst [vmem:[#allocation12_spill] sm:$0xff] %v8110_v14  ;;  %4455 = vrot.lane.b32.xlu1 %v6591_v46, %s6832_s9  ;;  %v3989_v44 = vadd.f32 1.0, %v6593_v30  ;;  %6608 = vpow2.f32 %v5515_v54  ;;  %v5518_v46 = vmul.f32 -1.442695, %v7879_v19 }
 0x255   : > { %4449 = vrot.lane.b32.xlu0 %v6589_v17, %s6832_s9  ;;  %v6595_v18 = vpop.eup %6594  ;;  %6610 = vpow2.f32 %v5520_v52 }
 0x256   : > { %v6597_v34 = vpop.eup %6596  ;;  %v8115_v11 = vpop.permute.xlu1 %4267  ;;  %v3992_v4 = vadd.f32 1.0, %v6595_v18  ;;  %6612 = vrcp.f32 %v3989_v44 }
 0x257   : > { %8813 = vst [vmem:[#allocation13_spill] sm:$0xff] %v8115_v11  ;;  %v8118_v17 = vpop.permute.xlu0 %4269  ;;  %v6599_v41 = vpop.eup %6598 }
 0x258   : > { %4451 = vrot.lane.b32.xlu1 %v6597_v34, %s6832_s9  ;;  %8814 = vst [vmem:[#allocation14_spill] sm:$0xff] %v8118_v17  ;;  %v6601_v25 = vpop.eup %6600  ;;  %v3995_v16 = vadd.f32 1.0, %v6599_v41  ;;  %6614 = vrcp.f32 %v3992_v4  ;;  %v5521_v34 = vmul.f32 -1.442695, %v7888_v3  ;;  %v5519_v41 = vmul.f32 -1.442695, %v7896_v12 }
 0x259   : > { %v6603_v14 = vpop.eup %6602  ;;  %v3990_v59 = vadd.f32 1.0, %v6601_v25  ;;  %6616 = vpow2.f32 %v5518_v46  ;;  %v5524_v3 = vmul.f32 -1.442695, %v7903_v6  ;;  %v5525_v6 = vmul.f32 -1.442695, %v7916_v47 }
 0x25a   : > { %v8121_v2 = vpop.permute.xlu1 %4271  ;;  %v6605_v62 = vpop.eup %6604  ;;  %6618 = vrcp.f32 %v3995_v16  ;;  %v3993_v18 = vadd.f32 1.0, %v6603_v14 }
 0x25b   : > { %8815 = vst [vmem:[#allocation15_spill] sm:$0xff] %v8121_v2  ;;  %v8123_v30 = vpop.permute.xlu0 %4273  ;;  %6620 = vrcp.f32 %v3990_v59  ;;  %v3996_v54 = vadd.f32 1.0, %v6605_v62 }
 0x25c   : > { %8816 = vst [vmem:[#allocation16_spill] sm:$0xff] %v8123_v30  ;;  %6622 = vpow2.f32 %v5521_v34 }
 0x25d   : > { %v8126_v52 = vpop.eup %6606  ;;  %6624 = vrcp.f32 %v3993_v18 }
 0x25e   : > { %v6609_v44 = vpop.eup %6608  ;;  %v8129_v4 = vpop.permute.xlu1 %4275  ;;  %6626 = vrcp.f32 %v3996_v54 }
 0x25f   : > { %8817 = vst [vmem:[#allocation17_spill] sm:$0xff] %v8129_v4  ;;  %v6611_v2 = vpop.eup %6610  ;;  %v3994_v46 = vadd.f32 1.0, %v6609_v44  ;;  %6628 = vpow2.f32 %v5519_v41 }
 0x260   : > { %v8134_v14 = vpop.eup %6612  ;;  %v3999_v62 = vadd.f32 1.0, %v6611_v2  ;;  %6630 = vpow2.f32 %v5524_v3 }
 0x261   : > { %6632 = vrcp.f32 %v3994_v46  ;;  %v5523_v46 = vmul.f32 -1.442695, %v7930_v36 }
 0x262   : > { %v8136_v59 = vpop.eup %6614  ;;  %6634 = vrcp.f32 %v3999_v62 }
 0x263   : > { %v6617_v54 = vpop.eup %6616 }
 0x276   : > { %v4390_v19 = vpop.permute.xlu0 %4389 }
 0x277   : > { %v4495_v25 = vmul.f32 %v8126_v52, %v4390_v19  ;;  %v5522_v19 = vmul.f32 -1.442695, %v7913_v28 }
 0x278   : > { %v4392_v12 = vpop.permute.xlu1 %4391 }
 0x279   : > { %4569 = vrot.lane.b32.xlu0 %v4495_v25, %s6832_s9  ;;  %v4496_v18 = vmul.f32 %v8136_v59, %v4392_v12  ;;  %v8143_v25 = vpop.eup %6618  ;;  %6636 = vpow2.f32 %v5522_v19  ;;  %v3997_v12 = vadd.f32 1.0, %v6617_v54  ;;  %v5528_v54 = vmul.f32 -1.442695, %v7936_v63 }
 0x27a   : > { %v4386_v16 = vpop.permute.xlu0 %4385  ;;  %v8146_v44 = vpop.eup %6620  ;;  %6638 = vpow2.f32 %v5525_v6 }
 0x27b   : > { %v4493_v34 = vmul.f32 %v8134_v14, %v4386_v16  ;;  %4571 = vrot.lane.b32.xlu1 %v4496_v18, %s6832_s9  ;;  %v6623_v3 = vpop.eup %6622  ;;  %6640 = vrcp.f32 %v3997_v12 }
 0x27c   : > { %v8151_v47 = vpop.eup %6624  ;;  %v4000_v19 = vadd.f32 1.0, %v6623_v3  ;;  %6642 = vpow2.f32 %v5523_v46  ;;  %v5526_v3 = vmul.f32 -1.442695, %v7949_v32  ;;  %v5529_v46 = vmul.f32 -1.442695, %v7956_v57 }
 0x27d   : > { %4565 = vrot.lane.b32.xlu0 %v4493_v34, %s6832_s9  ;;  %v8155_v18 = vpop.eup %6626  ;;  %v5532_v57 = vmul.f32 -1.442695, %v7970_v51 }
 0x27e   : > { %v4398_v2 = vpop.permute.xlu0 %4397  ;;  %v6629_v4 = vpop.eup %6628  ;;  %6644 = vrcp.f32 %v4000_v19 }
 0x27f   : > { %v4388_v41 = vpop.permute.xlu1 %4387  ;;  %v4499_v28 = vmul.f32 %v8143_v25, %v4398_v2  ;;  %v6631_v36 = vpop.eup %6630  ;;  %6646 = vpow2.f32 %v5528_v54  ;;  %v5527_v54 = vmul.f32 -1.442695, %v7967_v0  ;;  %v5530_v0 = vmul.f32 -1.442695, %v7984_v49 }
 0x280   : > { %v4494_v16 = vmul.f32 %v8146_v44, %v4388_v41  ;;  %v8162_v6 = vpop.eup %6632  ;;  %v4003_v63 = vadd.f32 1.0, %v6631_v36 }
 0x281   : > { %4577 = vrot.lane.b32.xlu0 %v4499_v28, %s6832_s9  ;;  %v3998_v28 = vadd.f32 1.0, %v6629_v4  ;;  %v8164_v17 = vpop.eup %6634 }
 0x282   : > { %4567 = vrot.lane.b32.xlu1 %v4494_v16, %s6832_s9  ;;  %v4394_v34 = vpop.permute.xlu0 %4393 }
 0x283   : > { %v4400_v62 = vpop.permute.xlu1 %4399  ;;  %v4497_v2 = vmul.f32 %v8151_v47, %v4394_v34  ;;  %v6637_v34 = vpop.eup %6636  ;;  %6648 = vrcp.f32 %v3998_v28 }
 0x284   : > { %v4500_v41 = vmul.f32 %v8155_v18, %v4400_v62  ;;  %v6639_v62 = vpop.eup %6638  ;;  %v4001_v4 = vadd.f32 1.0, %v6637_v34  ;;  %6650 = vpow2.f32 %v5526_v3 }
 0x285   : > { %4573 = vrot.lane.b32.xlu0 %v4497_v2, %s6832_s9  ;;  %6652 = vrcp.f32 %v4003_v63  ;;  %v8172_v32 = vpop.eup %6640 }
 0x286   : > { %4579 = vrot.lane.b32.xlu1 %v4500_v41, %s6832_s9  ;;  %v4406_v2 = vpop.permute.xlu0 %4405  ;;  %v4004_v41 = vadd.f32 1.0, %v6639_v62  ;;  %6654 = vpow2.f32 %v5529_v46  ;;  %v6643_v36 = vpop.eup %6642 }
 0x287   : > { %v4396_v16 = vpop.permute.xlu1 %4395  ;;  %v4503_v19 = vmul.f32 %v8164_v17, %v4406_v2  ;;  %6656 = vrcp.f32 %v4001_v4  ;;  %v4002_v34 = vadd.f32 1.0, %v6643_v36 }
 0x288   : > { %v4498_v12 = vmul.f32 %v8162_v6, %v4396_v16  ;;  %6658 = vrcp.f32 %v4004_v41 }
 0x289   : > { %4585 = vrot.lane.b32.xlu0 %v4503_v19, %s6832_s9  ;;  %6660 = vpow2.f32 %v5527_v54  ;;  %v5533_v19 = vmul.f32 -1.442695, %v7988_v13 }
 0x28a   : > { %4575 = vrot.lane.b32.xlu1 %v4498_v12, %s6832_s9  ;;  %v4402_v16 = vpop.permute.xlu0 %4401  ;;  %v8177_v12 = vpop.eup %6644  ;;  %6662 = vpow2.f32 %v5532_v57 }
 0x28b   : > { %v4501_v28 = vmul.f32 %v8172_v32, %v4402_v16  ;;  %v6647_v3 = vpop.eup %6646  ;;  %v4408_v63 = vpop.permute.xlu1 %4407  ;;  %6664 = vrcp.f32 %v4002_v34 }
 0x28c   : > { %v4504_v62 = vmul.f32 %v8177_v12, %v4408_v63  ;;  %v4007_v2 = vadd.f32 1.0, %v6647_v3  ;;  %6666 = vpow2.f32 %v5530_v0  ;;  %v5531_v3 = vmul.f32 -1.442695, %v8002_v50 }
 0x28d   : > { %4581 = vrot.lane.b32.xlu0 %v4501_v28, %s6832_s9  ;;  %v8182_v46 = vpop.eup %6648  ;;  %v5536_v0 = vmul.f32 -1.442695, %v8005_v37 }
 0x28e   : > { %4587 = vrot.lane.b32.xlu1 %v4504_v62, %s6832_s9  ;;  %v6651_v51 = vpop.eup %6650  ;;  %v4414_v36 = vpop.permute.xlu0 %4413  ;;  %6668 = vrcp.f32 %v4007_v2 }
 0x28f   : > { %v4404_v4 = vpop.permute.xlu1 %4403  ;;  %v8186_v41 = vpop.eup %6652  ;;  %v4005_v49 = vadd.f32 1.0, %v6651_v51  ;;  %6670 = vpow2.f32 %v5533_v19 }
 0x290   : > { %v4502_v54 = vmul.f32 %v8182_v46, %v4404_v4  ;;  %v6655_v16 = vpop.eup %6654  ;;  %v4507_v57 = vmul.f32 %v8186_v41, %v4414_v36  ;;  %v5534_v36 = vmul.f32 -1.442695, %v8017_v9  ;;  %v5535_v9 = vmul.f32 -1.442695, %v8033_v40 }
 0x291   : > { %v8191_v28 = vpop.eup %6656  ;;  %v4008_v34 = vadd.f32 1.0, %v6655_v16  ;;  %6672 = vrcp.f32 %v4005_v49 }
 0x292   : > { %4583 = vrot.lane.b32.xlu1 %v4502_v54, %s6832_s9  ;;  %4593 = vrot.lane.b32.xlu0 %v4507_v57, %s6832_s9  ;;  %v8195_v13 = vpop.eup %6658  ;;  %v4410_v63 = vpop.permute.xlu0 %4409  ;;  %6674 = vpow2.f32 %v5531_v3 }
 0x293   : > { %v6661_v62 = vpop.eup %6660  ;;  %v4505_v2 = vmul.f32 %v8191_v28, %v4410_v63  ;;  %6676 = vrcp.f32 %v4008_v34  ;;  %v5537_v63 = vmul.f32 -1.442695, %v8021_v29 }
 0x294   : > { %v6663_v54 = vpop.eup %6662  ;;  %v4006_v50 = vadd.f32 1.0, %v6661_v62  ;;  %6678 = vpow2.f32 %v5536_v0 }
 0x295   : > { %v8202_v19 = vpop.eup %6664  ;;  %v4011_v16 = vadd.f32 1.0, %v6663_v54 }
 0x296   : > { %4589 = vrot.lane.b32.xlu0 %v4505_v2, %s6832_s9  ;;  %v6667_v49 = vpop.eup %6666  ;;  %6680 = vrcp.f32 %v4006_v50  ;;  %v5540_v50 = vmul.f32 -1.442695, %v8036_v55 }
 0x297   : > { %6682 = vpow2.f32 %v5534_v36  ;;  %v4009_v0 = vadd.f32 1.0, %v6667_v49 }
 0x298   : > { %6684 = vrcp.f32 %v4011_v16 }
 0x299   : > { %v4416_v4 = vpop.permute.xlu1 %4415  ;;  %6686 = vpow2.f32 %v5537_v63  ;;  %v5538_v63 = vmul.f32 -1.442695, %v8047_v10 }
 0x29a   : > { %v4508_v51 = vmul.f32 %v8195_v13, %v4416_v4  ;;  %v8207_v4 = vpop.eup %6668  ;;  %6688 = vrcp.f32 %v4009_v0  ;;  %v5541_v0 = vmul.f32 -1.442695, %v8050_v38 }
 0x29b   : > { %v4422_v3 = vpop.permute.xlu0 %4421  ;;  %v6671_v34 = vpop.eup %6670  ;;  %6690 = vpow2.f32 %v5535_v9 }
 0x29c   : > { %4595 = vrot.lane.b32.xlu1 %v4508_v51, %s6832_s9  ;;  %v4511_v62 = vmul.f32 %v8207_v4, %v4422_v3  ;;  %v8213_v2 = vpop.eup %6672  ;;  %v4012_v29 = vadd.f32 1.0, %v6671_v34 }
 0x29d   : > { %v4412_v37 = vpop.permute.xlu1 %4411  ;;  %v6675_v54 = vpop.eup %6674 }
 0x29e   : > { %v4506_v57 = vmul.f32 %v8202_v19, %v4412_v37  ;;  %4601 = vrot.lane.b32.xlu0 %v4511_v62, %s6832_s9  ;;  %6692 = vrcp.f32 %v4012_v29  ;;  %v4010_v40 = vadd.f32 1.0, %v6675_v54 }
 0x29f   : > { %6694 = vpow2.f32 %v5540_v50  ;;  %v5539_v50 = vmul.f32 -1.442695, %v8062_v24 }
 0x2a0   : > { %4591 = vrot.lane.b32.xlu1 %v4506_v57, %s6832_s9  ;;  %v8217_v57 = vpop.eup %6676  ;;  %6696 = vrcp.f32 %v4010_v40  ;;  %v5544_v40 = vmul.f32 -1.442695, %v8065_v45 }
 0x2a1   : > { %v4418_v51 = vpop.permute.xlu0 %4417  ;;  %v6679_v16 = vpop.eup %6678  ;;  %6698 = vpow2.f32 %v5538_v63 }
 0x2a2   : > { %v4509_v37 = vmul.f32 %v8213_v2, %v4418_v51  ;;  %v8223_v55 = vpop.eup %6680  ;;  %v4015_v3 = vadd.f32 1.0, %v6679_v16 }
 0x2a3   : > { %v4424_v36 = vpop.permute.xlu1 %4423  ;;  %v6683_v62 = vpop.eup %6682 }
 0x2a4   : > { %v4512_v49 = vmul.f32 %v8217_v57, %v4424_v36  ;;  %4597 = vrot.lane.b32.xlu0 %v4509_v37, %s6832_s9  ;;  %v8227_v51 = vpop.eup %6684  ;;  %6700 = vrcp.f32 %v4015_v3  ;;  %v4013_v10 = vadd.f32 1.0, %v6683_v62 }
 0x2a5   : > { %v6687_v29 = vpop.eup %6686  ;;  %6702 = vpow2.f32 %v5541_v0  ;;  %v5542_v0 = vmul.f32 -1.442695, %v8077_v58 }
 0x2a6   : > { %4603 = vrot.lane.b32.xlu1 %v4512_v49, %s6832_s9  ;;  %v8233_v38 = vpop.eup %6688  ;;  %v4016_v36 = vadd.f32 1.0, %v6687_v29  ;;  %6704 = vrcp.f32 %v4013_v10  ;;  %v5545_v10 = vmul.f32 -1.442695, %v8080_v15 }
 0x2a7   : > { %v6691_v49 = vpop.eup %6690  ;;  %6706 = vpow2.f32 %v5539_v50 }
 0x2a8   : > { %v4420_v34 = vpop.permute.xlu1 %4419  ;;  %6708 = vrcp.f32 %v4016_v36  ;;  %v4014_v24 = vadd.f32 1.0, %v6691_v49 }
 0x2a9   : > { %v4510_v9 = vmul.f32 %v8223_v55, %v4420_v34  ;;  %v8237_v34 = vpop.eup %6692  ;;  %6710 = vpow2.f32 %v5544_v40  ;;  %v5543_v40 = vmul.f32 -1.442695, %v8094_v31 }
 0x2aa   : > { %v6695_v3 = vpop.eup %6694  ;;  %6712 = vrcp.f32 %v4014_v24 }
 0x2ab   : > { %v4430_v37 = vpop.permute.xlu0 %4429  ;;  %4599 = vrot.lane.b32.xlu1 %v4510_v9, %s6832_s9  ;;  %v8243_v45 = vpop.eup %6696  ;;  %6714 = vpow2.f32 %v5542_v0 }
 0x2ac   : > { %v4515_v54 = vmul.f32 %v8227_v51, %v4430_v37  ;;  %v4019_v37 = vadd.f32 1.0, %v6695_v3 }
 0x2ae   : > { %4609 = vrot.lane.b32.xlu0 %v4515_v54, %s6832_s9  ;;  %v4432_v9 = vpop.permute.xlu1 %4431  ;;  %v6699_v54 = vpop.eup %6698  ;;  %6716 = vrcp.f32 %v4019_v37 }
 0x2af   : > { %v4426_v16 = vpop.permute.xlu0 %4425  ;;  %v4516_v62 = vmul.f32 %v8237_v34, %v4432_v9  ;;  %v4017_v58 = vadd.f32 1.0, %v6699_v54  ;;  %6718 = vpow2.f32 %v5545_v10 }
 0x2b0   : > { %v4513_v63 = vmul.f32 %v8233_v38, %v4426_v16  ;;  %v8247_v16 = vpop.eup %6700 }
 0x2b1   : > { %4611 = vrot.lane.b32.xlu1 %v4516_v62, %s6832_s9  ;;  %v6703_v36 = vpop.eup %6702  ;;  %6720 = vrcp.f32 %v4017_v58 }
 0x2b2   : > { %4605 = vrot.lane.b32.xlu0 %v4513_v63, %s6832_s9  ;;  %v4428_v29 = vpop.permute.xlu1 %4427  ;;  %v8253_v15 = vpop.eup %6704  ;;  %v4020_v9 = vadd.f32 1.0, %v6703_v36  ;;  %6722 = vpow2.f32 %v5543_v40 }
 0x2b3   : > { %v4514_v50 = vmul.f32 %v8243_v45, %v4428_v29  ;;  %v4438_v63 = vpop.permute.xlu0 %4437  ;;  %v6707_v62 = vpop.eup %6706 }
 0x2b4   : > { %v4519_v49 = vmul.f32 %v8247_v16, %v4438_v63  ;;  %v8256_v29 = vpop.eup %6708  ;;  %6724 = vrcp.f32 %v4020_v9  ;;  %v4018_v31 = vadd.f32 1.0, %v6707_v62 }
 0x2b5   : > { %4607 = vrot.lane.b32.xlu1 %v4514_v50, %s6832_s9  ;;  %v6711_v63 = vpop.eup %6710 }
 0x2b6   : > { %4617 = vrot.lane.b32.xlu0 %v4519_v49, %s6832_s9  ;;  %v4440_v0 = vpop.permute.xlu1 %4439  ;;  %v8261_v54 = vpop.eup %6712  ;;  %v4023_v10 = vadd.f32 1.0, %v6711_v63  ;;  %6726 = vrcp.f32 %v4018_v31 }
 0x2b7   : > { %v4434_v3 = vpop.permute.xlu0 %4433  ;;  %v4520_v37 = vmul.f32 %v8256_v29, %v4440_v0  ;;  %v6715_v36 = vpop.eup %6714 }
 0x2b8   : > { %v4517_v24 = vmul.f32 %v8253_v15, %v4434_v3  ;;  %v8264_v3 = vpop.eup %6716  ;;  %6728 = vrcp.f32 %v4023_v10  ;;  %v4021_v9 = vadd.f32 1.0, %v6715_v36 }
 0x2b9   : > { %4619 = vrot.lane.b32.xlu1 %v4520_v37, %s6832_s9  ;;  %v6719_v40 = vpop.eup %6718 }
 0x2ba   : > { %4613 = vrot.lane.b32.xlu0 %v4517_v24, %s6832_s9  ;;  %v4436_v50 = vpop.permute.xlu1 %4435  ;;  %v4024_v24 = vadd.f32 1.0, %v6719_v40  ;;  %6730 = vrcp.f32 %v4021_v9 }
 0x2bb   : > { %v4518_v49 = vmul.f32 %v8261_v54, %v4436_v50  ;;  %v4446_v58 = vpop.permute.xlu0 %4445  ;;  %v8269_v62 = vpop.eup %6720 }
 0x2bc   : > { %v4523_v0 = vmul.f32 %v8264_v3, %v4446_v58  ;;  %v6723_v37 = vpop.eup %6722  ;;  %6732 = vrcp.f32 %v4024_v24 }
 0x2bd   : > { %4615 = vrot.lane.b32.xlu1 %v4518_v49, %s6832_s9  ;;  %v4022_v10 = vadd.f32 1.0, %v6723_v37 }
 0x2be   : > { %4625 = vrot.lane.b32.xlu0 %v4523_v0, %s6832_s9  ;;  %v8272_v30 = vpop.eup %6724  ;;  %v4448_v31 = vpop.permute.xlu1 %4447 }
 0x2bf   : > { %v4442_v63 = vpop.permute.xlu0 %4441  ;;  %v4524_v11 = vmul.f32 %v8272_v30, %v4448_v31  ;;  %6734 = vrcp.f32 %v4022_v10 }
 0x2c0   : > { %v4521_v50 = vmul.f32 %v8269_v62, %v4442_v63  ;;  %v8277_v36 = vpop.eup %6726 }
 0x2c1   : > { %4627 = vrot.lane.b32.xlu1 %v4524_v11, %s6832_s9 }
 0x2c2   : > { %4621 = vrot.lane.b32.xlu0 %v4521_v50, %s6832_s9  ;;  %v4444_v49 = vpop.permute.xlu1 %4443  ;;  %v8280_v40 = vpop.eup %6728 }
 0x2c3   : > { %v4522_v58 = vmul.f32 %v8277_v36, %v4444_v49  ;;  %v4454_v0 = vpop.permute.xlu0 %4453 }
 0x2c4   : > { %v4527_v9 = vmul.f32 %v8280_v40, %v4454_v0  ;;  %v8285_v63 = vpop.eup %6730  ;;  %v4315_v0 = vmul.f32 %v8126_v52, %v7883_v53  ;;  %v4319_v53 = vmul.f32 %v8143_v25, %v7921_v60  ;;  %v4320_v60 = vmul.f32 %v8155_v18, %v7938_v27 }
 0x2c5   : > { %4623 = vrot.lane.b32.xlu1 %v4522_v58, %s6832_s9  ;;  %8818 = vst [vmem:[#allocation18_spill] sm:$0xff] %v8285_v63 }
 0x2c6   : > { %4633 = vrot.lane.b32.xlu0 %v4527_v9, %s6832_s9  ;;  %v8288_v37 = vpop.eup %6732  ;;  %v4456_v50 = vpop.permute.xlu1 %4455 }
 0x2c7   : > { %v4450_v24 = vpop.permute.xlu0 %4449  ;;  %8819 = vst [vmem:[#allocation19_spill] sm:$0xff] %v8288_v37  ;;  %v4528_v31 = vmul.f32 %v8288_v37, %v4456_v50  ;;  %v4313_v50 = vmul.f32 %v8134_v14, %v7873_v1 }
 0x2c8   : > { %v4525_v11 = vmul.f32 %v8285_v63, %v4450_v24 }
 0x2c9   : > { %4635 = vrot.lane.b32.xlu1 %v4528_v31, %s6832_s9  ;;  %v8293_v10 = vpop.eup %6734 }
 0x2ca   : > { %4629 = vrot.lane.b32.xlu0 %v4525_v11, %s6832_s9  ;;  %v4452_v49 = vpop.permute.xlu1 %4451  ;;  %v4316_v11 = vmul.f32 %v8136_v59, %v7899_v20 }
 0x2cb   : > { %v4526_v58 = vmul.f32 %v8293_v10, %v4452_v49 }
 0x2cd   : > { %4631 = vrot.lane.b32.xlu1 %v4526_v58, %s6832_s9  ;;  %v4314_v58 = vmul.f32 %v8146_v44, %v7890_v43 }
 0x2eb   : > { %v4570_v9 = vpop.permute.xlu0 %4569 }
 0x2ec   : > { %v8299_v24 = vadd.f32 %v4570_v9, %v4315_v0 }
 0x2ed   : > { %v4572_v37 = vpop.permute.xlu1 %4571 }
 0x2ee   : > { %6736 = vtanh.f32 %v8299_v24  ;;  %v8308_v49 = vadd.f32 %v4572_v37, %v4316_v11  ;;  %v4317_v37 = vmul.f32 %v8151_v47, %v7906_v56 }
 0x2ef   : > { %v4566_v31 = vpop.permute.xlu0 %4565 }
 0x2f0   : > { %v8306_v63 = vadd.f32 %v4566_v31, %v4313_v50  ;;  %8820 = vst [vmem:[#allocation20_spill] sm:$0xff] %v8308_v49 }
 0x2f2   : > { %6738 = vtanh.f32 %v8306_v63 }
 0x2f3   : > { %6740 = vtanh.f32 %v8308_v49  ;;  %v4578_v1 = vpop.permute.xlu0 %4577 }
 0x2f4   : > { %v4568_v0 = vpop.permute.xlu1 %4567  ;;  %v8316_v9 = vadd.f32 %v4578_v1, %v4319_v53  ;;  %v4318_v53 = vmul.f32 %v8162_v6, %v7918_v7 }
 0x2f5   : > { %v8318_v20 = vadd.f32 %v4568_v0, %v4314_v58  ;;  %v4323_v0 = vmul.f32 %v8164_v17, %v7961_v8 }
 0x2f6   : > { %6742 = vtanh.f32 %v8316_v9 }
 0x2f7   : > { %6744 = vtanh.f32 %v8318_v20  ;;  %v4574_v50 = vpop.permute.xlu0 %4573 }
 0x2f8   : > { %v6737_v43 = vpop.eup %6736  ;;  %v4580_v11 = vpop.permute.xlu1 %4579  ;;  %v8326_v31 = vadd.f32 %v4574_v50, %v4317_v37 }
 0x2f9   : > { %v8328_v49 = vadd.f32 %v4580_v11, %v4320_v60  ;;  %4785 = vrot.lane.b32.xlu0 %v6737_v43, %s6832_s9  ;;  %v4321_v11 = vmul.f32 %v8172_v32, %v7941_v39  ;;  %v4322_v39 = vmul.f32 %v8182_v46, %v7958_v48  ;;  %v4325_v48 = vmul.f32 %v8191_v28, %v7975_v42 }
 0x2fa   : > { %6746 = vtanh.f32 %v8326_v31  ;;  %v4326_v42 = vmul.f32 %v8202_v19, %v7990_v23  ;;  %v4329_v23 = vmul.f32 %v8213_v2, %v8010_v33  ;;  %v8824_v33 = vld [vmem:[#allocation2_spill] sm:$0xff] }
 0x2fb   : > { %6748 = vtanh.f32 %v8328_v49  ;;  %v4586_v60 = vpop.permute.xlu0 %4585 }
 0x2fc   : > { %v6739_v56 = vpop.eup %6738  ;;  %v4576_v58 = vpop.permute.xlu1 %4575  ;;  %v8342_v43 = vadd.f32 %v4586_v60, %v4323_v0  ;;  %v4327_v60 = vmul.f32 %v8186_v41, %v7993_v35 }
 0x2fd   : > { %v6741_v27 = vpop.eup %6740  ;;  %4781 = vrot.lane.b32.xlu0 %v6739_v56, %s6832_s9  ;;  %v8336_v1 = vadd.f32 %v4576_v58, %v4318_v53 }
 0x2fe   : > { %4787 = vrot.lane.b32.xlu1 %v6741_v27, %s6832_s9  ;;  %v4324_v27 = vmul.f32 %v8177_v12, %v7973_v5 }
 0x2ff   : > { %6750 = vtanh.f32 %v8336_v1  ;;  %v4582_v53 = vpop.permute.xlu0 %4581 }
 0x300   : > { %v6743_v37 = vpop.eup %6742  ;;  %6752 = vtanh.f32 %v8342_v43  ;;  %v8350_v8 = vadd.f32 %v4582_v53, %v4321_v11  ;;  %v4588_v58 = vpop.permute.xlu1 %4587  ;;  %v4328_v53 = vmul.f32 %v8195_v13, %v8007_v61 }
 0x301   : > { %v6745_v50 = vpop.eup %6744  ;;  %4793 = vrot.lane.b32.xlu0 %v6743_v37, %s6832_s9  ;;  %v8356_v0 = vadd.f32 %v4588_v58, %v4324_v27 }
 0x302   : > { %4783 = vrot.lane.b32.xlu1 %v6745_v50, %s6832_s9  ;;  %6754 = vtanh.f32 %v8350_v8 }
 0x303   : > { %6756 = vtanh.f32 %v8356_v0 }
 0x304   : > { %v6747_v7 = vpop.eup %6746  ;;  %v4584_v50 = vpop.permute.xlu1 %4583 }
 0x305   : > { %v6749_v56 = vpop.eup %6748  ;;  %4789 = vrot.lane.b32.xlu0 %v6747_v7, %s6832_s9  ;;  %v8364_v11 = vadd.f32 %v4584_v50, %v4322_v39  ;;  %v4594_v5 = vpop.permute.xlu0 %4593 }
 0x306   : > { %4795 = vrot.lane.b32.xlu1 %v6749_v56, %s6832_s9  ;;  %v8366_v56 = vadd.f32 %v4594_v5, %v4327_v60 }
 0x307   : > { %6758 = vtanh.f32 %v8364_v11 }
 0x308   : > { %6760 = vtanh.f32 %v8366_v56 }
 0x309   : > { %v6751_v37 = vpop.eup %6750  ;;  %v4590_v35 = vpop.permute.xlu0 %4589 }
 0x30a   : > { %4791 = vrot.lane.b32.xlu1 %v6751_v37, %s6832_s9  ;;  %v6753_v7 = vpop.eup %6752  ;;  %v8375_v37 = vadd.f32 %v4590_v35, %v4325_v48 }
 0x30b   : > { %4801 = vrot.lane.b32.xlu0 %v6753_v7, %s6832_s9  ;;  %v4331_v7 = vmul.f32 %v8207_v4, %v8026_v26  ;;  %v4332_v26 = vmul.f32 %v8217_v57, %v8038_v21  ;;  %v8825_v21 = vld [vmem:[#allocation5_spill] sm:$0xff] }
 0x30c   : > { %v6755_v27 = vpop.eup %6754  ;;  %6762 = vtanh.f32 %v8375_v37 }
 0x30d   : > { %v6757_v60 = vpop.eup %6756 }
 0x30e   : > { %v4596_v58 = vpop.permute.xlu1 %4595  ;;  %4803 = vrot.lane.b32.xlu1 %v6757_v60, %s6832_s9 }
 0x30f   : > { %v8377_v39 = vadd.f32 %v4596_v58, %v4328_v53  ;;  %4797 = vrot.lane.b32.xlu0 %v6755_v27, %s6832_s9 }
 0x310   : > { %v4602_v48 = vpop.permute.xlu0 %4601 }
 0x311   : > { %6764 = vtanh.f32 %v8377_v39  ;;  %v6759_v5 = vpop.eup %6758  ;;  %v8390_v35 = vadd.f32 %v4602_v48, %v4331_v7 }
 0x312   : > { %v4592_v50 = vpop.permute.xlu1 %4591  ;;  %v6761_v53 = vpop.eup %6760  ;;  %4799 = vrot.lane.b32.xlu1 %v6759_v5, %s6832_s9  ;;  %v4330_v5 = vmul.f32 %v8223_v55, %v8824_v33 }
 0x313   : > { %v8385_v61 = vadd.f32 %v4592_v50, %v4326_v42  ;;  %8821 = vst [vmem:[#allocation21_spill] sm:$0xff] %v8390_v35  ;;  %4809 = vrot.lane.b32.xlu0 %v6761_v53, %s6832_s9 }
 0x315   : > { %6766 = vtanh.f32 %v8385_v61 }
 0x316   : > { %6768 = vtanh.f32 %v8390_v35  ;;  %v4598_v27 = vpop.permute.xlu0 %4597  ;;  %v6763_v58 = vpop.eup %6762 }
 0x317   : > { %v8399_v60 = vadd.f32 %v4598_v27, %v4329_v23  ;;  %4805 = vrot.lane.b32.xlu0 %v6763_v58, %s6832_s9  ;;  %v4335_v23 = vmul.f32 %v8227_v51, %v8825_v21  ;;  %v8829_v21 = vld [vmem:[#allocation6_spill] sm:$0xff] }
 0x318   : > { %v4604_v50 = vpop.permute.xlu1 %4603 }
 0x319   : > { %8822 = vst [vmem:[#allocation22_spill] sm:$0xff] %v8399_v60  ;;  %v8402_v7 = vadd.f32 %v4604_v50, %v4332_v26  ;;  %6770 = vtanh.f32 %v8399_v60 }
 0x31b   : > { %v6765_v42 = vpop.eup %6764  ;;  %8823 = vst [vmem:[#allocation23_spill] sm:$0xff] %v8402_v7  ;;  %6772 = vtanh.f32 %v8402_v7 }
 0x31c   : > { %4811 = vrot.lane.b32.xlu1 %v6765_v42, %s6832_s9  ;;  %v8828_v42 = vld [vmem:[#allocation3_spill] sm:$0xff] }
 0x31d   : > { %v4600_v53 = vpop.permute.xlu1 %4599  ;;  %v4333_v33 = vmul.f32 %v8233_v38, %v8828_v42 }
 0x31e   : > { %v8411_v27 = vadd.f32 %v4600_v53, %v4330_v5  ;;  %v4336_v5 = vmul.f32 %v8237_v34, %v8829_v21 }
 0x31f   : > { %v6767_v48 = vpop.eup %6766 }
 0x320   : > { %8826 = vst [vmem:[#allocation2_spill] sm:$0xff] %v8411_v27  ;;  %4807 = vrot.lane.b32.xlu1 %v6767_v48, %s6832_s9  ;;  %v4610_v58 = vpop.permute.xlu0 %4609  ;;  %v6769_v26 = vpop.eup %6768  ;;  %6774 = vtanh.f32 %v8411_v27 }
 0x321   : > { %v8415_v50 = vadd.f32 %v4610_v58, %v4335_v23  ;;  %4817 = vrot.lane.b32.xlu0 %v6769_v26, %s6832_s9  ;;  %v8832_v58 = vld [vmem:[#allocation4_spill] sm:$0xff] }
 0x322   : > { %v4334_v26 = vmul.f32 %v8243_v45, %v8832_v58 }
 0x323   : > { %8827 = vst [vmem:[#allocation5_spill] sm:$0xff] %v8415_v50  ;;  %6776 = vtanh.f32 %v8415_v50  ;;  %v6771_v60 = vpop.eup %6770  ;;  %v4612_v48 = vpop.permute.xlu1 %4611 }
 0x324   : > { %v4606_v7 = vpop.permute.xlu0 %4605  ;;  %v8426_v23 = vadd.f32 %v4612_v48, %v4336_v5 }
 0x325   : > { %v8423_v53 = vadd.f32 %v4606_v7, %v4333_v33  ;;  %4813 = vrot.lane.b32.xlu0 %v6771_v60, %s6832_s9  ;;  %v6773_v27 = vpop.eup %6772  ;;  %v4339_v7 = vmul.f32 %v8247_v16, %v8085_v22  ;;  %v8836_v22 = vld [vmem:[#allocation9_spill] sm:$0xff] }
 0x326   : > { %8831 = vst [vmem:[#allocation6_spill] sm:$0xff] %v8426_v23  ;;  %4819 = vrot.lane.b32.xlu1 %v6773_v27, %s6832_s9  ;;  %v8835_v27 = vld [vmem:[#allocation7_spill] sm:$0xff] }
 0x327   : > { %8830 = vst [vmem:[#allocation3_spill] sm:$0xff] %v8423_v53  ;;  %6778 = vtanh.f32 %v8423_v53  ;;  %v4608_v42 = vpop.permute.xlu1 %4607  ;;  %v4337_v48 = vmul.f32 %v8253_v15, %v8835_v27 }
 0x328   : > { %6780 = vtanh.f32 %v8426_v23  ;;  %v8435_v33 = vadd.f32 %v4608_v42, %v4334_v26  ;;  %v4618_v60 = vpop.permute.xlu0 %4617  ;;  %v4340_v26 = vmul.f32 %v8256_v29, %v8836_v22  ;;  %v8840_v22 = vld [vmem:[#allocation12_spill] sm:$0xff] }
 0x329   : > { %v8439_v5 = vadd.f32 %v4618_v60, %v4339_v7  ;;  %v8839_v60 = vld [vmem:[#allocation8_spill] sm:$0xff] }
 0x32a   : > { %v6775_v50 = vpop.eup %6774  ;;  %8833 = vst [vmem:[#allocation4_spill] sm:$0xff] %v8435_v33  ;;  %6782 = vtanh.f32 %v8435_v33 }
 0x32b   : > { %4815 = vrot.lane.b32.xlu1 %v6775_v50, %s6832_s9  ;;  %8834 = vst [vmem:[#allocation24_spill] sm:$0xff] %v8439_v5  ;;  %6784 = vtanh.f32 %v8439_v5  ;;  %v4620_v50 = vpop.permute.xlu1 %4619 }
 0x32c   : > { %v4614_v58 = vpop.permute.xlu0 %4613  ;;  %v8450_v7 = vadd.f32 %v4620_v50, %v4340_v26 }
 0x32d   : > { %v6777_v21 = vpop.eup %6776  ;;  %v8447_v42 = vadd.f32 %v4614_v58, %v4337_v48  ;;  %v4343_v48 = vmul.f32 %v8264_v3, %v8840_v22  ;;  %v8844_v22 = vld [vmem:[#allocation13_spill] sm:$0xff] }
 0x32e   : > { %4825 = vrot.lane.b32.xlu0 %v6777_v21, %s6832_s9  ;;  %8838 = vst [vmem:[#allocation9_spill] sm:$0xff] %v8450_v7  ;;  %v4338_v21 = vmul.f32 %v8261_v54, %v8839_v60 }
 0x32f   : > { %8837 = vst [vmem:[#allocation7_spill] sm:$0xff] %v8447_v42  ;;  %6786 = vtanh.f32 %v8447_v42  ;;  %v4616_v27 = vpop.permute.xlu1 %4615 }
 0x330   : > { %6788 = vtanh.f32 %v8450_v7  ;;  %v8459_v58 = vadd.f32 %v4616_v27, %v4338_v21  ;;  %v4344_v21 = vmul.f32 %v8272_v30, %v8844_v22  ;;  %v8848_v22 = vld [vmem:[#allocation16_spill] sm:$0xff] }
 0x331   : > { %v6779_v23 = vpop.eup %6778 }
 0x332   : > { %4821 = vrot.lane.b32.xlu0 %v6779_v23, %s6832_s9  ;;  %v6781_v33 = vpop.eup %6780  ;;  %8841 = vst [vmem:[#allocation8_spill] sm:$0xff] %v8459_v58  ;;  %v4626_v23 = vpop.permute.xlu0 %4625  ;;  %6790 = vtanh.f32 %v8459_v58 }
 0x333   : > { %4827 = vrot.lane.b32.xlu1 %v6781_v33, %s6832_s9  ;;  %v8463_v50 = vadd.f32 %v4626_v23, %v4343_v48  ;;  %v8843_v33 = vld [vmem:[#allocation10_spill] sm:$0xff]  ;;  %v8847_v23 = vld [vmem:[#allocation11_spill] sm:$0xff] }
 0x334   : > { %v6783_v5 = vpop.eup %6782  ;;  %v4341_v60 = vmul.f32 %v8269_v62, %v8843_v33 }
 0x335   : > { %v6785_v26 = vpop.eup %6784  ;;  %8842 = vst [vmem:[#allocation12_spill] sm:$0xff] %v8463_v50  ;;  %6792 = vtanh.f32 %v8463_v50 }
 0x336   : > { %4833 = vrot.lane.b32.xlu0 %v6785_v26, %s6832_s9  ;;  %v4622_v7 = vpop.permute.xlu0 %4621  ;;  %v4342_v26 = vmul.f32 %v8277_v36, %v8847_v23  ;;  %v8852_v23 = vld [vmem:[#allocation18_spill] sm:$0xff] }
 0x337   : > { %4823 = vrot.lane.b32.xlu1 %v6783_v5, %s6832_s9  ;;  %v8471_v27 = vadd.f32 %v4622_v7, %v4341_v60  ;;  %v4628_v5 = vpop.permute.xlu1 %4627  ;;  %v4347_v7 = vmul.f32 %v8280_v40, %v8848_v22  ;;  %v8853_v22 = vld [vmem:[#allocation17_spill] sm:$0xff] }
 0x338   : > { %v8474_v48 = vadd.f32 %v4628_v5, %v4344_v21 }
 0x339   : > { %v6787_v42 = vpop.eup %6786  ;;  %8845 = vst [vmem:[#allocation10_spill] sm:$0xff] %v8471_v27  ;;  %6794 = vtanh.f32 %v8471_v27 }
 0x33a   : > { %4829 = vrot.lane.b32.xlu0 %v6787_v42, %s6832_s9  ;;  %v6789_v58 = vpop.eup %6788  ;;  %8846 = vst [vmem:[#allocation13_spill] sm:$0xff] %v8474_v48  ;;  %6796 = vtanh.f32 %v8474_v48  ;;  %v4634_v42 = vpop.permute.xlu0 %4633 }
 0x33b   : > { %4835 = vrot.lane.b32.xlu1 %v6789_v58, %s6832_s9  ;;  %v4624_v33 = vpop.permute.xlu1 %4623  ;;  %v8487_v5 = vadd.f32 %v4634_v42, %v4347_v7  ;;  %v8851_v58 = vld [vmem:[#allocation14_spill] sm:$0xff]  ;;  %v8855_v42 = vld [vmem:[#allocation15_spill] sm:$0xff] }
 0x33c   : > { %v6791_v50 = vpop.eup %6790  ;;  %v8483_v60 = vadd.f32 %v4624_v33, %v4342_v26  ;;  %v4345_v48 = vmul.f32 %v8852_v23, %v8851_v58  ;;  %v8854_v26 = vld [vmem:[#allocation19_spill] sm:$0xff] }
 0x33d   : > { %8850 = vst [vmem:[#allocation16_spill] sm:$0xff] %v8487_v5  ;;  %v4348_v33 = vmul.f32 %v8854_v26, %v8853_v22 }
 0x33e   : > { %8849 = vst [vmem:[#allocation11_spill] sm:$0xff] %v8483_v60  ;;  %6798 = vtanh.f32 %v8483_v60  ;;  %v4630_v27 = vpop.permute.xlu0 %4629 }
 0x33f   : > { %4831 = vrot.lane.b32.xlu1 %v6791_v50, %s6832_s9  ;;  %v6793_v21 = vpop.eup %6792  ;;  %6800 = vtanh.f32 %v8487_v5  ;;  %v8495_v35 = vadd.f32 %v4630_v27, %v4345_v48  ;;  %v4636_v50 = vpop.permute.xlu1 %4635 }
 0x340   : > { %4841 = vrot.lane.b32.xlu0 %v6793_v21, %s6832_s9  ;;  %v8498_v7 = vadd.f32 %v4636_v50, %v4348_v33  ;;  %v4346_v21 = vmul.f32 %v8293_v10, %v8855_v42 }
 0x341   : > { %6802 = vtanh.f32 %v8495_v35 }
 0x342   : > { %6804 = vtanh.f32 %v8498_v7 }
 0x343   : > { %v6795_v53 = vpop.eup %6794  ;;  %v4632_v58 = vpop.permute.xlu1 %4631 }
 0x344   : > { %4837 = vrot.lane.b32.xlu0 %v6795_v53, %s6832_s9  ;;  %v6797_v60 = vpop.eup %6796  ;;  %v8505_v22 = vadd.f32 %v4632_v58, %v4346_v21 }
 0x345   : > { %4843 = vrot.lane.b32.xlu1 %v6797_v60, %s6832_s9 }
 0x346   : > { %6806 = vtanh.f32 %v8505_v22 }
 0x348   : > { %v6799_v5 = vpop.eup %6798 }
 0x349   : > { %4839 = vrot.lane.b32.xlu1 %v6799_v5, %s6832_s9  ;;  %v6801_v27 = vpop.eup %6800 }
 0x34a   : > { %4849 = vrot.lane.b32.xlu0 %v6801_v27, %s6832_s9 }
 0x34b   : > { %v6803_v53 = vpop.eup %6802 }
 0x34c   : > { %v6805_v48 = vpop.eup %6804 }
 0x34d   : > { %4851 = vrot.lane.b32.xlu1 %v6805_v48, %s6832_s9 }
 0x34e   : > { %4845 = vrot.lane.b32.xlu0 %v6803_v53, %s6832_s9 }
 0x350   : > { %v6807_v60 = vpop.eup %6806 }
 0x351   : > { %4847 = vrot.lane.b32.xlu1 %v6807_v60, %s6832_s9 }
 0x36b   : > { %v4786_v33 = vpop.permute.xlu0 %4785 }
 0x36c   : > { %v4891_v50 = vmul.f32 %v8126_v52, %v4786_v33 }
 0x36e   : > { %4965 = vrot.lane.b32.xlu0 %v4891_v50, %s6833_s17 }
 0x36f   : > { %v4782_v5 = vpop.permute.xlu0 %4781 }
 0x370   : > { %v4788_v42 = vpop.permute.xlu1 %4787  ;;  %v4889_v21 = vmul.f32 %v8134_v14, %v4782_v5 }
 0x371   : > { %v4892_v58 = vmul.f32 %v8136_v59, %v4788_v42 }
 0x372   : > { %4961 = vrot.lane.b32.xlu0 %v4889_v21, %s6833_s17 }
 0x373   : > { %4967 = vrot.lane.b32.xlu1 %v4892_v58, %s6833_s17  ;;  %v4794_v27 = vpop.permute.xlu0 %4793 }
 0x374   : > { %v4784_v53 = vpop.permute.xlu1 %4783  ;;  %v4895_v48 = vmul.f32 %v8143_v25, %v4794_v27 }
 0x375   : > { %v4890_v60 = vmul.f32 %v8146_v44, %v4784_v53 }
 0x376   : > { %4973 = vrot.lane.b32.xlu0 %v4895_v48, %s6833_s17 }
 0x377   : > { %4963 = vrot.lane.b32.xlu1 %v4890_v60, %s6833_s17  ;;  %v4790_v52 = vpop.permute.xlu0 %4789 }
 0x378   : > { %v4796_v33 = vpop.permute.xlu1 %4795  ;;  %v4893_v14 = vmul.f32 %v8151_v47, %v4790_v52 }
 0x379   : > { %v4896_v59 = vmul.f32 %v8155_v18, %v4796_v33 }
 0x37a   : > { %4969 = vrot.lane.b32.xlu0 %v4893_v14, %s6833_s17 }
 0x37b   : > { %4975 = vrot.lane.b32.xlu1 %v4896_v59, %s6833_s17 }
 0x37c   : > { %v4792_v50 = vpop.permute.xlu1 %4791 }
 0x37d   : > { %v4894_v5 = vmul.f32 %v8162_v6, %v4792_v50  ;;  %v4802_v25 = vpop.permute.xlu0 %4801 }
 0x37e   : > { %v4899_v44 = vmul.f32 %v8164_v17, %v4802_v25 }
 0x37f   : > { %4971 = vrot.lane.b32.xlu1 %v4894_v5, %s6833_s17 }
 0x380   : > { %4981 = vrot.lane.b32.xlu0 %v4899_v44, %s6833_s17  ;;  %v4804_v47 = vpop.permute.xlu1 %4803 }
 0x381   : > { %v4798_v42 = vpop.permute.xlu0 %4797  ;;  %v4900_v18 = vmul.f32 %v8177_v12, %v4804_v47 }
 0x382   : > { %v4897_v21 = vmul.f32 %v8172_v32, %v4798_v42 }
 0x383   : > { %4983 = vrot.lane.b32.xlu1 %v4900_v18, %s6833_s17 }
 0x384   : > { %4977 = vrot.lane.b32.xlu0 %v4897_v21, %s6833_s17  ;;  %v4800_v58 = vpop.permute.xlu1 %4799 }
 0x385   : > { %v4898_v6 = vmul.f32 %v8182_v46, %v4800_v58  ;;  %v4810_v27 = vpop.permute.xlu0 %4809 }
 0x386   : > { %v4903_v53 = vmul.f32 %v8186_v41, %v4810_v27 }
 0x387   : > { %4979 = vrot.lane.b32.xlu1 %v4898_v6, %s6833_s17 }
 0x388   : > { %4989 = vrot.lane.b32.xlu0 %v4903_v53, %s6833_s17 }
 0x389   : > { %v4806_v17 = vpop.permute.xlu0 %4805 }
 0x38a   : > { %v4901_v32 = vmul.f32 %v8191_v28, %v4806_v17 }
 0x38c   : > { %4985 = vrot.lane.b32.xlu0 %v4901_v32, %s6833_s17 }
 0x38e   : > { %v4812_v48 = vpop.permute.xlu1 %4811 }
 0x38f   : > { %v4904_v60 = vmul.f32 %v8195_v13, %v4812_v48 }
 0x391   : > { %4991 = vrot.lane.b32.xlu1 %v4904_v60, %s6833_s17 }
 0x392   : > { %v4808_v12 = vpop.permute.xlu1 %4807 }
 0x393   : > { %v4902_v46 = vmul.f32 %v8202_v19, %v4808_v12  ;;  %v4818_v52 = vpop.permute.xlu0 %4817 }
 0x394   : > { %v4907_v41 = vmul.f32 %v8207_v4, %v4818_v52 }
 0x395   : > { %4987 = vrot.lane.b32.xlu1 %v4902_v46, %s6833_s17 }
 0x396   : > { %4997 = vrot.lane.b32.xlu0 %v4907_v41, %s6833_s17  ;;  %v8858_v41 = vld [vmem:[#allocation22_spill] sm:$0xff] }
 0x397   : > { %v4814_v33 = vpop.permute.xlu0 %4813 }
 0x398   : > { %v4905_v14 = vmul.f32 %v8213_v2, %v4814_v33  ;;  %v4820_v28 = vpop.permute.xlu1 %4819 }
 0x399   : > { %v4908_v13 = vmul.f32 %v8217_v57, %v4820_v28 }
 0x39a   : > { %4993 = vrot.lane.b32.xlu0 %v4905_v14, %s6833_s17  ;;  %v8860_v14 = vld [vmem:[#allocation2_spill] sm:$0xff] }
 0x39b   : > { %4999 = vrot.lane.b32.xlu1 %v4908_v13, %s6833_s17  ;;  %v8861_v13 = vld [vmem:[#allocation5_spill] sm:$0xff] }
 0x39d   : > { %v4816_v59 = vpop.permute.xlu1 %4815 }
 0x39e   : > { %v4906_v19 = vmul.f32 %v8223_v55, %v4816_v59 }
 0x3a0   : > { %v4826_v50 = vpop.permute.xlu0 %4825  ;;  %4995 = vrot.lane.b32.xlu1 %v4906_v19, %s6833_s17 }
 0x3a1   : > { %v4911_v5 = vmul.f32 %v8227_v51, %v4826_v50  ;;  %v8862_v50 = vld [vmem:[#allocation3_spill] sm:$0xff] }
 0x3a3   : > { %5005 = vrot.lane.b32.xlu0 %v4911_v5, %s6833_s17  ;;  %v8863_v5 = vld [vmem:[#allocation6_spill] sm:$0xff] }
 0x3a4   : > { %v4822_v4 = vpop.permute.xlu0 %4821 }
 0x3a5   : > { %v4909_v2 = vmul.f32 %v8233_v38, %v4822_v4  ;;  %v4828_v25 = vpop.permute.xlu1 %4827 }
 0x3a6   : > { %v4912_v57 = vmul.f32 %v8237_v34, %v4828_v25 }
 0x3a7   : > { %5001 = vrot.lane.b32.xlu0 %v4909_v2, %s6833_s17  ;;  %v8864_v2 = vld [vmem:[#allocation4_spill] sm:$0xff] }
 0x3a8   : > { %5007 = vrot.lane.b32.xlu1 %v4912_v57, %s6833_s17  ;;  %v4834_v42 = vpop.permute.xlu0 %4833  ;;  %v8865_v57 = vld [vmem:[#allocation24_spill] sm:$0xff] }
 0x3a9   : > { %v4824_v44 = vpop.permute.xlu1 %4823  ;;  %v4915_v51 = vmul.f32 %v8247_v16, %v4834_v42  ;;  %v8866_v42 = vld [vmem:[#allocation7_spill] sm:$0xff] }
 0x3aa   : > { %v4910_v55 = vmul.f32 %v8243_v45, %v4824_v44 }
 0x3ab   : > { %5013 = vrot.lane.b32.xlu0 %v4915_v51, %s6833_s17  ;;  %v8867_v51 = vld [vmem:[#allocation9_spill] sm:$0xff] }
 0x3ac   : > { %5003 = vrot.lane.b32.xlu1 %v4910_v55, %s6833_s17  ;;  %v4830_v21 = vpop.permute.xlu0 %4829 }
 0x3ad   : > { %v4913_v38 = vmul.f32 %v8253_v15, %v4830_v21  ;;  %v4836_v47 = vpop.permute.xlu1 %4835 }
 0x3ae   : > { %v4916_v34 = vmul.f32 %v8256_v29, %v4836_v47 }
 0x3af   : > { %5009 = vrot.lane.b32.xlu0 %v4913_v38, %s6833_s17  ;;  %v8868_v38 = vld [vmem:[#allocation8_spill] sm:$0xff] }
 0x3b0   : > { %5015 = vrot.lane.b32.xlu1 %v4916_v34, %s6833_s17  ;;  %v8869_v34 = vld [vmem:[#allocation12_spill] sm:$0xff] }
 0x3b1   : > { %v4832_v18 = vpop.permute.xlu1 %4831 }
 0x3b2   : > { %v4914_v45 = vmul.f32 %v8261_v54, %v4832_v18  ;;  %v4842_v58 = vpop.permute.xlu0 %4841 }
 0x3b3   : > { %v4919_v16 = vmul.f32 %v8264_v3, %v4842_v58  ;;  %v8870_v58 = vld [vmem:[#allocation10_spill] sm:$0xff] }
 0x3b4   : > { %5011 = vrot.lane.b32.xlu1 %v4914_v45, %s6833_s17 }
 0x3b5   : > { %5021 = vrot.lane.b32.xlu0 %v4919_v16, %s6833_s17  ;;  %v8871_v16 = vld [vmem:[#allocation13_spill] sm:$0xff] }
 0x3b6   : > { %v4838_v6 = vpop.permute.xlu0 %4837 }
 0x3b7   : > { %v4917_v15 = vmul.f32 %v8269_v62, %v4838_v6  ;;  %v4844_v27 = vpop.permute.xlu1 %4843 }
 0x3b8   : > { %v4920_v29 = vmul.f32 %v8272_v30, %v4844_v27 }
 0x3b9   : > { %5017 = vrot.lane.b32.xlu0 %v4917_v15, %s6833_s17  ;;  %v8872_v15 = vld [vmem:[#allocation11_spill] sm:$0xff] }
 0x3ba   : > { %5023 = vrot.lane.b32.xlu1 %v4920_v29, %s6833_s17 }
 0x3bb   : > { %v4840_v53 = vpop.permute.xlu1 %4839 }
 0x3bc   : > { %v4918_v54 = vmul.f32 %v8277_v36, %v4840_v53  ;;  %v4850_v17 = vpop.permute.xlu0 %4849 }
 0x3bd   : > { %v4923_v62 = vmul.f32 %v8280_v40, %v4850_v17 }
 0x3be   : > { %5019 = vrot.lane.b32.xlu1 %v4918_v54, %s6833_s17  ;;  %v8873_v54 = vld [vmem:[#allocation16_spill] sm:$0xff] }
 0x3bf   : > { %v4852_v32 = vpop.permute.xlu1 %4851 }
 0x3c0   : > { %v4846_v3 = vpop.permute.xlu0 %4845  ;;  %v4924_v36 = vmul.f32 %v8854_v26, %v4852_v32  ;;  %v8856_v26 = vld [vmem:[#allocation20_spill] sm:$0xff] }
 0x3c1   : > { %v4921_v48 = vmul.f32 %v8852_v23, %v4846_v3 }
 0x3c3   : > { %5025 = vrot.lane.b32.xlu0 %v4921_v48, %s6833_s17  ;;  %v4848_v30 = vpop.permute.xlu1 %4847 }
 0x3c4   : > { %v4922_v60 = vmul.f32 %v8293_v10, %v4848_v30 }
 0x3c6   : > { %5027 = vrot.lane.b32.xlu1 %v4922_v60, %s6833_s17 }
 0x3c7   : > { %5029 = vrot.lane.b32.xlu0 %v4923_v62, %s6833_s17 }
 0x3ca   : > { %5031 = vrot.lane.b32.xlu1 %v4924_v36, %s6833_s17 }
 0x3e0   : > { %v4966_v40 = vpop.permute.xlu0 %4965 }
 0x3e1   : > { %5072 = vst.msk [vmem:[%s8590_s20 + $0x10] sm:$0xff] %vm5069_vm8, %v4966_v40 }
 0x3e2   : > { %5109 = vst.msk [vmem:[%s8590_s20 + $0x10] sm:$0xff] %vm5106_vm9, %v8299_v24 }
 0x3e4   : > { %v4962_v10 = vpop.permute.xlu0 %4961 }
 0x3e5   : > { %v4968_v23 = vpop.permute.xlu1 %4967  ;;  %5070 = vst.msk [vmem:[%s8590_s20] sm:$0xff] %vm5069_vm8, %v4962_v10 }
 0x3e6   : > { %5073 = vst.msk [vmem:[%s8590_s20 + $0x18] sm:$0xff] %vm5069_vm8, %v4968_v23 }
 0x3e7   : > { %5107 = vst.msk [vmem:[%s8590_s20] sm:$0xff] %vm5106_vm9, %v8306_v63  ;;  %5110 = vst.msk [vmem:[%s8590_s20 + $0x18] sm:$0xff] %vm5106_vm9, %v8856_v26 }
 0x3e8   : > { %v4974_v12 = vpop.permute.xlu0 %4973 }
 0x3e9   : > { %v4964_v24 = vpop.permute.xlu1 %4963  ;;  %5076 = vst.msk [vmem:[%s8590_s20 + $0x30] sm:$0xff] %vm5069_vm8, %v4974_v12 }
 0x3ea   : > { %5071 = vst.msk [vmem:[%s8590_s20 + $0x8] sm:$0xff] %vm5069_vm8, %v4964_v24 }
 0x3eb   : > { %5113 = vst.msk [vmem:[%s8590_s20 + $0x30] sm:$0xff] %vm5106_vm9, %v8316_v9  ;;  %5108 = vst.msk [vmem:[%s8590_s20 + $0x8] sm:$0xff] %vm5106_vm9, %v8318_v20 }
 0x3ec   : > { %v4970_v63 = vpop.permute.xlu0 %4969 }
 0x3ed   : > { %v4976_v46 = vpop.permute.xlu1 %4975  ;;  %5074 = vst.msk [vmem:[%s8590_s20 + $0x20] sm:$0xff] %vm5069_vm8, %v4970_v63 }
 0x3ee   : > { %5077 = vst.msk [vmem:[%s8590_s20 + $0x38] sm:$0xff] %vm5069_vm8, %v4976_v46 }
 0x3ef   : > { %5111 = vst.msk [vmem:[%s8590_s20 + $0x20] sm:$0xff] %vm5106_vm9, %v8326_v31  ;;  %5114 = vst.msk [vmem:[%s8590_s20 + $0x38] sm:$0xff] %vm5106_vm9, %v8328_v49 }
 0x3f1   : > { %v4972_v9 = vpop.permute.xlu1 %4971 }
 0x3f2   : > { %5075 = vst.msk [vmem:[%s8590_s20 + $0x28] sm:$0xff] %vm5069_vm8, %v4972_v9  ;;  %v4982_v20 = vpop.permute.xlu0 %4981 }
 0x3f3   : > { %5112 = vst.msk [vmem:[%s8590_s20 + $0x28] sm:$0xff] %vm5106_vm9, %v8336_v1 }
 0x3f4   : > { %5080 = vst.msk [vmem:[%s8590_s20 + $0x50] sm:$0xff] %vm5069_vm8, %v4982_v20 }
 0x3f5   : > { %5117 = vst.msk [vmem:[%s8590_s20 + $0x50] sm:$0xff] %vm5106_vm9, %v8342_v43  ;;  %v4984_v49 = vpop.permute.xlu1 %4983 }
 0x3f6   : > { %v4978_v31 = vpop.permute.xlu0 %4977  ;;  %5081 = vst.msk [vmem:[%s8590_s20 + $0x58] sm:$0xff] %vm5069_vm8, %v4984_v49 }
 0x3f7   : > { %5078 = vst.msk [vmem:[%s8590_s20 + $0x40] sm:$0xff] %vm5069_vm8, %v4978_v31 }
 0x3f8   : > { %5115 = vst.msk [vmem:[%s8590_s20 + $0x40] sm:$0xff] %vm5106_vm9, %v8350_v8  ;;  %5118 = vst.msk [vmem:[%s8590_s20 + $0x58] sm:$0xff] %vm5106_vm9, %v8356_v0 }
 0x3f9   : > { %v4980_v1 = vpop.permute.xlu1 %4979 }
 0x3fa   : > { %5079 = vst.msk [vmem:[%s8590_s20 + $0x48] sm:$0xff] %vm5069_vm8, %v4980_v1  ;;  %v4990_v43 = vpop.permute.xlu0 %4989 }
 0x3fb   : > { %5116 = vst.msk [vmem:[%s8590_s20 + $0x48] sm:$0xff] %vm5106_vm9, %v8364_v11 }
 0x3fc   : > { %5084 = vst.msk [vmem:[%s8590_s20 + $0x70] sm:$0xff] %vm5069_vm8, %v4990_v43 }
 0x3fd   : > { %5121 = vst.msk [vmem:[%s8590_s20 + $0x70] sm:$0xff] %vm5106_vm9, %v8366_v56  ;;  %v8857_v56 = vld [vmem:[#allocation21_spill] sm:$0xff] }
 0x3fe   : > { %v4986_v8 = vpop.permute.xlu0 %4985 }
 0x3ff   : > { %5082 = vst.msk [vmem:[%s8590_s20 + $0x60] sm:$0xff] %vm5069_vm8, %v4986_v8 }
 0x400   : > { %5119 = vst.msk [vmem:[%s8590_s20 + $0x60] sm:$0xff] %vm5106_vm9, %v8375_v37 }
 0x403   : > { %v4992_v52 = vpop.permute.xlu1 %4991 }
 0x404   : > { %5085 = vst.msk [vmem:[%s8590_s20 + $0x78] sm:$0xff] %vm5069_vm8, %v4992_v52 }
 0x405   : > { %5122 = vst.msk [vmem:[%s8590_s20 + $0x78] sm:$0xff] %vm5106_vm9, %v8377_v39 }
 0x407   : > { %v4988_v0 = vpop.permute.xlu1 %4987 }
 0x408   : > { %5083 = vst.msk [vmem:[%s8590_s20 + $0x68] sm:$0xff] %vm5069_vm8, %v4988_v0  ;;  %v4998_v11 = vpop.permute.xlu0 %4997 }
 0x409   : > { %5120 = vst.msk [vmem:[%s8590_s20 + $0x68] sm:$0xff] %vm5106_vm9, %v8385_v61  ;;  %v8859_v61 = vld [vmem:[#allocation23_spill] sm:$0xff] }
 0x40a   : > { %5088 = vst.msk [vmem:[%s8590_s20 + $0x90] sm:$0xff] %vm5069_vm8, %v4998_v11 }
 0x40b   : > { %5125 = vst.msk [vmem:[%s8590_s20 + $0x90] sm:$0xff] %vm5106_vm9, %v8857_v56 }
 0x40c   : > { %v4994_v37 = vpop.permute.xlu0 %4993 }
 0x40d   : > { %5086 = vst.msk [vmem:[%s8590_s20 + $0x80] sm:$0xff] %vm5069_vm8, %v4994_v37  ;;  %v5000_v39 = vpop.permute.xlu1 %4999 }
 0x40e   : > { %5123 = vst.msk [vmem:[%s8590_s20 + $0x80] sm:$0xff] %vm5106_vm9, %v8858_v41 }
 0x40f   : > { %5089 = vst.msk [vmem:[%s8590_s20 + $0x98] sm:$0xff] %vm5069_vm8, %v5000_v39 }
 0x410   : > { %5126 = vst.msk [vmem:[%s8590_s20 + $0x98] sm:$0xff] %vm5106_vm9, %v8859_v61 }
 0x412   : > { %v4996_v33 = vpop.permute.xlu1 %4995 }
 0x413   : > { %5087 = vst.msk [vmem:[%s8590_s20 + $0x88] sm:$0xff] %vm5069_vm8, %v4996_v33 }
 0x414   : > { %5124 = vst.msk [vmem:[%s8590_s20 + $0x88] sm:$0xff] %vm5106_vm9, %v8860_v14 }
 0x415   : > { %v5006_v28 = vpop.permute.xlu0 %5005 }
 0x416   : > { %5092 = vst.msk [vmem:[%s8590_s20 + $0xb0] sm:$0xff] %vm5069_vm8, %v5006_v28 }
 0x417   : > { %5129 = vst.msk [vmem:[%s8590_s20 + $0xb0] sm:$0xff] %vm5106_vm9, %v8861_v13 }
 0x419   : > { %v5002_v59 = vpop.permute.xlu0 %5001 }
 0x41a   : > { %5090 = vst.msk [vmem:[%s8590_s20 + $0xa0] sm:$0xff] %vm5069_vm8, %v5002_v59  ;;  %v5008_v19 = vpop.permute.xlu1 %5007 }
 0x41b   : > { %5127 = vst.msk [vmem:[%s8590_s20 + $0xa0] sm:$0xff] %vm5106_vm9, %v8862_v50 }
 0x41c   : > { %5093 = vst.msk [vmem:[%s8590_s20 + $0xb8] sm:$0xff] %vm5069_vm8, %v5008_v19 }
 0x41d   : > { %5130 = vst.msk [vmem:[%s8590_s20 + $0xb8] sm:$0xff] %vm5106_vm9, %v8863_v5  ;;  %v5014_v25 = vpop.permute.xlu0 %5013 }
 0x41e   : > { %v5004_v4 = vpop.permute.xlu1 %5003  ;;  %5096 = vst.msk [vmem:[%s8590_s20 + $0xd0] sm:$0xff] %vm5069_vm8, %v5014_v25 }
 0x41f   : > { %5091 = vst.msk [vmem:[%s8590_s20 + $0xa8] sm:$0xff] %vm5069_vm8, %v5004_v4 }
 0x420   : > { %5128 = vst.msk [vmem:[%s8590_s20 + $0xa8] sm:$0xff] %vm5106_vm9, %v8864_v2  ;;  %5133 = vst.msk [vmem:[%s8590_s20 + $0xd0] sm:$0xff] %vm5106_vm9, %v8865_v57 }
 0x421   : > { %v5010_v44 = vpop.permute.xlu0 %5009 }
 0x422   : > { %5094 = vst.msk [vmem:[%s8590_s20 + $0xc0] sm:$0xff] %vm5069_vm8, %v5010_v44  ;;  %v5016_v55 = vpop.permute.xlu1 %5015 }
 0x423   : > { %5131 = vst.msk [vmem:[%s8590_s20 + $0xc0] sm:$0xff] %vm5106_vm9, %v8866_v42 }
 0x424   : > { %5097 = vst.msk [vmem:[%s8590_s20 + $0xd8] sm:$0xff] %vm5069_vm8, %v5016_v55 }
 0x425   : > { %5134 = vst.msk [vmem:[%s8590_s20 + $0xd8] sm:$0xff] %vm5106_vm9, %v8867_v51 }
 0x426   : > { %v5012_v21 = vpop.permute.xlu1 %5011 }
 0x427   : > { %5095 = vst.msk [vmem:[%s8590_s20 + $0xc8] sm:$0xff] %vm5069_vm8, %v5012_v21  ;;  %v5022_v47 = vpop.permute.xlu0 %5021 }
 0x428   : > { %5132 = vst.msk [vmem:[%s8590_s20 + $0xc8] sm:$0xff] %vm5106_vm9, %v8868_v38 }
 0x429   : > { %5100 = vst.msk [vmem:[%s8590_s20 + $0xf0] sm:$0xff] %vm5069_vm8, %v5022_v47 }
 0x42a   : > { %5137 = vst.msk [vmem:[%s8590_s20 + $0xf0] sm:$0xff] %vm5106_vm9, %v8869_v34 }
 0x42b   : > { %v5018_v18 = vpop.permute.xlu0 %5017 }
 0x42c   : > { %5098 = vst.msk [vmem:[%s8590_s20 + $0xe0] sm:$0xff] %vm5069_vm8, %v5018_v18  ;;  %v5024_v45 = vpop.permute.xlu1 %5023 }
 0x42d   : > { %5135 = vst.msk [vmem:[%s8590_s20 + $0xe0] sm:$0xff] %vm5106_vm9, %v8870_v58 }
 0x42e   : > { %5101 = vst.msk [vmem:[%s8590_s20 + $0xf8] sm:$0xff] %vm5069_vm8, %v5024_v45 }
 0x42f   : > { %5138 = vst.msk [vmem:[%s8590_s20 + $0xf8] sm:$0xff] %vm5106_vm9, %v8871_v16 }
 0x430   : > { %v5020_v6 = vpop.permute.xlu1 %5019 }
 0x431   : > { %5099 = vst.msk [vmem:[%s8590_s20 + $0xe8] sm:$0xff] %vm5069_vm8, %v5020_v6 }
 0x432   : > { %5136 = vst.msk [vmem:[%s8590_s20 + $0xe8] sm:$0xff] %vm5106_vm9, %v8872_v15 }
 0x435   : > { %v5026_v27 = vpop.permute.xlu0 %5025 }
 0x436   : > { %5102 = vst.msk [vmem:[%s8590_s20 + $0x100] sm:$0xff] %vm5069_vm8, %v5026_v27 }
 0x437   : > { %5139 = vst.msk [vmem:[%s8590_s20 + $0x100] sm:$0xff] %vm5106_vm9, %v8495_v35 }
 0x438   : > { %v5028_v53 = vpop.permute.xlu1 %5027 }
 0x439   : > { %v5030_v29 = vpop.permute.xlu0 %5029  ;;  %5103 = vst.msk [vmem:[%s8590_s20 + $0x108] sm:$0xff] %vm5069_vm8, %v5028_v53 }
 0x43a   : > { %5104 = vst.msk [vmem:[%s8590_s20 + $0x110] sm:$0xff] %vm5069_vm8, %v5030_v29 }
 0x43b   : > { %5141 = vst.msk [vmem:[%s8590_s20 + $0x110] sm:$0xff] %vm5106_vm9, %v8873_v54  ;;  %5140 = vst.msk [vmem:[%s8590_s20 + $0x108] sm:$0xff] %vm5106_vm9, %v8505_v22 }
 0x43c   : > { %v5032_v17 = vpop.permute.xlu1 %5031 }
 0x43d   : > { %5105 = vst.msk [vmem:[%s8590_s20 + $0x118] sm:$0xff] %vm5069_vm8, %v5032_v17 }
 0x43e   : > { %5142 = vst.msk [vmem:[%s8590_s20 + $0x118] sm:$0xff] %vm5106_vm9, %v8498_v7 }
 0x43f PF: > { %s14_s15 = sadd.s32 1, %s6830_s15  }
 0x440   : > { %p11_p4 = scmp.ge.s32.totalorder %s14_s15, 4  }
 0x442   :  { %13 = sbr.rel (!%p11_p4) target bundleno = 1 (0x1), region = 77 }

</bundles_post_ra>
